<compile_context>
chip_gen: v7x
topology: tpu7x:2x2x1
jax: 0.10.0
libtpu: 0.0.40
codegen_flags: <defaults>
</compile_context>

<pallas_src>
import functools
import math

import jax
import jax.numpy as jnp
from jax.experimental import pallas as pl
from jax.experimental.pallas import tpu as pltpu


def _layernorm(x, gamma, beta, eps=1e-5):
    # PyTorch nn.LayerNorm: biased variance, eps inside sqrt. Computed in f32.
    mu = jnp.mean(x, axis=-1, keepdims=True)
    var = jnp.mean((x - mu) ** 2, axis=-1, keepdims=True)
    return (x - mu) * jax.lax.rsqrt(var + eps) * gamma + beta


def _default_vmem_limit_bytes():
    # Per-generation scoped-VMEM limit: ~100 MiB on 128-MiB parts (v5e/v6e),
    # capacity minus Mosaic-scratch headroom on 64-MiB parts (v7x).
    try:
        cap = int(pltpu.get_tpu_info().vmem_capacity_bytes)
    except Exception:
        return 56 * 1024 * 1024  # conservative, known-good fallback
    return max(32 * 1024 * 1024, min(cap - 12 * 1024 * 1024, 100 * 1024 * 1024))


def block_kernel(x_ref,
                 ln1g_ref, ln1b_ref,
                 wq_ref, bq_ref, wk_ref, bk_ref, wv_ref, bv_ref,
                 wproj_ref, bproj_ref,
                 ln2g_ref, ln2b_ref,
                 wfc1_ref, bfc1_ref,
                 wfc2_ref, bfc2_ref,
                 out_ref,
                 attn_scratch, x1_scratch,
                 *, heads, head_dim, mlp_chunk):
    # Per grid step: one batch element; batch dim is squeezed -> x_ref is (N, C).
    x = x_ref[...].astype(jnp.float32)                     # (N, C) f32
    N, C = x.shape
    hd = head_dim

    # ---- norm1 + q/k/v projections (bf16 MXU operands, f32 accumulation) -------------
    # Attention scale is pre-folded into wq/bq on the host.
    xn = _layernorm(x, ln1g_ref[...], ln1b_ref[...]).astype(jnp.bfloat16)
    q = (jnp.dot(xn, wq_ref[...], preferred_element_type=jnp.float32)
         + bq_ref[...]).astype(jnp.bfloat16)               # (N, C) bf16, pre-scaled
    k = (jnp.dot(xn, wk_ref[...], preferred_element_type=jnp.float32)
         + bk_ref[...]).astype(jnp.bfloat16)
    v = (jnp.dot(xn, wv_ref[...], preferred_element_type=jnp.float32)
         + bv_ref[...]).astype(jnp.bfloat16)

    # ---- attention: heads processed in pairs -> 2*hd-lane-wide scratch stores ---------
    # TODO(synk): for very long sequences (N >= ~2-4K) tile this flash-style over query
    # rows so the per-head (N, N) f32 score block stays bounded (matters on v7x's 64 MiB).
    for h0 in range(0, heads, 2):                          # static unroll over head pairs
        n_pair = min(2, heads - h0)
        pair_out = []
        for h in range(h0, h0 + n_pair):
            sl = slice(h * hd, (h + 1) * hd)
            qh, kh, vh = q[:, sl], k[:, sl], v[:, sl]       # (N, hd) bf16
            # s = qh @ kh^T without an explicit transpose (NT matmul).
            s = jax.lax.dot_general(qh, kh, (((1,), (1,)), ((), ())),
                                    preferred_element_type=jnp.float32)  # (N, N) f32
            s = s - jnp.max(s, axis=-1, keepdims=True)
            # TODO(synk): if profiling shows the single EUP saturating on v6e/v7x, compute
            # this exp in bf16 (keep the reduction f32); v5e has no bf16 EUP path.
            p = jnp.exp(s)
            denom = jnp.sum(p, axis=-1, keepdims=True)      # >= 1 (max subtracted)
            o = jnp.dot(p.astype(jnp.bfloat16), vh,
                        preferred_element_type=jnp.float32)  # (N, hd), unnormalized
            o = o * pl.reciprocal(denom, approx=True)        # normalize after P.V (EUP)
            pair_out.append(o.astype(jnp.bfloat16))
        o_pair = pair_out[0] if n_pair == 1 else jnp.concatenate(pair_out, axis=-1)
        attn_scratch[:, h0 * hd:(h0 + n_pair) * hd] = o_pair

    # ---- output projection + residual 1 (residual stream kept f32 in VMEM scratch) ----
    y = jnp.dot(attn_scratch[...], wproj_ref[...],
                preferred_element_type=jnp.float32) + bproj_ref[...]
    x1_scratch[...] = x + y

    # ---- norm2 + MLP: fori_loop over token chunks (live ranges actually bounded) ------
    g2 = ln2g_ref[...]                                      # hoisted out of the loop
    b2 = ln2b_ref[...]
    bfc1 = bfc1_ref[...]
    bfc2 = bfc2_ref[...]
    inv_sqrt2 = jnp.float32(1.0 / math.sqrt(2.0))

    def mlp_on_chunk(xc):
        xn2 = _layernorm(xc, g2, b2)
        h1 = jnp.dot(xn2.astype(jnp.bfloat16), wfc1_ref[...],
                     preferred_element_type=jnp.float32) + bfc1
        # exact GELU (PyTorch nn.GELU default, approximate='none'), kept in f32
        h1 = 0.5 * h1 * (1.0 + jax.lax.erf(h1 * inv_sqrt2))
        h2 = jnp.dot(h1.astype(jnp.bfloat16), wfc2_ref[...],
                     preferred_element_type=jnp.float32) + bfc2
        return (xc + h2).astype(out_ref.dtype)              # residual 2

    n_full = N // mlp_chunk                                  # static
    if n_full > 0:
        def body(ci, carry):
            lo = pl.multiple_of(ci * mlp_chunk, mlp_chunk)
            out_ref[pl.ds(lo, mlp_chunk), :] = mlp_on_chunk(
                x1_scratch[pl.ds(lo, mlp_chunk), :])
            return carry
        jax.lax.fori_loop(0, n_full, body, 0)
    rem = N - n_full * mlp_chunk                             # static tail chunk
    if rem:
        lo = n_full * mlp_chunk
        out_ref[lo:, :] = mlp_on_chunk(x1_scratch[lo:, :])


def block_forward(x, params, *, heads, mlp_chunk=256, vmem_limit_bytes=None,
                  single_buffer_weights=True):
    B, N, C = x.shape
    head_dim = C // heads
    mlp_dim = params["w_fc1"].shape[1]
    scale = head_dim ** (-0.5)
    if vmem_limit_bytes is None:
        vmem_limit_bytes = _default_vmem_limit_bytes()
    mlp_chunk = max(1, min(mlp_chunk, N))

    # Weight matrices feed the MXU as bf16; LN params and biases stay f32 (they add to /
    # scale f32 accumulators). The attention scale is folded into w_q / b_q here (free).
    wdt = jnp.bfloat16
    w_qkv = params["w_qkv"]
    b_qkv = params["b_qkv"]
    ordered = [
        params["ln1_g"].astype(jnp.float32), params["ln1_b"].astype(jnp.float32),
        (w_qkv[:, 0 * C:1 * C] * scale).astype(wdt),
        (b_qkv[:, 0 * C:1 * C] * scale).astype(jnp.float32),
        w_qkv[:, 1 * C:2 * C].astype(wdt), b_qkv[:, 1 * C:2 * C].astype(jnp.float32),
        w_qkv[:, 2 * C:3 * C].astype(wdt), b_qkv[:, 2 * C:3 * C].astype(jnp.float32),
        params["w_proj"].astype(wdt),        params["b_proj"].astype(jnp.float32),
        params["ln2_g"].astype(jnp.float32), params["ln2_b"].astype(jnp.float32),
        params["w_fc1"].astype(wdt),         params["b_fc1"].astype(jnp.float32),
        params["w_fc2"].astype(wdt),         params["b_fc2"].astype(jnp.float32),
    ]

    kernel = functools.partial(block_kernel, heads=heads, head_dim=head_dim,
                               mlp_chunk=mlp_chunk)

    # Advisory cost estimate for the XLA scheduler.
    flops = int(B * (2 * N * C * 3 * C          # qkv proj
                     + 4 * N * N * C            # QK^T + P.V over all heads
                     + 2 * N * C * C            # output proj
                     + 4 * N * C * mlp_dim))    # fc1 + fc2
    transcendentals = int(B * (heads * N * N + N * mlp_dim))   # exp + erf
    bytes_accessed = int(2 * x.size * x.dtype.itemsize
                         + sum(int(a.size) * a.dtype.itemsize for a in ordered))

    def build_and_run(single_buffered):
        def resident_spec(a):
            nd = a.ndim
            idx_map = lambda b, _nd=nd: (0,) * _nd   # constant -> stays VMEM-resident
            if single_buffered:
                # Constant index_map => second pipeline buffer is dead; request a single
                # buffer (halves resident weight VMEM; matters on v7x's 64 MiB).
                return pl.BlockSpec(a.shape, idx_map,
                                    pipeline_mode=pl.Buffered(buffer_count=1))
            return pl.BlockSpec(a.shape, idx_map)

        # Leading batch dim squeezed: kernel sees (N, C) refs.
        in_specs = [pl.BlockSpec((None, N, C), lambda b: (b, 0, 0))] + [
            resident_spec(a) for a in ordered]
        out_specs = pl.BlockSpec((None, N, C), lambda b: (b, 0, 0))

        # TODO(synk): when B == 1 on v7x (2 TensorCores) add a second "parallel" grid axis
        # over query-token tiles so both cores get work; with grid=(B,) one core idles.
        fn = pl.pallas_call(
            kernel,
            out_shape=jax.ShapeDtypeStruct((B, N, C), x.dtype),
            grid=(B,),
            in_specs=in_specs,
            out_specs=out_specs,
            scratch_shapes=[pltpu.VMEM((N, C), jnp.bfloat16),   # attention head outputs
                            pltpu.VMEM((N, C), jnp.float32)],   # residual-1 stream
            compiler_params=pltpu.CompilerParams(
                dimension_semantics=("parallel",),
                vmem_limit_bytes=vmem_limit_bytes),
            cost_estimate=pl.CostEstimate(
                flops=flops,
                transcendentals=transcendentals,
                bytes_accessed=bytes_accessed),
        )
        return fn(x, *ordered)

    if single_buffer_weights and hasattr(pl, "Buffered"):
        try:
            return build_and_run(True)
        except Exception:
            # This Pallas build rejects pipeline_mode=Buffered(1) on a pallas_call
            # BlockSpec; fall back to the default double-buffered resident weights.
            pass
    return build_and_run(False)


def make_params(key, dim, heads, mlp_dim):
    ks = jax.random.split(key, 4)
    std = 0.02
    return {
        # LayerNorm params kept 2D (1, C) so they broadcast cleanly in VMEM.
        "ln1_g": jnp.ones((1, dim), jnp.float32),
        "ln1_b": jnp.zeros((1, dim), jnp.float32),
        "ln2_g": jnp.ones((1, dim), jnp.float32),
        "ln2_b": jnp.zeros((1, dim), jnp.float32),
        # Attention: qkv (C, 3C), proj (C, C) — right-multiply layout (y = x @ W + b).
        "w_qkv": jax.random.normal(ks[0], (dim, 3 * dim), jnp.float32) * std,
        "b_qkv": jnp.zeros((1, 3 * dim), jnp.float32),
        "w_proj": jax.random.normal(ks[1], (dim, dim), jnp.float32) * std,
        "b_proj": jnp.zeros((1, dim), jnp.float32),
        # MLP: fc1 (C, H), fc2 (H, C)
        "w_fc1": jax.random.normal(ks[2], (dim, mlp_dim), jnp.float32) * std,
        "b_fc1": jnp.zeros((1, mlp_dim), jnp.float32),
        "w_fc2": jax.random.normal(ks[3], (mlp_dim, dim), jnp.float32) * std,
        "b_fc2": jnp.zeros((1, dim), jnp.float32),
    }


def block_reference(x, params, *, heads):
    """Pure-JAX f32 reference mirroring the PyTorch Block forward (eval mode)."""
    B, N, C = x.shape
    hd = C // heads
    scale = hd ** (-0.5)

    def ln(v, g, b):
        mu = jnp.mean(v, axis=-1, keepdims=True)
        var = jnp.mean((v - mu) ** 2, axis=-1, keepdims=True)
        return (v - mu) / jnp.sqrt(var + 1e-5) * g + b

    xn = ln(x, params["ln1_g"][0], params["ln1_b"][0])
    qkv = xn @ params["w_qkv"] + params["b_qkv"][0]
    qkv = qkv.reshape(B, N, 3, heads, hd).transpose(2, 0, 3, 1, 4)
    q, k, v = qkv[0], qkv[1], qkv[2]                      # (B, H, N, hd)
    attn = (q @ jnp.swapaxes(k, -2, -1)) * scale
    attn = jax.nn.softmax(attn, axis=-1)
    y = (attn @ v).transpose(0, 2, 1, 3).reshape(B, N, C)
    y = y @ params["w_proj"] + params["b_proj"][0]
    x = x + y
    xn2 = ln(x, params["ln2_g"][0], params["ln2_b"][0])
    h1 = xn2 @ params["w_fc1"] + params["b_fc1"][0]
    h1 = 0.5 * h1 * (1.0 + jax.lax.erf(h1 / jnp.sqrt(2.0)))
    h2 = h1 @ params["w_fc2"] + params["b_fc2"][0]
    return x + h2


if __name__ == "__main__":
    B, N, dim, heads, mlp_dim = 2, 8, 32, 4, 64

    key = jax.random.PRNGKey(0)
    kx, kp = jax.random.split(key)
    x = jax.random.normal(kx, (B, N, dim), jnp.float32)
    params = make_params(kp, dim, heads, mlp_dim)

    out = block_forward(x, params, heads=heads)
    out = jax.block_until_ready(out)

    ref = block_reference(x, params, heads=heads)
    assert out.shape == (B, N, dim)
    # bf16 matmul operands / weights + approx reciprocal -> slightly looser tolerance
    # than the pure-f32 reference.
    max_err = jnp.max(jnp.abs(out - ref))
    assert jnp.allclose(out, ref, atol=2e-2, rtol=2e-2), f"max abs err {max_err}"

    print("KERNEL_OK")
</pallas_src>

<mosaic_0001>
module attributes {stable_mosaic.version = 11 : i64} {
  func.func @block_kernel(%arg0: i32, %arg1: memref<1x8x32xf32, #tpu.memory_space<vmem>>, %arg2: memref<1x32xf32, #tpu.memory_space<vmem>>, %arg3: memref<1x32xf32, #tpu.memory_space<vmem>>, %arg4: memref<32x32xbf16, #tpu.memory_space<vmem>>, %arg5: memref<1x32xf32, #tpu.memory_space<vmem>>, %arg6: memref<32x32xbf16, #tpu.memory_space<vmem>>, %arg7: memref<1x32xf32, #tpu.memory_space<vmem>>, %arg8: memref<32x32xbf16, #tpu.memory_space<vmem>>, %arg9: memref<1x32xf32, #tpu.memory_space<vmem>>, %arg10: memref<32x32xbf16, #tpu.memory_space<vmem>>, %arg11: memref<1x32xf32, #tpu.memory_space<vmem>>, %arg12: memref<1x32xf32, #tpu.memory_space<vmem>>, %arg13: memref<1x32xf32, #tpu.memory_space<vmem>>, %arg14: memref<32x64xbf16, #tpu.memory_space<vmem>>, %arg15: memref<1x64xf32, #tpu.memory_space<vmem>>, %arg16: memref<64x32xbf16, #tpu.memory_space<vmem>>, %arg17: memref<1x32xf32, #tpu.memory_space<vmem>>, %arg18: memref<1x8x32xf32, #tpu.memory_space<vmem>>, %arg19: memref<8x32xbf16, #tpu.memory_space<vmem>>, %arg20: memref<8x32xf32, #tpu.memory_space<vmem>>) attributes {dimension_semantics = [#tpu.dimension_semantics<parallel>], iteration_bounds = array<i64: 2>, scalar_prefetch = 0 : i64, scratch_operands = 2 : i64, tpu.core_type = #tpu.core_type<tc>, window_params = [{transform_indices = @transform_0, window_bounds = array<i64: 1, 8, 32>}, {pipeline_mode = #tpu.pipeline_mode<synchronous>, transform_indices = @transform_1, window_bounds = array<i64: 1, 32>}, {pipeline_mode = #tpu.pipeline_mode<synchronous>, transform_indices = @transform_2, window_bounds = array<i64: 1, 32>}, {pipeline_mode = #tpu.pipeline_mode<synchronous>, transform_indices = @transform_3, window_bounds = array<i64: 32, 32>}, {pipeline_mode = #tpu.pipeline_mode<synchronous>, transform_indices = @transform_4, window_bounds = array<i64: 1, 32>}, {pipeline_mode = #tpu.pipeline_mode<synchronous>, transform_indices = @transform_5, window_bounds = array<i64: 32, 32>}, {pipeline_mode = #tpu.pipeline_mode<synchronous>, transform_indices = @transform_6, window_bounds = array<i64: 1, 32>}, {pipeline_mode = #tpu.pipeline_mode<synchronous>, transform_indices = @transform_7, window_bounds = array<i64: 32, 32>}, {pipeline_mode = #tpu.pipeline_mode<synchronous>, transform_indices = @transform_8, window_bounds = array<i64: 1, 32>}, {pipeline_mode = #tpu.pipeline_mode<synchronous>, transform_indices = @transform_9, window_bounds = array<i64: 32, 32>}, {pipeline_mode = #tpu.pipeline_mode<synchronous>, transform_indices = @transform_10, window_bounds = array<i64: 1, 32>}, {pipeline_mode = #tpu.pipeline_mode<synchronous>, transform_indices = @transform_11, window_bounds = array<i64: 1, 32>}, {pipeline_mode = #tpu.pipeline_mode<synchronous>, transform_indices = @transform_12, window_bounds = array<i64: 1, 32>}, {pipeline_mode = #tpu.pipeline_mode<synchronous>, transform_indices = @transform_13, window_bounds = array<i64: 32, 64>}, {pipeline_mode = #tpu.pipeline_mode<synchronous>, transform_indices = @transform_14, window_bounds = array<i64: 1, 64>}, {pipeline_mode = #tpu.pipeline_mode<synchronous>, transform_indices = @transform_15, window_bounds = array<i64: 64, 32>}, {pipeline_mode = #tpu.pipeline_mode<synchronous>, transform_indices = @transform_16, window_bounds = array<i64: 1, 32>}, {transform_indices = @transform_17, window_bounds = array<i64: 1, 8, 32>}]} {
    %c0 = arith.constant 0 : index
    %c0_0 = arith.constant 0 : index
    %c0_1 = arith.constant 0 : index
    %0 = vector.load %arg1[%c0, %c0_0, %c0_1] : memref<1x8x32xf32, #tpu.memory_space<vmem>>, vector<1x8x32xf32>
    %1 = vector.shape_cast %0 : vector<1x8x32xf32> to vector<8x32xf32>
    %c0_2 = arith.constant 0 : index
    %c0_3 = arith.constant 0 : index
    %2 = vector.load %arg2[%c0_2, %c0_3] : memref<1x32xf32, #tpu.memory_space<vmem>>, vector<1x32xf32>
    %c0_4 = arith.constant 0 : index
    %c0_5 = arith.constant 0 : index
    %3 = vector.load %arg3[%c0_4, %c0_5] : memref<1x32xf32, #tpu.memory_space<vmem>>, vector<1x32xf32>
    %cst = arith.constant dense<0.000000e+00> : vector<8xf32>
    %4 = vector.multi_reduction <add>, %1, %cst [1] : vector<8x32xf32> to vector<8xf32>
    %5 = vector.shape_cast %4 : vector<8xf32> to vector<8x1xf32>
    %cst_6 = arith.constant 3.200000e+01 : f32
    %6 = vector.broadcast %cst_6 : f32 to vector<8x1xf32>
    %7 = arith.divf %5, %6 : vector<8x1xf32>
    %8 = vector.broadcast %7 : vector<8x1xf32> to vector<8x32xf32>
    %9 = arith.subf %1, %8 : vector<8x32xf32>
    %10 = arith.mulf %9, %9 : vector<8x32xf32>
    %cst_7 = arith.constant dense<0.000000e+00> : vector<8xf32>
    %11 = vector.multi_reduction <add>, %10, %cst_7 [1] : vector<8x32xf32> to vector<8xf32>
    %12 = vector.shape_cast %11 : vector<8xf32> to vector<8x1xf32>
    %cst_8 = arith.constant 3.200000e+01 : f32
    %13 = vector.broadcast %cst_8 : f32 to vector<8x1xf32>
    %14 = arith.divf %12, %13 : vector<8x1xf32>
    %15 = vector.broadcast %7 : vector<8x1xf32> to vector<8x32xf32>
    %16 = arith.subf %1, %15 : vector<8x32xf32>
    %cst_9 = arith.constant 9.99999974E-6 : f32
    %17 = vector.broadcast %cst_9 : f32 to vector<8x1xf32>
    %18 = arith.addf %14, %17 : vector<8x1xf32>
    %19 = math.rsqrt %18 : vector<8x1xf32>
    %20 = vector.broadcast %19 : vector<8x1xf32> to vector<8x32xf32>
    %21 = arith.mulf %16, %20 : vector<8x32xf32>
    %22 = vector.broadcast %2 : vector<1x32xf32> to vector<8x32xf32>
    %23 = arith.mulf %21, %22 : vector<8x32xf32>
    %24 = vector.broadcast %3 : vector<1x32xf32> to vector<8x32xf32>
    %25 = arith.addf %23, %24 : vector<8x32xf32>
    %26 = arith.truncf %25 : vector<8x32xf32> to vector<8x32xbf16>
    %c0_10 = arith.constant 0 : index
    %c0_11 = arith.constant 0 : index
    %27 = vector.load %arg4[%c0_10, %c0_11] : memref<32x32xbf16, #tpu.memory_space<vmem>>, vector<32x32xbf16>
    %cst_12 = arith.constant dense<0.000000e+00> : vector<8x32xf32>
    %28 = tpu.matmul %26, %27, %cst_12 {dimension_numbers = #tpu.dot_dimension_numbers<[1], [0], [0], [1], [0, 0, 1, 1], [], []>} : vector<8x32xbf16>, vector<32x32xbf16>, vector<8x32xf32> -> vector<8x32xf32>
    %c0_13 = arith.constant 0 : index
    %c0_14 = arith.constant 0 : index
    %29 = vector.load %arg5[%c0_13, %c0_14] : memref<1x32xf32, #tpu.memory_space<vmem>>, vector<1x32xf32>
    %30 = vector.broadcast %29 : vector<1x32xf32> to vector<8x32xf32>
    %31 = arith.addf %28, %30 : vector<8x32xf32>
    %32 = arith.truncf %31 : vector<8x32xf32> to vector<8x32xbf16>
    %c0_15 = arith.constant 0 : index
    %c0_16 = arith.constant 0 : index
    %33 = vector.load %arg6[%c0_15, %c0_16] : memref<32x32xbf16, #tpu.memory_space<vmem>>, vector<32x32xbf16>
    %cst_17 = arith.constant dense<0.000000e+00> : vector<8x32xf32>
    %34 = tpu.matmul %26, %33, %cst_17 {dimension_numbers = #tpu.dot_dimension_numbers<[1], [0], [0], [1], [0, 0, 1, 1], [], []>} : vector<8x32xbf16>, vector<32x32xbf16>, vector<8x32xf32> -> vector<8x32xf32>
    %c0_18 = arith.constant 0 : index
    %c0_19 = arith.constant 0 : index
    %35 = vector.load %arg7[%c0_18, %c0_19] : memref<1x32xf32, #tpu.memory_space<vmem>>, vector<1x32xf32>
    %36 = vector.broadcast %35 : vector<1x32xf32> to vector<8x32xf32>
    %37 = arith.addf %34, %36 : vector<8x32xf32>
    %38 = arith.truncf %37 : vector<8x32xf32> to vector<8x32xbf16>
    %c0_20 = arith.constant 0 : index
    %c0_21 = arith.constant 0 : index
    %39 = vector.load %arg8[%c0_20, %c0_21] : memref<32x32xbf16, #tpu.memory_space<vmem>>, vector<32x32xbf16>
    %cst_22 = arith.constant dense<0.000000e+00> : vector<8x32xf32>
    %40 = tpu.matmul %26, %39, %cst_22 {dimension_numbers = #tpu.dot_dimension_numbers<[1], [0], [0], [1], [0, 0, 1, 1], [], []>} : vector<8x32xbf16>, vector<32x32xbf16>, vector<8x32xf32> -> vector<8x32xf32>
    %c0_23 = arith.constant 0 : index
    %c0_24 = arith.constant 0 : index
    %41 = vector.load %arg9[%c0_23, %c0_24] : memref<1x32xf32, #tpu.memory_space<vmem>>, vector<1x32xf32>
    %42 = vector.broadcast %41 : vector<1x32xf32> to vector<8x32xf32>
    %43 = arith.addf %40, %42 : vector<8x32xf32>
    %44 = arith.truncf %43 : vector<8x32xf32> to vector<8x32xbf16>
    %45 = vector.extract_strided_slice %32 {offsets = [0, 0], sizes = [8, 8], strides = [1, 1]} : vector<8x32xbf16> to vector<8x8xbf16>
    %46 = vector.extract_strided_slice %38 {offsets = [0, 0], sizes = [8, 8], strides = [1, 1]} : vector<8x32xbf16> to vector<8x8xbf16>
    %47 = vector.extract_strided_slice %44 {offsets = [0, 0], sizes = [8, 8], strides = [1, 1]} : vector<8x32xbf16> to vector<8x8xbf16>
    %cst_25 = arith.constant dense<0.000000e+00> : vector<8x8xf32>
    %48 = tpu.matmul %45, %46, %cst_25 {dimension_numbers = #tpu.dot_dimension_numbers<[1], [1], [0], [0], [0, 0, 1, 0], [], []>} : vector<8x8xbf16>, vector<8x8xbf16>, vector<8x8xf32> -> vector<8x8xf32>
    %cst_26 = arith.constant dense<0xFF800000> : vector<8xf32>
    %49 = vector.multi_reduction <maximumf>, %48, %cst_26 [1] : vector<8x8xf32> to vector<8xf32>
    %50 = vector.shape_cast %49 : vector<8xf32> to vector<8x1xf32>
    %51 = vector.broadcast %50 : vector<8x1xf32> to vector<8x8xf32>
    %52 = arith.subf %48, %51 : vector<8x8xf32>
    %53 = math.exp %52 : vector<8x8xf32>
    %cst_27 = arith.constant dense<0.000000e+00> : vector<8xf32>
    %54 = vector.multi_reduction <add>, %53, %cst_27 [1] : vector<8x8xf32> to vector<8xf32>
    %55 = vector.shape_cast %54 : vector<8xf32> to vector<8x1xf32>
    %56 = arith.truncf %53 : vector<8x8xf32> to vector<8x8xbf16>
    %cst_28 = arith.constant dense<0.000000e+00> : vector<8x8xf32>
    %57 = tpu.matmul %56, %47, %cst_28 {dimension_numbers = #tpu.dot_dimension_numbers<[1], [0], [0], [1], [0, 0, 1, 1], [], []>} : vector<8x8xbf16>, vector<8x8xbf16>, vector<8x8xf32> -> vector<8x8xf32>
    %58 = tpu.reciprocal %55 {approx = true} : vector<8x1xf32> -> vector<8x1xf32>
    %59 = vector.broadcast %58 : vector<8x1xf32> to vector<8x8xf32>
    %60 = arith.mulf %57, %59 : vector<8x8xf32>
    %61 = arith.truncf %60 : vector<8x8xf32> to vector<8x8xbf16>
    %62 = vector.extract_strided_slice %32 {offsets = [0, 8], sizes = [8, 8], strides = [1, 1]} : vector<8x32xbf16> to vector<8x8xbf16>
    %63 = vector.extract_strided_slice %38 {offsets = [0, 8], sizes = [8, 8], strides = [1, 1]} : vector<8x32xbf16> to vector<8x8xbf16>
    %64 = vector.extract_strided_slice %44 {offsets = [0, 8], sizes = [8, 8], strides = [1, 1]} : vector<8x32xbf16> to vector<8x8xbf16>
    %cst_29 = arith.constant dense<0.000000e+00> : vector<8x8xf32>
    %65 = tpu.matmul %62, %63, %cst_29 {dimension_numbers = #tpu.dot_dimension_numbers<[1], [1], [0], [0], [0, 0, 1, 0], [], []>} : vector<8x8xbf16>, vector<8x8xbf16>, vector<8x8xf32> -> vector<8x8xf32>
    %cst_30 = arith.constant dense<0xFF800000> : vector<8xf32>
    %66 = vector.multi_reduction <maximumf>, %65, %cst_30 [1] : vector<8x8xf32> to vector<8xf32>
    %67 = vector.shape_cast %66 : vector<8xf32> to vector<8x1xf32>
    %68 = vector.broadcast %67 : vector<8x1xf32> to vector<8x8xf32>
    %69 = arith.subf %65, %68 : vector<8x8xf32>
    %70 = math.exp %69 : vector<8x8xf32>
    %cst_31 = arith.constant dense<0.000000e+00> : vector<8xf32>
    %71 = vector.multi_reduction <add>, %70, %cst_31 [1] : vector<8x8xf32> to vector<8xf32>
    %72 = vector.shape_cast %71 : vector<8xf32> to vector<8x1xf32>
    %73 = arith.truncf %70 : vector<8x8xf32> to vector<8x8xbf16>
    %cst_32 = arith.constant dense<0.000000e+00> : vector<8x8xf32>
    %74 = tpu.matmul %73, %64, %cst_32 {dimension_numbers = #tpu.dot_dimension_numbers<[1], [0], [0], [1], [0, 0, 1, 1], [], []>} : vector<8x8xbf16>, vector<8x8xbf16>, vector<8x8xf32> -> vector<8x8xf32>
    %75 = tpu.reciprocal %72 {approx = true} : vector<8x1xf32> -> vector<8x1xf32>
    %76 = vector.broadcast %75 : vector<8x1xf32> to vector<8x8xf32>
    %77 = arith.mulf %74, %76 : vector<8x8xf32>
    %78 = arith.truncf %77 : vector<8x8xf32> to vector<8x8xbf16>
    %79 = tpu.concatenate %61, %78 in 1 : vector<8x8xbf16>, vector<8x8xbf16> -> vector<8x16xbf16>
    %c0_33 = arith.constant 0 : index
    %c0_34 = arith.constant 0 : index
    %80 = vector.load %arg19[%c0_33, %c0_34] : memref<8x32xbf16, #tpu.memory_space<vmem>>, vector<8x16xbf16>
    tpu.vector_store %arg19[%c0_33, %c0_34], %79 {strides = array<i32>} : memref<8x32xbf16, #tpu.memory_space<vmem>>, vector<8x16xbf16>,
    %81 = vector.extract_strided_slice %32 {offsets = [0, 16], sizes = [8, 8], strides = [1, 1]} : vector<8x32xbf16> to vector<8x8xbf16>
    %82 = vector.extract_strided_slice %38 {offsets = [0, 16], sizes = [8, 8], strides = [1, 1]} : vector<8x32xbf16> to vector<8x8xbf16>
    %83 = vector.extract_strided_slice %44 {offsets = [0, 16], sizes = [8, 8], strides = [1, 1]} : vector<8x32xbf16> to vector<8x8xbf16>
    %cst_35 = arith.constant dense<0.000000e+00> : vector<8x8xf32>
    %84 = tpu.matmul %81, %82, %cst_35 {dimension_numbers = #tpu.dot_dimension_numbers<[1], [1], [0], [0], [0, 0, 1, 0], [], []>} : vector<8x8xbf16>, vector<8x8xbf16>, vector<8x8xf32> -> vector<8x8xf32>
    %cst_36 = arith.constant dense<0xFF800000> : vector<8xf32>
    %85 = vector.multi_reduction <maximumf>, %84, %cst_36 [1] : vector<8x8xf32> to vector<8xf32>
    %86 = vector.shape_cast %85 : vector<8xf32> to vector<8x1xf32>
    %87 = vector.broadcast %86 : vector<8x1xf32> to vector<8x8xf32>
    %88 = arith.subf %84, %87 : vector<8x8xf32>
    %89 = math.exp %88 : vector<8x8xf32>
    %cst_37 = arith.constant dense<0.000000e+00> : vector<8xf32>
    %90 = vector.multi_reduction <add>, %89, %cst_37 [1] : vector<8x8xf32> to vector<8xf32>
    %91 = vector.shape_cast %90 : vector<8xf32> to vector<8x1xf32>
    %92 = arith.truncf %89 : vector<8x8xf32> to vector<8x8xbf16>
    %cst_38 = arith.constant dense<0.000000e+00> : vector<8x8xf32>
    %93 = tpu.matmul %92, %83, %cst_38 {dimension_numbers = #tpu.dot_dimension_numbers<[1], [0], [0], [1], [0, 0, 1, 1], [], []>} : vector<8x8xbf16>, vector<8x8xbf16>, vector<8x8xf32> -> vector<8x8xf32>
    %94 = tpu.reciprocal %91 {approx = true} : vector<8x1xf32> -> vector<8x1xf32>
    %95 = vector.broadcast %94 : vector<8x1xf32> to vector<8x8xf32>
    %96 = arith.mulf %93, %95 : vector<8x8xf32>
    %97 = arith.truncf %96 : vector<8x8xf32> to vector<8x8xbf16>
    %98 = vector.extract_strided_slice %32 {offsets = [0, 24], sizes = [8, 8], strides = [1, 1]} : vector<8x32xbf16> to vector<8x8xbf16>
    %99 = vector.extract_strided_slice %38 {offsets = [0, 24], sizes = [8, 8], strides = [1, 1]} : vector<8x32xbf16> to vector<8x8xbf16>
    %100 = vector.extract_strided_slice %44 {offsets = [0, 24], sizes = [8, 8], strides = [1, 1]} : vector<8x32xbf16> to vector<8x8xbf16>
    %cst_39 = arith.constant dense<0.000000e+00> : vector<8x8xf32>
    %101 = tpu.matmul %98, %99, %cst_39 {dimension_numbers = #tpu.dot_dimension_numbers<[1], [1], [0], [0], [0, 0, 1, 0], [], []>} : vector<8x8xbf16>, vector<8x8xbf16>, vector<8x8xf32> -> vector<8x8xf32>
    %cst_40 = arith.constant dense<0xFF800000> : vector<8xf32>
    %102 = vector.multi_reduction <maximumf>, %101, %cst_40 [1] : vector<8x8xf32> to vector<8xf32>
    %103 = vector.shape_cast %102 : vector<8xf32> to vector<8x1xf32>
    %104 = vector.broadcast %103 : vector<8x1xf32> to vector<8x8xf32>
    %105 = arith.subf %101, %104 : vector<8x8xf32>
    %106 = math.exp %105 : vector<8x8xf32>
    %cst_41 = arith.constant dense<0.000000e+00> : vector<8xf32>
    %107 = vector.multi_reduction <add>, %106, %cst_41 [1] : vector<8x8xf32> to vector<8xf32>
    %108 = vector.shape_cast %107 : vector<8xf32> to vector<8x1xf32>
    %109 = arith.truncf %106 : vector<8x8xf32> to vector<8x8xbf16>
    %cst_42 = arith.constant dense<0.000000e+00> : vector<8x8xf32>
    %110 = tpu.matmul %109, %100, %cst_42 {dimension_numbers = #tpu.dot_dimension_numbers<[1], [0], [0], [1], [0, 0, 1, 1], [], []>} : vector<8x8xbf16>, vector<8x8xbf16>, vector<8x8xf32> -> vector<8x8xf32>
    %111 = tpu.reciprocal %108 {approx = true} : vector<8x1xf32> -> vector<8x1xf32>
    %112 = vector.broadcast %111 : vector<8x1xf32> to vector<8x8xf32>
    %113 = arith.mulf %110, %112 : vector<8x8xf32>
    %114 = arith.truncf %113 : vector<8x8xf32> to vector<8x8xbf16>
    %115 = tpu.concatenate %97, %114 in 1 : vector<8x8xbf16>, vector<8x8xbf16> -> vector<8x16xbf16>
    %c0_43 = arith.constant 0 : index
    %c16 = arith.constant 16 : index
    %116 = vector.load %arg19[%c0_43, %c16] : memref<8x32xbf16, #tpu.memory_space<vmem>>, vector<8x16xbf16>
    tpu.vector_store %arg19[%c0_43, %c16], %115 {strides = array<i32>} : memref<8x32xbf16, #tpu.memory_space<vmem>>, vector<8x16xbf16>,
    %c0_44 = arith.constant 0 : index
    %c0_45 = arith.constant 0 : index
    %117 = vector.load %arg19[%c0_44, %c0_45] : memref<8x32xbf16, #tpu.memory_space<vmem>>, vector<8x32xbf16>
    %c0_46 = arith.constant 0 : index
    %c0_47 = arith.constant 0 : index
    %118 = vector.load %arg10[%c0_46, %c0_47] : memref<32x32xbf16, #tpu.memory_space<vmem>>, vector<32x32xbf16>
    %cst_48 = arith.constant dense<0.000000e+00> : vector<8x32xf32>
    %119 = tpu.matmul %117, %118, %cst_48 {dimension_numbers = #tpu.dot_dimension_numbers<[1], [0], [0], [1], [0, 0, 1, 1], [], []>} : vector<8x32xbf16>, vector<32x32xbf16>, vector<8x32xf32> -> vector<8x32xf32>
    %c0_49 = arith.constant 0 : index
    %c0_50 = arith.constant 0 : index
    %120 = vector.load %arg11[%c0_49, %c0_50] : memref<1x32xf32, #tpu.memory_space<vmem>>, vector<1x32xf32>
    %121 = vector.broadcast %120 : vector<1x32xf32> to vector<8x32xf32>
    %122 = arith.addf %119, %121 : vector<8x32xf32>
    %123 = arith.addf %1, %122 : vector<8x32xf32>
    %c0_51 = arith.constant 0 : index
    %c0_52 = arith.constant 0 : index
    %124 = vector.load %arg20[%c0_51, %c0_52] : memref<8x32xf32, #tpu.memory_space<vmem>>, vector<8x32xf32>
    tpu.vector_store %arg20[%c0_51, %c0_52], %123 {strides = array<i32>} : memref<8x32xf32, #tpu.memory_space<vmem>>, vector<8x32xf32>,
    %c0_53 = arith.constant 0 : index
    %c0_54 = arith.constant 0 : index
    %125 = vector.load %arg12[%c0_53, %c0_54] : memref<1x32xf32, #tpu.memory_space<vmem>>, vector<1x32xf32>
    %c0_55 = arith.constant 0 : index
    %c0_56 = arith.constant 0 : index
    %126 = vector.load %arg13[%c0_55, %c0_56] : memref<1x32xf32, #tpu.memory_space<vmem>>, vector<1x32xf32>
    %c0_57 = arith.constant 0 : index
    %c0_58 = arith.constant 0 : index
    %127 = vector.load %arg15[%c0_57, %c0_58] : memref<1x64xf32, #tpu.memory_space<vmem>>, vector<1x64xf32>
    %c0_59 = arith.constant 0 : index
    %c0_60 = arith.constant 0 : index
    %128 = vector.load %arg17[%c0_59, %c0_60] : memref<1x32xf32, #tpu.memory_space<vmem>>, vector<1x32xf32>
    %cst_61 = arith.constant 0.707106769 : f32
    %c0_i32 = arith.constant 0 : i32
    %c8_i32 = arith.constant 8 : i32
    %129 = arith.muli %c0_i32, %c8_i32 : i32
    %130 = tpu.assume_multiple %129, 8 : i32
    %131 = arith.index_cast %130 : i32 to index
    %c0_62 = arith.constant 0 : index
    %132 = vector.load %arg20[%131, %c0_62] : memref<8x32xf32, #tpu.memory_space<vmem>>, vector<8x32xf32>
    %cst_63 = arith.constant dense<0.000000e+00> : vector<8xf32>
    %133 = vector.multi_reduction <add>, %132, %cst_63 [1] : vector<8x32xf32> to vector<8xf32>
    %134 = vector.shape_cast %133 : vector<8xf32> to vector<8x1xf32>
    %cst_64 = arith.constant 3.200000e+01 : f32
    %135 = vector.broadcast %cst_64 : f32 to vector<8x1xf32>
    %136 = arith.divf %134, %135 : vector<8x1xf32>
    %137 = vector.broadcast %136 : vector<8x1xf32> to vector<8x32xf32>
    %138 = arith.subf %132, %137 : vector<8x32xf32>
    %139 = arith.mulf %138, %138 : vector<8x32xf32>
    %cst_65 = arith.constant dense<0.000000e+00> : vector<8xf32>
    %140 = vector.multi_reduction <add>, %139, %cst_65 [1] : vector<8x32xf32> to vector<8xf32>
    %141 = vector.shape_cast %140 : vector<8xf32> to vector<8x1xf32>
    %cst_66 = arith.constant 3.200000e+01 : f32
    %142 = vector.broadcast %cst_66 : f32 to vector<8x1xf32>
    %143 = arith.divf %141, %142 : vector<8x1xf32>
    %144 = vector.broadcast %136 : vector<8x1xf32> to vector<8x32xf32>
    %145 = arith.subf %132, %144 : vector<8x32xf32>
    %cst_67 = arith.constant 9.99999974E-6 : f32
    %146 = vector.broadcast %cst_67 : f32 to vector<8x1xf32>
    %147 = arith.addf %143, %146 : vector<8x1xf32>
    %148 = math.rsqrt %147 : vector<8x1xf32>
    %149 = vector.broadcast %148 : vector<8x1xf32> to vector<8x32xf32>
    %150 = arith.mulf %145, %149 : vector<8x32xf32>
    %151 = vector.broadcast %125 : vector<1x32xf32> to vector<8x32xf32>
    %152 = arith.mulf %150, %151 : vector<8x32xf32>
    %153 = vector.broadcast %126 : vector<1x32xf32> to vector<8x32xf32>
    %154 = arith.addf %152, %153 : vector<8x32xf32>
    %155 = arith.truncf %154 : vector<8x32xf32> to vector<8x32xbf16>
    %c0_68 = arith.constant 0 : index
    %c0_69 = arith.constant 0 : index
    %156 = vector.load %arg14[%c0_68, %c0_69] : memref<32x64xbf16, #tpu.memory_space<vmem>>, vector<32x64xbf16>
    %cst_70 = arith.constant dense<0.000000e+00> : vector<8x64xf32>
    %157 = tpu.matmul %155, %156, %cst_70 {dimension_numbers = #tpu.dot_dimension_numbers<[1], [0], [0], [1], [0, 0, 1, 1], [], []>} : vector<8x32xbf16>, vector<32x64xbf16>, vector<8x64xf32> -> vector<8x64xf32>
    %158 = vector.broadcast %127 : vector<1x64xf32> to vector<8x64xf32>
    %159 = arith.addf %157, %158 : vector<8x64xf32>
    %cst_71 = arith.constant 5.000000e-01 : f32
    %160 = vector.broadcast %cst_71 : f32 to vector<8x64xf32>
    %161 = arith.mulf %160, %159 : vector<8x64xf32>
    %162 = vector.broadcast %cst_61 : f32 to vector<8x64xf32>
    %163 = arith.mulf %159, %162 : vector<8x64xf32>
    %164 = math.erf %163 : vector<8x64xf32>
    %cst_72 = arith.constant 1.000000e+00 : f32
    %165 = vector.broadcast %cst_72 : f32 to vector<8x64xf32>
    %166 = arith.addf %165, %164 : vector<8x64xf32>
    %167 = arith.mulf %161, %166 : vector<8x64xf32>
    %168 = arith.truncf %167 : vector<8x64xf32> to vector<8x64xbf16>
    %c0_73 = arith.constant 0 : index
    %c0_74 = arith.constant 0 : index
    %169 = vector.load %arg16[%c0_73, %c0_74] : memref<64x32xbf16, #tpu.memory_space<vmem>>, vector<64x32xbf16>
    %cst_75 = arith.constant dense<0.000000e+00> : vector<8x32xf32>
    %170 = tpu.matmul %168, %169, %cst_75 {dimension_numbers = #tpu.dot_dimension_numbers<[1], [0], [0], [1], [0, 0, 1, 1], [], []>} : vector<8x64xbf16>, vector<64x32xbf16>, vector<8x32xf32> -> vector<8x32xf32>
    %171 = vector.broadcast %128 : vector<1x32xf32> to vector<8x32xf32>
    %172 = arith.addf %170, %171 : vector<8x32xf32>
    %173 = arith.addf %132, %172 : vector<8x32xf32>
    %c0_76 = arith.constant 0 : index
    %174 = arith.index_cast %130 : i32 to index
    %c0_77 = arith.constant 0 : index
    %175 = vector.load %arg18[%c0_76, %174, %c0_77] : memref<1x8x32xf32, #tpu.memory_space<vmem>>, vector<1x8x32xf32>
    %176 = vector.shape_cast %175 : vector<1x8x32xf32> to vector<8x32xf32>
    %177 = vector.shape_cast %173 : vector<8x32xf32> to vector<1x8x32xf32>
    tpu.vector_store %arg18[%c0_76, %174, %c0_77], %177 {strides = array<i32>} : memref<1x8x32xf32, #tpu.memory_space<vmem>>, vector<1x8x32xf32>,
    %c1_i32 = arith.constant 1 : i32
    return
  }
  func.func @transform_0(%arg0: i32) -> (i32, i32, i32) {
    %c0_i32 = arith.constant 0 : i32
    %c0_i32_0 = arith.constant 0 : i32
    %c0_i32_1 = arith.constant 0 : i32
    return %arg0, %c0_i32, %c0_i32_0 : i32, i32, i32
  }
  func.func @transform_1(%arg0: i32) -> (i32, i32) {
    %c0_i32 = arith.constant 0 : i32
    %c0_i32_0 = arith.constant 0 : i32
    %c0_i32_1 = arith.constant 0 : i32
    return %c0_i32, %c0_i32_0 : i32, i32
  }
  func.func @transform_2(%arg0: i32) -> (i32, i32) {
    %c0_i32 = arith.constant 0 : i32
    %c0_i32_0 = arith.constant 0 : i32
    %c0_i32_1 = arith.constant 0 : i32
    return %c0_i32, %c0_i32_0 : i32, i32
  }
  func.func @transform_3(%arg0: i32) -> (i32, i32) {
    %c0_i32 = arith.constant 0 : i32
    %c0_i32_0 = arith.constant 0 : i32
    %c0_i32_1 = arith.constant 0 : i32
    return %c0_i32, %c0_i32_0 : i32, i32
  }
  func.func @transform_4(%arg0: i32) -> (i32, i32) {
    %c0_i32 = arith.constant 0 : i32
    %c0_i32_0 = arith.constant 0 : i32
    %c0_i32_1 = arith.constant 0 : i32
    return %c0_i32, %c0_i32_0 : i32, i32
  }
  func.func @transform_5(%arg0: i32) -> (i32, i32) {
    %c0_i32 = arith.constant 0 : i32
    %c0_i32_0 = arith.constant 0 : i32
    %c0_i32_1 = arith.constant 0 : i32
    return %c0_i32, %c0_i32_0 : i32, i32
  }
  func.func @transform_6(%arg0: i32) -> (i32, i32) {
    %c0_i32 = arith.constant 0 : i32
    %c0_i32_0 = arith.constant 0 : i32
    %c0_i32_1 = arith.constant 0 : i32
    return %c0_i32, %c0_i32_0 : i32, i32
  }
  func.func @transform_7(%arg0: i32) -> (i32, i32) {
    %c0_i32 = arith.constant 0 : i32
    %c0_i32_0 = arith.constant 0 : i32
    %c0_i32_1 = arith.constant 0 : i32
    return %c0_i32, %c0_i32_0 : i32, i32
  }
  func.func @transform_8(%arg0: i32) -> (i32, i32) {
    %c0_i32 = arith.constant 0 : i32
    %c0_i32_0 = arith.constant 0 : i32
    %c0_i32_1 = arith.constant 0 : i32
    return %c0_i32, %c0_i32_0 : i32, i32
  }
  func.func @transform_9(%arg0: i32) -> (i32, i32) {
    %c0_i32 = arith.constant 0 : i32
    %c0_i32_0 = arith.constant 0 : i32
    %c0_i32_1 = arith.constant 0 : i32
    return %c0_i32, %c0_i32_0 : i32, i32
  }
  func.func @transform_10(%arg0: i32) -> (i32, i32) {
    %c0_i32 = arith.constant 0 : i32
    %c0_i32_0 = arith.constant 0 : i32
    %c0_i32_1 = arith.constant 0 : i32
    return %c0_i32, %c0_i32_0 : i32, i32
  }
  func.func @transform_11(%arg0: i32) -> (i32, i32) {
    %c0_i32 = arith.constant 0 : i32
    %c0_i32_0 = arith.constant 0 : i32
    %c0_i32_1 = arith.constant 0 : i32
    return %c0_i32, %c0_i32_0 : i32, i32
  }
  func.func @transform_12(%arg0: i32) -> (i32, i32) {
    %c0_i32 = arith.constant 0 : i32
    %c0_i32_0 = arith.constant 0 : i32
    %c0_i32_1 = arith.constant 0 : i32
    return %c0_i32, %c0_i32_0 : i32, i32
  }
  func.func @transform_13(%arg0: i32) -> (i32, i32) {
    %c0_i32 = arith.constant 0 : i32
    %c0_i32_0 = arith.constant 0 : i32
    %c0_i32_1 = arith.constant 0 : i32
    return %c0_i32, %c0_i32_0 : i32, i32
  }
  func.func @transform_14(%arg0: i32) -> (i32, i32) {
    %c0_i32 = arith.constant 0 : i32
    %c0_i32_0 = arith.constant 0 : i32
    %c0_i32_1 = arith.constant 0 : i32
    return %c0_i32, %c0_i32_0 : i32, i32
  }
  func.func @transform_15(%arg0: i32) -> (i32, i32) {
    %c0_i32 = arith.constant 0 : i32
    %c0_i32_0 = arith.constant 0 : i32
    %c0_i32_1 = arith.constant 0 : i32
    return %c0_i32, %c0_i32_0 : i32, i32
  }
  func.func @transform_16(%arg0: i32) -> (i32, i32) {
    %c0_i32 = arith.constant 0 : i32
    %c0_i32_0 = arith.constant 0 : i32
    %c0_i32_1 = arith.constant 0 : i32
    return %c0_i32, %c0_i32_0 : i32, i32
  }
  func.func @transform_17(%arg0: i32) -> (i32, i32, i32) {
    %c0_i32 = arith.constant 0 : i32
    %c0_i32_0 = arith.constant 0 : i32
    %c0_i32_1 = arith.constant 0 : i32
    return %arg0, %c0_i32, %c0_i32_0 : i32, i32, i32
  }
}

module attributes {stable_mosaic.version = 11 : i64} {
  func.func @block_kernel(%arg0: i32, %arg1: memref<1x8x32xf32, #tpu.memory_space<vmem>>, %arg2: memref<1x32xf32, #tpu.memory_space<vmem>>, %arg3: memref<1x32xf32, #tpu.memory_space<vmem>>, %arg4: memref<32x32xbf16, #tpu.memory_space<vmem>>, %arg5: memref<1x32xf32, #tpu.memory_space<vmem>>, %arg6: memref<32x32xbf16, #tpu.memory_space<vmem>>, %arg7: memref<1x32xf32, #tpu.memory_space<vmem>>, %arg8: memref<32x32xbf16, #tpu.memory_space<vmem>>, %arg9: memref<1x32xf32, #tpu.memory_space<vmem>>, %arg10: memref<32x32xbf16, #tpu.memory_space<vmem>>, %arg11: memref<1x32xf32, #tpu.memory_space<vmem>>, %arg12: memref<1x32xf32, #tpu.memory_space<vmem>>, %arg13: memref<1x32xf32, #tpu.memory_space<vmem>>, %arg14: memref<32x64xbf16, #tpu.memory_space<vmem>>, %arg15: memref<1x64xf32, #tpu.memory_space<vmem>>, %arg16: memref<64x32xbf16, #tpu.memory_space<vmem>>, %arg17: memref<1x32xf32, #tpu.memory_space<vmem>>, %arg18: memref<1x8x32xf32, #tpu.memory_space<vmem>>, %arg19: memref<8x32xbf16, #tpu.memory_space<vmem>>, %arg20: memref<8x32xf32, #tpu.memory_space<vmem>>) attributes {dimension_semantics = [#tpu.dimension_semantics<parallel>], iteration_bounds = array<i64: 2>, scalar_prefetch = 0 : i64, scratch_operands = 2 : i64, tpu.core_type = #tpu.core_type<tc>, window_params = [{transform_indices = @transform_0, window_bounds = array<i64: 1, 8, 32>}, {pipeline_mode = #tpu.pipeline_mode<synchronous>, transform_indices = @transform_1, window_bounds = array<i64: 1, 32>}, {pipeline_mode = #tpu.pipeline_mode<synchronous>, transform_indices = @transform_2, window_bounds = array<i64: 1, 32>}, {pipeline_mode = #tpu.pipeline_mode<synchronous>, transform_indices = @transform_3, window_bounds = array<i64: 32, 32>}, {pipeline_mode = #tpu.pipeline_mode<synchronous>, transform_indices = @transform_4, window_bounds = array<i64: 1, 32>}, {pipeline_mode = #tpu.pipeline_mode<synchronous>, transform_indices = @transform_5, window_bounds = array<i64: 32, 32>}, {pipeline_mode = #tpu.pipeline_mode<synchronous>, transform_indices = @transform_6, window_bounds = array<i64: 1, 32>}, {pipeline_mode = #tpu.pipeline_mode<synchronous>, transform_indices = @transform_7, window_bounds = array<i64: 32, 32>}, {pipeline_mode = #tpu.pipeline_mode<synchronous>, transform_indices = @transform_8, window_bounds = array<i64: 1, 32>}, {pipeline_mode = #tpu.pipeline_mode<synchronous>, transform_indices = @transform_9, window_bounds = array<i64: 32, 32>}, {pipeline_mode = #tpu.pipeline_mode<synchronous>, transform_indices = @transform_10, window_bounds = array<i64: 1, 32>}, {pipeline_mode = #tpu.pipeline_mode<synchronous>, transform_indices = @transform_11, window_bounds = array<i64: 1, 32>}, {pipeline_mode = #tpu.pipeline_mode<synchronous>, transform_indices = @transform_12, window_bounds = array<i64: 1, 32>}, {pipeline_mode = #tpu.pipeline_mode<synchronous>, transform_indices = @transform_13, window_bounds = array<i64: 32, 64>}, {pipeline_mode = #tpu.pipeline_mode<synchronous>, transform_indices = @transform_14, window_bounds = array<i64: 1, 64>}, {pipeline_mode = #tpu.pipeline_mode<synchronous>, transform_indices = @transform_15, window_bounds = array<i64: 64, 32>}, {pipeline_mode = #tpu.pipeline_mode<synchronous>, transform_indices = @transform_16, window_bounds = array<i64: 1, 32>}, {transform_indices = @transform_17, window_bounds = array<i64: 1, 8, 32>}]} {
    %c0 = arith.constant 0 : index
    %c0_0 = arith.constant 0 : index
    %c0_1 = arith.constant 0 : index
    %0 = vector.load %arg1[%c0, %c0_0, %c0_1] : memref<1x8x32xf32, #tpu.memory_space<vmem>>, vector<1x8x32xf32>
    %1 = vector.shape_cast %0 : vector<1x8x32xf32> to vector<8x32xf32>
    %c0_2 = arith.constant 0 : index
    %c0_3 = arith.constant 0 : index
    %2 = vector.load %arg2[%c0_2, %c0_3] : memref<1x32xf32, #tpu.memory_space<vmem>>, vector<1x32xf32>
    %c0_4 = arith.constant 0 : index
    %c0_5 = arith.constant 0 : index
    %3 = vector.load %arg3[%c0_4, %c0_5] : memref<1x32xf32, #tpu.memory_space<vmem>>, vector<1x32xf32>
    %cst = arith.constant dense<0.000000e+00> : vector<8xf32>
    %4 = vector.multi_reduction <add>, %1, %cst [1] : vector<8x32xf32> to vector<8xf32>
    %5 = vector.shape_cast %4 : vector<8xf32> to vector<8x1xf32>
    %cst_6 = arith.constant 3.200000e+01 : f32
    %6 = vector.broadcast %cst_6 : f32 to vector<8x1xf32>
    %7 = arith.divf %5, %6 : vector<8x1xf32>
    %8 = vector.broadcast %7 : vector<8x1xf32> to vector<8x32xf32>
    %9 = arith.subf %1, %8 : vector<8x32xf32>
    %10 = arith.mulf %9, %9 : vector<8x32xf32>
    %cst_7 = arith.constant dense<0.000000e+00> : vector<8xf32>
    %11 = vector.multi_reduction <add>, %10, %cst_7 [1] : vector<8x32xf32> to vector<8xf32>
    %12 = vector.shape_cast %11 : vector<8xf32> to vector<8x1xf32>
    %cst_8 = arith.constant 3.200000e+01 : f32
    %13 = vector.broadcast %cst_8 : f32 to vector<8x1xf32>
    %14 = arith.divf %12, %13 : vector<8x1xf32>
    %15 = vector.broadcast %7 : vector<8x1xf32> to vector<8x32xf32>
    %16 = arith.subf %1, %15 : vector<8x32xf32>
    %cst_9 = arith.constant 9.99999974E-6 : f32
    %17 = vector.broadcast %cst_9 : f32 to vector<8x1xf32>
    %18 = arith.addf %14, %17 : vector<8x1xf32>
    %19 = math.rsqrt %18 : vector<8x1xf32>
    %20 = vector.broadcast %19 : vector<8x1xf32> to vector<8x32xf32>
    %21 = arith.mulf %16, %20 : vector<8x32xf32>
    %22 = vector.broadcast %2 : vector<1x32xf32> to vector<8x32xf32>
    %23 = arith.mulf %21, %22 : vector<8x32xf32>
    %24 = vector.broadcast %3 : vector<1x32xf32> to vector<8x32xf32>
    %25 = arith.addf %23, %24 : vector<8x32xf32>
    %26 = arith.truncf %25 : vector<8x32xf32> to vector<8x32xbf16>
    %c0_10 = arith.constant 0 : index
    %c0_11 = arith.constant 0 : index
    %27 = vector.load %arg4[%c0_10, %c0_11] : memref<32x32xbf16, #tpu.memory_space<vmem>>, vector<32x32xbf16>
    %cst_12 = arith.constant dense<0.000000e+00> : vector<8x32xf32>
    %28 = tpu.matmul %26, %27, %cst_12 {dimension_numbers = #tpu.dot_dimension_numbers<[1], [0], [0], [1], [0, 0, 1, 1], [], []>} : vector<8x32xbf16>, vector<32x32xbf16>, vector<8x32xf32> -> vector<8x32xf32>
    %c0_13 = arith.constant 0 : index
    %c0_14 = arith.constant 0 : index
    %29 = vector.load %arg5[%c0_13, %c0_14] : memref<1x32xf32, #tpu.memory_space<vmem>>, vector<1x32xf32>
    %30 = vector.broadcast %29 : vector<1x32xf32> to vector<8x32xf32>
    %31 = arith.addf %28, %30 : vector<8x32xf32>
    %32 = arith.truncf %31 : vector<8x32xf32> to vector<8x32xbf16>
    %c0_15 = arith.constant 0 : index
    %c0_16 = arith.constant 0 : index
    %33 = vector.load %arg6[%c0_15, %c0_16] : memref<32x32xbf16, #tpu.memory_space<vmem>>, vector<32x32xbf16>
    %cst_17 = arith.constant dense<0.000000e+00> : vector<8x32xf32>
    %34 = tpu.matmul %26, %33, %cst_17 {dimension_numbers = #tpu.dot_dimension_numbers<[1], [0], [0], [1], [0, 0, 1, 1], [], []>} : vector<8x32xbf16>, vector<32x32xbf16>, vector<8x32xf32> -> vector<8x32xf32>
    %c0_18 = arith.constant 0 : index
    %c0_19 = arith.constant 0 : index
    %35 = vector.load %arg7[%c0_18, %c0_19] : memref<1x32xf32, #tpu.memory_space<vmem>>, vector<1x32xf32>
    %36 = vector.broadcast %35 : vector<1x32xf32> to vector<8x32xf32>
    %37 = arith.addf %34, %36 : vector<8x32xf32>
    %38 = arith.truncf %37 : vector<8x32xf32> to vector<8x32xbf16>
    %c0_20 = arith.constant 0 : index
    %c0_21 = arith.constant 0 : index
    %39 = vector.load %arg8[%c0_20, %c0_21] : memref<32x32xbf16, #tpu.memory_space<vmem>>, vector<32x32xbf16>
    %cst_22 = arith.constant dense<0.000000e+00> : vector<8x32xf32>
    %40 = tpu.matmul %26, %39, %cst_22 {dimension_numbers = #tpu.dot_dimension_numbers<[1], [0], [0], [1], [0, 0, 1, 1], [], []>} : vector<8x32xbf16>, vector<32x32xbf16>, vector<8x32xf32> -> vector<8x32xf32>
    %c0_23 = arith.constant 0 : index
    %c0_24 = arith.constant 0 : index
    %41 = vector.load %arg9[%c0_23, %c0_24] : memref<1x32xf32, #tpu.memory_space<vmem>>, vector<1x32xf32>
    %42 = vector.broadcast %41 : vector<1x32xf32> to vector<8x32xf32>
    %43 = arith.addf %40, %42 : vector<8x32xf32>
    %44 = arith.truncf %43 : vector<8x32xf32> to vector<8x32xbf16>
    %45 = vector.extract_strided_slice %32 {offsets = [0, 0], sizes = [8, 8], strides = [1, 1]} : vector<8x32xbf16> to vector<8x8xbf16>
    %46 = vector.extract_strided_slice %38 {offsets = [0, 0], sizes = [8, 8], strides = [1, 1]} : vector<8x32xbf16> to vector<8x8xbf16>
    %47 = vector.extract_strided_slice %44 {offsets = [0, 0], sizes = [8, 8], strides = [1, 1]} : vector<8x32xbf16> to vector<8x8xbf16>
    %cst_25 = arith.constant dense<0.000000e+00> : vector<8x8xf32>
    %48 = tpu.matmul %45, %46, %cst_25 {dimension_numbers = #tpu.dot_dimension_numbers<[1], [1], [0], [0], [0, 0, 1, 0], [], []>} : vector<8x8xbf16>, vector<8x8xbf16>, vector<8x8xf32> -> vector<8x8xf32>
    %cst_26 = arith.constant dense<0xFF800000> : vector<8xf32>
    %49 = vector.multi_reduction <maximumf>, %48, %cst_26 [1] : vector<8x8xf32> to vector<8xf32>
    %50 = vector.shape_cast %49 : vector<8xf32> to vector<8x1xf32>
    %51 = vector.broadcast %50 : vector<8x1xf32> to vector<8x8xf32>
    %52 = arith.subf %48, %51 : vector<8x8xf32>
    %53 = math.exp %52 : vector<8x8xf32>
    %cst_27 = arith.constant dense<0.000000e+00> : vector<8xf32>
    %54 = vector.multi_reduction <add>, %53, %cst_27 [1] : vector<8x8xf32> to vector<8xf32>
    %55 = vector.shape_cast %54 : vector<8xf32> to vector<8x1xf32>
    %56 = arith.truncf %53 : vector<8x8xf32> to vector<8x8xbf16>
    %cst_28 = arith.constant dense<0.000000e+00> : vector<8x8xf32>
    %57 = tpu.matmul %56, %47, %cst_28 {dimension_numbers = #tpu.dot_dimension_numbers<[1], [0], [0], [1], [0, 0, 1, 1], [], []>} : vector<8x8xbf16>, vector<8x8xbf16>, vector<8x8xf32> -> vector<8x8xf32>
    %58 = tpu.reciprocal %55 {approx = true} : vector<8x1xf32> -> vector<8x1xf32>
    %59 = vector.broadcast %58 : vector<8x1xf32> to vector<8x8xf32>
    %60 = arith.mulf %57, %59 : vector<8x8xf32>
    %61 = arith.truncf %60 : vector<8x8xf32> to vector<8x8xbf16>
    %62 = vector.extract_strided_slice %32 {offsets = [0, 8], sizes = [8, 8], strides = [1, 1]} : vector<8x32xbf16> to vector<8x8xbf16>
    %63 = vector.extract_strided_slice %38 {offsets = [0, 8], sizes = [8, 8], strides = [1, 1]} : vector<8x32xbf16> to vector<8x8xbf16>
    %64 = vector.extract_strided_slice %44 {offsets = [0, 8], sizes = [8, 8], strides = [1, 1]} : vector<8x32xbf16> to vector<8x8xbf16>
    %cst_29 = arith.constant dense<0.000000e+00> : vector<8x8xf32>
    %65 = tpu.matmul %62, %63, %cst_29 {dimension_numbers = #tpu.dot_dimension_numbers<[1], [1], [0], [0], [0, 0, 1, 0], [], []>} : vector<8x8xbf16>, vector<8x8xbf16>, vector<8x8xf32> -> vector<8x8xf32>
    %cst_30 = arith.constant dense<0xFF800000> : vector<8xf32>
    %66 = vector.multi_reduction <maximumf>, %65, %cst_30 [1] : vector<8x8xf32> to vector<8xf32>
    %67 = vector.shape_cast %66 : vector<8xf32> to vector<8x1xf32>
    %68 = vector.broadcast %67 : vector<8x1xf32> to vector<8x8xf32>
    %69 = arith.subf %65, %68 : vector<8x8xf32>
    %70 = math.exp %69 : vector<8x8xf32>
    %cst_31 = arith.constant dense<0.000000e+00> : vector<8xf32>
    %71 = vector.multi_reduction <add>, %70, %cst_31 [1] : vector<8x8xf32> to vector<8xf32>
    %72 = vector.shape_cast %71 : vector<8xf32> to vector<8x1xf32>
    %73 = arith.truncf %70 : vector<8x8xf32> to vector<8x8xbf16>
    %cst_32 = arith.constant dense<0.000000e+00> : vector<8x8xf32>
    %74 = tpu.matmul %73, %64, %cst_32 {dimension_numbers = #tpu.dot_dimension_numbers<[1], [0], [0], [1], [0, 0, 1, 1], [], []>} : vector<8x8xbf16>, vector<8x8xbf16>, vector<8x8xf32> -> vector<8x8xf32>
    %75 = tpu.reciprocal %72 {approx = true} : vector<8x1xf32> -> vector<8x1xf32>
    %76 = vector.broadcast %75 : vector<8x1xf32> to vector<8x8xf32>
    %77 = arith.mulf %74, %76 : vector<8x8xf32>
    %78 = arith.truncf %77 : vector<8x8xf32> to vector<8x8xbf16>
    %79 = tpu.concatenate %61, %78 in 1 : vector<8x8xbf16>, vector<8x8xbf16> -> vector<8x16xbf16>
    %c0_33 = arith.constant 0 : index
    %c0_34 = arith.constant 0 : index
    %80 = vector.load %arg19[%c0_33, %c0_34] : memref<8x32xbf16, #tpu.memory_space<vmem>>, vector<8x16xbf16>
    tpu.vector_store %arg19[%c0_33, %c0_34], %79 {strides = array<i32>} : memref<8x32xbf16, #tpu.memory_space<vmem>>, vector<8x16xbf16>,
    %81 = vector.extract_strided_slice %32 {offsets = [0, 16], sizes = [8, 8], strides = [1, 1]} : vector<8x32xbf16> to vector<8x8xbf16>
    %82 = vector.extract_strided_slice %38 {offsets = [0, 16], sizes = [8, 8], strides = [1, 1]} : vector<8x32xbf16> to vector<8x8xbf16>
    %83 = vector.extract_strided_slice %44 {offsets = [0, 16], sizes = [8, 8], strides = [1, 1]} : vector<8x32xbf16> to vector<8x8xbf16>
    %cst_35 = arith.constant dense<0.000000e+00> : vector<8x8xf32>
    %84 = tpu.matmul %81, %82, %cst_35 {dimension_numbers = #tpu.dot_dimension_numbers<[1], [1], [0], [0], [0, 0, 1, 0], [], []>} : vector<8x8xbf16>, vector<8x8xbf16>, vector<8x8xf32> -> vector<8x8xf32>
    %cst_36 = arith.constant dense<0xFF800000> : vector<8xf32>
    %85 = vector.multi_reduction <maximumf>, %84, %cst_36 [1] : vector<8x8xf32> to vector<8xf32>
    %86 = vector.shape_cast %85 : vector<8xf32> to vector<8x1xf32>
    %87 = vector.broadcast %86 : vector<8x1xf32> to vector<8x8xf32>
    %88 = arith.subf %84, %87 : vector<8x8xf32>
    %89 = math.exp %88 : vector<8x8xf32>
    %cst_37 = arith.constant dense<0.000000e+00> : vector<8xf32>
    %90 = vector.multi_reduction <add>, %89, %cst_37 [1] : vector<8x8xf32> to vector<8xf32>
    %91 = vector.shape_cast %90 : vector<8xf32> to vector<8x1xf32>
    %92 = arith.truncf %89 : vector<8x8xf32> to vector<8x8xbf16>
    %cst_38 = arith.constant dense<0.000000e+00> : vector<8x8xf32>
    %93 = tpu.matmul %92, %83, %cst_38 {dimension_numbers = #tpu.dot_dimension_numbers<[1], [0], [0], [1], [0, 0, 1, 1], [], []>} : vector<8x8xbf16>, vector<8x8xbf16>, vector<8x8xf32> -> vector<8x8xf32>
    %94 = tpu.reciprocal %91 {approx = true} : vector<8x1xf32> -> vector<8x1xf32>
    %95 = vector.broadcast %94 : vector<8x1xf32> to vector<8x8xf32>
    %96 = arith.mulf %93, %95 : vector<8x8xf32>
    %97 = arith.truncf %96 : vector<8x8xf32> to vector<8x8xbf16>
    %98 = vector.extract_strided_slice %32 {offsets = [0, 24], sizes = [8, 8], strides = [1, 1]} : vector<8x32xbf16> to vector<8x8xbf16>
    %99 = vector.extract_strided_slice %38 {offsets = [0, 24], sizes = [8, 8], strides = [1, 1]} : vector<8x32xbf16> to vector<8x8xbf16>
    %100 = vector.extract_strided_slice %44 {offsets = [0, 24], sizes = [8, 8], strides = [1, 1]} : vector<8x32xbf16> to vector<8x8xbf16>
    %cst_39 = arith.constant dense<0.000000e+00> : vector<8x8xf32>
    %101 = tpu.matmul %98, %99, %cst_39 {dimension_numbers = #tpu.dot_dimension_numbers<[1], [1], [0], [0], [0, 0, 1, 0], [], []>} : vector<8x8xbf16>, vector<8x8xbf16>, vector<8x8xf32> -> vector<8x8xf32>
    %cst_40 = arith.constant dense<0xFF800000> : vector<8xf32>
    %102 = vector.multi_reduction <maximumf>, %101, %cst_40 [1] : vector<8x8xf32> to vector<8xf32>
    %103 = vector.shape_cast %102 : vector<8xf32> to vector<8x1xf32>
    %104 = vector.broadcast %103 : vector<8x1xf32> to vector<8x8xf32>
    %105 = arith.subf %101, %104 : vector<8x8xf32>
    %106 = math.exp %105 : vector<8x8xf32>
    %cst_41 = arith.constant dense<0.000000e+00> : vector<8xf32>
    %107 = vector.multi_reduction <add>, %106, %cst_41 [1] : vector<8x8xf32> to vector<8xf32>
    %108 = vector.shape_cast %107 : vector<8xf32> to vector<8x1xf32>
    %109 = arith.truncf %106 : vector<8x8xf32> to vector<8x8xbf16>
    %cst_42 = arith.constant dense<0.000000e+00> : vector<8x8xf32>
    %110 = tpu.matmul %109, %100, %cst_42 {dimension_numbers = #tpu.dot_dimension_numbers<[1], [0], [0], [1], [0, 0, 1, 1], [], []>} : vector<8x8xbf16>, vector<8x8xbf16>, vector<8x8xf32> -> vector<8x8xf32>
    %111 = tpu.reciprocal %108 {approx = true} : vector<8x1xf32> -> vector<8x1xf32>
    %112 = vector.broadcast %111 : vector<8x1xf32> to vector<8x8xf32>
    %113 = arith.mulf %110, %112 : vector<8x8xf32>
    %114 = arith.truncf %113 : vector<8x8xf32> to vector<8x8xbf16>
    %115 = tpu.concatenate %97, %114 in 1 : vector<8x8xbf16>, vector<8x8xbf16> -> vector<8x16xbf16>
    %c0_43 = arith.constant 0 : index
    %c16 = arith.constant 16 : index
    %116 = vector.load %arg19[%c0_43, %c16] : memref<8x32xbf16, #tpu.memory_space<vmem>>, vector<8x16xbf16>
    tpu.vector_store %arg19[%c0_43, %c16], %115 {strides = array<i32>} : memref<8x32xbf16, #tpu.memory_space<vmem>>, vector<8x16xbf16>,
    %c0_44 = arith.constant 0 : index
    %c0_45 = arith.constant 0 : index
    %117 = vector.load %arg19[%c0_44, %c0_45] : memref<8x32xbf16, #tpu.memory_space<vmem>>, vector<8x32xbf16>
    %c0_46 = arith.constant 0 : index
    %c0_47 = arith.constant 0 : index
    %118 = vector.load %arg10[%c0_46, %c0_47] : memref<32x32xbf16, #tpu.memory_space<vmem>>, vector<32x32xbf16>
    %cst_48 = arith.constant dense<0.000000e+00> : vector<8x32xf32>
    %119 = tpu.matmul %117, %118, %cst_48 {dimension_numbers = #tpu.dot_dimension_numbers<[1], [0], [0], [1], [0, 0, 1, 1], [], []>} : vector<8x32xbf16>, vector<32x32xbf16>, vector<8x32xf32> -> vector<8x32xf32>
    %c0_49 = arith.constant 0 : index
    %c0_50 = arith.constant 0 : index
    %120 = vector.load %arg11[%c0_49, %c0_50] : memref<1x32xf32, #tpu.memory_space<vmem>>, vector<1x32xf32>
    %121 = vector.broadcast %120 : vector<1x32xf32> to vector<8x32xf32>
    %122 = arith.addf %119, %121 : vector<8x32xf32>
    %123 = arith.addf %1, %122 : vector<8x32xf32>
    %c0_51 = arith.constant 0 : index
    %c0_52 = arith.constant 0 : index
    %124 = vector.load %arg20[%c0_51, %c0_52] : memref<8x32xf32, #tpu.memory_space<vmem>>, vector<8x32xf32>
    tpu.vector_store %arg20[%c0_51, %c0_52], %123 {strides = array<i32>} : memref<8x32xf32, #tpu.memory_space<vmem>>, vector<8x32xf32>,
    %c0_53 = arith.constant 0 : index
    %c0_54 = arith.constant 0 : index
    %125 = vector.load %arg12[%c0_53, %c0_54] : memref<1x32xf32, #tpu.memory_space<vmem>>, vector<1x32xf32>
    %c0_55 = arith.constant 0 : index
    %c0_56 = arith.constant 0 : index
    %126 = vector.load %arg13[%c0_55, %c0_56] : memref<1x32xf32, #tpu.memory_space<vmem>>, vector<1x32xf32>
    %c0_57 = arith.constant 0 : index
    %c0_58 = arith.constant 0 : index
    %127 = vector.load %arg15[%c0_57, %c0_58] : memref<1x64xf32, #tpu.memory_space<vmem>>, vector<1x64xf32>
    %c0_59 = arith.constant 0 : index
    %c0_60 = arith.constant 0 : index
    %128 = vector.load %arg17[%c0_59, %c0_60] : memref<1x32xf32, #tpu.memory_space<vmem>>, vector<1x32xf32>
    %cst_61 = arith.constant 0.707106769 : f32
    %c0_i32 = arith.constant 0 : i32
    %c8_i32 = arith.constant 8 : i32
    %129 = arith.muli %c0_i32, %c8_i32 : i32
    %130 = tpu.assume_multiple %129, 8 : i32
    %131 = arith.index_cast %130 : i32 to index
    %c0_62 = arith.constant 0 : index
    %132 = vector.load %arg20[%131, %c0_62] : memref<8x32xf32, #tpu.memory_space<vmem>>, vector<8x32xf32>
    %cst_63 = arith.constant dense<0.000000e+00> : vector<8xf32>
    %133 = vector.multi_reduction <add>, %132, %cst_63 [1] : vector<8x32xf32> to vector<8xf32>
    %134 = vector.shape_cast %133 : vector<8xf32> to vector<8x1xf32>
    %cst_64 = arith.constant 3.200000e+01 : f32
    %135 = vector.broadcast %cst_64 : f32 to vector<8x1xf32>
    %136 = arith.divf %134, %135 : vector<8x1xf32>
    %137 = vector.broadcast %136 : vector<8x1xf32> to vector<8x32xf32>
    %138 = arith.subf %132, %137 : vector<8x32xf32>
    %139 = arith.mulf %138, %138 : vector<8x32xf32>
    %cst_65 = arith.constant dense<0.000000e+00> : vector<8xf32>
    %140 = vector.multi_reduction <add>, %139, %cst_65 [1] : vector<8x32xf32> to vector<8xf32>
    %141 = vector.shape_cast %140 : vector<8xf32> to vector<8x1xf32>
    %cst_66 = arith.constant 3.200000e+01 : f32
    %142 = vector.broadcast %cst_66 : f32 to vector<8x1xf32>
    %143 = arith.divf %141, %142 : vector<8x1xf32>
    %144 = vector.broadcast %136 : vector<8x1xf32> to vector<8x32xf32>
    %145 = arith.subf %132, %144 : vector<8x32xf32>
    %cst_67 = arith.constant 9.99999974E-6 : f32
    %146 = vector.broadcast %cst_67 : f32 to vector<8x1xf32>
    %147 = arith.addf %143, %146 : vector<8x1xf32>
    %148 = math.rsqrt %147 : vector<8x1xf32>
    %149 = vector.broadcast %148 : vector<8x1xf32> to vector<8x32xf32>
    %150 = arith.mulf %145, %149 : vector<8x32xf32>
    %151 = vector.broadcast %125 : vector<1x32xf32> to vector<8x32xf32>
    %152 = arith.mulf %150, %151 : vector<8x32xf32>
    %153 = vector.broadcast %126 : vector<1x32xf32> to vector<8x32xf32>
    %154 = arith.addf %152, %153 : vector<8x32xf32>
    %155 = arith.truncf %154 : vector<8x32xf32> to vector<8x32xbf16>
    %c0_68 = arith.constant 0 : index
    %c0_69 = arith.constant 0 : index
    %156 = vector.load %arg14[%c0_68, %c0_69] : memref<32x64xbf16, #tpu.memory_space<vmem>>, vector<32x64xbf16>
    %cst_70 = arith.constant dense<0.000000e+00> : vector<8x64xf32>
    %157 = tpu.matmul %155, %156, %cst_70 {dimension_numbers = #tpu.dot_dimension_numbers<[1], [0], [0], [1], [0, 0, 1, 1], [], []>} : vector<8x32xbf16>, vector<32x64xbf16>, vector<8x64xf32> -> vector<8x64xf32>
    %158 = vector.broadcast %127 : vector<1x64xf32> to vector<8x64xf32>
    %159 = arith.addf %157, %158 : vector<8x64xf32>
    %cst_71 = arith.constant 5.000000e-01 : f32
    %160 = vector.broadcast %cst_71 : f32 to vector<8x64xf32>
    %161 = arith.mulf %160, %159 : vector<8x64xf32>
    %162 = vector.broadcast %cst_61 : f32 to vector<8x64xf32>
    %163 = arith.mulf %159, %162 : vector<8x64xf32>
    %164 = math.erf %163 : vector<8x64xf32>
    %cst_72 = arith.constant 1.000000e+00 : f32
    %165 = vector.broadcast %cst_72 : f32 to vector<8x64xf32>
    %166 = arith.addf %165, %164 : vector<8x64xf32>
    %167 = arith.mulf %161, %166 : vector<8x64xf32>
    %168 = arith.truncf %167 : vector<8x64xf32> to vector<8x64xbf16>
    %c0_73 = arith.constant 0 : index
    %c0_74 = arith.constant 0 : index
    %169 = vector.load %arg16[%c0_73, %c0_74] : memref<64x32xbf16, #tpu.memory_space<vmem>>, vector<64x32xbf16>
    %cst_75 = arith.constant dense<0.000000e+00> : vector<8x32xf32>
    %170 = tpu.matmul %168, %169, %cst_75 {dimension_numbers = #tpu.dot_dimension_numbers<[1], [0], [0], [1], [0, 0, 1, 1], [], []>} : vector<8x64xbf16>, vector<64x32xbf16>, vector<8x32xf32> -> vector<8x32xf32>
    %171 = vector.broadcast %128 : vector<1x32xf32> to vector<8x32xf32>
    %172 = arith.addf %170, %171 : vector<8x32xf32>
    %173 = arith.addf %132, %172 : vector<8x32xf32>
    %c0_76 = arith.constant 0 : index
    %174 = arith.index_cast %130 : i32 to index
    %c0_77 = arith.constant 0 : index
    %175 = vector.load %arg18[%c0_76, %174, %c0_77] : memref<1x8x32xf32, #tpu.memory_space<vmem>>, vector<1x8x32xf32>
    %176 = vector.shape_cast %175 : vector<1x8x32xf32> to vector<8x32xf32>
    %177 = vector.shape_cast %173 : vector<8x32xf32> to vector<1x8x32xf32>
    tpu.vector_store %arg18[%c0_76, %174, %c0_77], %177 {strides = array<i32>} : memref<1x8x32xf32, #tpu.memory_space<vmem>>, vector<1x8x32xf32>,
    %c1_i32 = arith.constant 1 : i32
    return
  }
  func.func @transform_0(%arg0: i32) -> (i32, i32, i32) {
    %c0_i32 = arith.constant 0 : i32
    %c0_i32_0 = arith.constant 0 : i32
    %c0_i32_1 = arith.constant 0 : i32
    return %arg0, %c0_i32, %c0_i32_0 : i32, i32, i32
  }
  func.func @transform_1(%arg0: i32) -> (i32, i32) {
    %c0_i32 = arith.constant 0 : i32
    %c0_i32_0 = arith.constant 0 : i32
    %c0_i32_1 = arith.constant 0 : i32
    return %c0_i32, %c0_i32_0 : i32, i32
  }
  func.func @transform_2(%arg0: i32) -> (i32, i32) {
    %c0_i32 = arith.constant 0 : i32
    %c0_i32_0 = arith.constant 0 : i32
    %c0_i32_1 = arith.constant 0 : i32
    return %c0_i32, %c0_i32_0 : i32, i32
  }
  func.func @transform_3(%arg0: i32) -> (i32, i32) {
    %c0_i32 = arith.constant 0 : i32
    %c0_i32_0 = arith.constant 0 : i32
    %c0_i32_1 = arith.constant 0 : i32
    return %c0_i32, %c0_i32_0 : i32, i32
  }
  func.func @transform_4(%arg0: i32) -> (i32, i32) {
    %c0_i32 = arith.constant 0 : i32
    %c0_i32_0 = arith.constant 0 : i32
    %c0_i32_1 = arith.constant 0 : i32
    return %c0_i32, %c0_i32_0 : i32, i32
  }
  func.func @transform_5(%arg0: i32) -> (i32, i32) {
    %c0_i32 = arith.constant 0 : i32
    %c0_i32_0 = arith.constant 0 : i32
    %c0_i32_1 = arith.constant 0 : i32
    return %c0_i32, %c0_i32_0 : i32, i32
  }
  func.func @transform_6(%arg0: i32) -> (i32, i32) {
    %c0_i32 = arith.constant 0 : i32
    %c0_i32_0 = arith.constant 0 : i32
    %c0_i32_1 = arith.constant 0 : i32
    return %c0_i32, %c0_i32_0 : i32, i32
  }
  func.func @transform_7(%arg0: i32) -> (i32, i32) {
    %c0_i32 = arith.constant 0 : i32
    %c0_i32_0 = arith.constant 0 : i32
    %c0_i32_1 = arith.constant 0 : i32
    return %c0_i32, %c0_i32_0 : i32, i32
  }
  func.func @transform_8(%arg0: i32) -> (i32, i32) {
    %c0_i32 = arith.constant 0 : i32
    %c0_i32_0 = arith.constant 0 : i32
    %c0_i32_1 = arith.constant 0 : i32
    return %c0_i32, %c0_i32_0 : i32, i32
  }
  func.func @transform_9(%arg0: i32) -> (i32, i32) {
    %c0_i32 = arith.constant 0 : i32
    %c0_i32_0 = arith.constant 0 : i32
    %c0_i32_1 = arith.constant 0 : i32
    return %c0_i32, %c0_i32_0 : i32, i32
  }
  func.func @transform_10(%arg0: i32) -> (i32, i32) {
    %c0_i32 = arith.constant 0 : i32
    %c0_i32_0 = arith.constant 0 : i32
    %c0_i32_1 = arith.constant 0 : i32
    return %c0_i32, %c0_i32_0 : i32, i32
  }
  func.func @transform_11(%arg0: i32) -> (i32, i32) {
    %c0_i32 = arith.constant 0 : i32
    %c0_i32_0 = arith.constant 0 : i32
    %c0_i32_1 = arith.constant 0 : i32
    return %c0_i32, %c0_i32_0 : i32, i32
  }
  func.func @transform_12(%arg0: i32) -> (i32, i32) {
    %c0_i32 = arith.constant 0 : i32
    %c0_i32_0 = arith.constant 0 : i32
    %c0_i32_1 = arith.constant 0 : i32
    return %c0_i32, %c0_i32_0 : i32, i32
  }
  func.func @transform_13(%arg0: i32) -> (i32, i32) {
    %c0_i32 = arith.constant 0 : i32
    %c0_i32_0 = arith.constant 0 : i32
    %c0_i32_1 = arith.constant 0 : i32
    return %c0_i32, %c0_i32_0 : i32, i32
  }
  func.func @transform_14(%arg0: i32) -> (i32, i32) {
    %c0_i32 = arith.constant 0 : i32
    %c0_i32_0 = arith.constant 0 : i32
    %c0_i32_1 = arith.constant 0 : i32
    return %c0_i32, %c0_i32_0 : i32, i32
  }
  func.func @transform_15(%arg0: i32) -> (i32, i32) {
    %c0_i32 = arith.constant 0 : i32
    %c0_i32_0 = arith.constant 0 : i32
    %c0_i32_1 = arith.constant 0 : i32
    return %c0_i32, %c0_i32_0 : i32, i32
  }
  func.func @transform_16(%arg0: i32) -> (i32, i32) {
    %c0_i32 = arith.constant 0 : i32
    %c0_i32_0 = arith.constant 0 : i32
    %c0_i32_1 = arith.constant 0 : i32
    return %c0_i32, %c0_i32_0 : i32, i32
  }
  func.func @transform_17(%arg0: i32) -> (i32, i32, i32) {
    %c0_i32 = arith.constant 0 : i32
    %c0_i32_0 = arith.constant 0 : i32
    %c0_i32_1 = arith.constant 0 : i32
    return %arg0, %c0_i32, %c0_i32_0 : i32, i32, i32
  }
}

</mosaic_0001>

<bundles_post_ra>
// kernel: tpu_custom_call.1
= control target key start
LH: loop header
LB: loop body
LE: loop exit
PB: predicated region body
PF: predicated region fallthrough
CT: control target
= control target key end

     0   :  { %s2974_s0 = inlined_call_operand.vmem [shape: f32[2,8,32], index: 0, kind: input, shape index: {}]   ;;  %s2975_s1 = inlined_call_operand.vmem [shape: f32[1,32], index: 1, kind: input, shape index: {}]   ;;  %s2976_s2 = inlined_call_operand.hbm [shape: f32[1,32], index: 2, kind: input, shape index: {}]   ;;  %s2977_s3 = inlined_call_operand.vmem [shape: bf16[32,32], index: 3, kind: input, shape index: {}]   ;;  %s2978_s4 = inlined_call_operand.hbm [shape: f32[1,32], index: 4, kind: input, shape index: {}]   ;;  %s2979_s5 = inlined_call_operand.vmem [shape: bf16[32,32], index: 5, kind: input, shape index: {}]   ;;  %s2980_s6 = inlined_call_operand.hbm [shape: f32[1,32], index: 6, kind: input, shape index: {}]   ;;  %s2981_s7 = inlined_call_operand.hbm [shape: bf16[32,32], index: 7, kind: input, shape index: {}]   ;;  %s2982_s8 = inlined_call_operand.hbm [shape: f32[1,32], index: 8, kind: input, shape index: {}]   ;;  %s2983_s9 = inlined_call_operand.vmem [shape: bf16[32,32], index: 9, kind: input, shape index: {}]   ;;  %s2984_s10 = inlined_call_operand.hbm [shape: f32[1,32], index: 10, kind: input, shape index: {}]   ;;  %s2985_s11 = inlined_call_operand.hbm [shape: f32[1,32], index: 11, kind: input, shape index: {}]   ;;  %s2986_s12 = inlined_call_operand.hbm [shape: f32[1,32], index: 12, kind: input, shape index: {}]   ;;  %s2987_s13 = inlined_call_operand.vmem [shape: bf16[32,64], index: 13, kind: input, shape index: {}]   ;;  %s2988_s14 = inlined_call_operand.vmem [shape: f32[1,64], index: 14, kind: input, shape index: {}]   ;;  %s2989_s15 = inlined_call_operand.vmem [shape: bf16[64,32], index: 15, kind: input, shape index: {}]   ;;  %s2990_s16 = inlined_call_operand.vmem [shape: f32[1,32], index: 16, kind: input, shape index: {}]   ;;  %s2991_s17 = inlined_call_operand.hbm [shape: f32[2,8,32], index: 17, kind: output, shape index: {}]  }
   0x1   :  { %3004 = sst [smem:[#allocation32_spill]] %s2974_s0 }
   0x2   :  { %3005 = sst [smem:[#allocation33_spill]] %s2975_s1 }
   0x3   :  { %3006 = sst [smem:[#allocation34_spill]] %s2978_s4 }
   0x4   :  { %3007 = sst [smem:[#allocation35_spill]] %s2990_s16 }
   0x5   :  { %3008 = sst [smem:[#allocation36_spill]] %s2991_s17 }
   0x6   :  { %22 = vsyncpa [#allocation5], 0 }
   0x7   :  { %23 = vsyncpa [#allocation8], 0 }
   0x8   :  { %24 = vsyncpa [#allocation11], 0 }
   0x9   :  { %25 = vsyncpa [#allocation14], 0 }
   0xa   :  { %26 = vsyncpa [#allocation17], 0 }
   0xb   :  { %27 = vsyncpa [#allocation6], 0 }
   0xc   :  { %29 = vsyncpa [#allocation6 + $0x1], 0  ;;  %s2533_s24 = smov 0   ;;  %s2535_s25 = smov 0  }
   0xd   :  { %s2537_s26 = smov 0   ;;  %s2539_s27 = smov 0  }
   0xe LB: > { %3009 = sst [smem:[#allocation25_spill]] %s2411_s24  ;;  %s2554_s28 = sadd.s32 4294967295, %s2423_s27   ;;  %s2423_s27 = sphi %s2539_s27, %s3043_s27   ;;  %s2419_s26 = sphi %s2537_s26, %s3045_s26   ;;  %s2415_s25 = sphi %s2535_s25, %s3047_s25   ;;  %s2411_s24 = sphi %s2533_s24, %s3046_s24  }
   0xf   : > { %3010 = sst [smem:[#allocation26_spill]] %s2419_s26  ;;  %s1751_s29 = sadd.s32 4294967294, %s2423_s27  }
  0x10   : > { %3011 = sst [smem:[#allocation27_spill]] %s2423_s27  ;;  %s2558_s0 = sadd.s32 1, %s2423_s27  }
  0x11   : > { %3012 = sst [smem:[#allocation28_spill]] %s2558_s0  ;;  %s404_s30 = sadd.s32 1, %s2419_s26 }
  0x12   : > { %s401_s18 = ssub.s32 %s2423_s27, %s2558_s0  ;;  %p414_p0 = scmp.ne.s32.totalorder %s2419_s26, %s2415_s25 }
  0x13   : > { %p402_p1 = scmp.eq.s32.totalorder %s401_s18, 0  ;;  %p415_p2 = scmp.eq.s32.totalorder %s2554_s28, 1 }
  0x14   : > { %p420_p3 = scmp.ne.s32.totalorder %s2415_s25, %s2411_s24  ;;  %p421_p4 = scmp.eq.s32.totalorder %s1751_s29, 1 }
  0x15   : > { %s2569_s19 = scalar_select %p402_p1, %s2419_s26, %s404_s30  }
  0x16   : > { %p2571_p5 = por %p415_p2, %p414_p0  ;;  %p2575_p6 = por %p421_p4, %p420_p3 }
  0x17   : > { %3013 = sst [smem:[#allocation29_spill]] %s2569_s19  ;;  %p1752_p7 = scmp.ge.s32.totalorder %s2423_s27, 1 }
  0x18   : > { %s3014_s1 = scalar_select %p2571_p5, 1, 0 }
  0x19   : > { %s3016_s20 = scalar_select %p2575_p6, 1, 0 }
  0x1a   : > { %3015 = sst [smem:[#allocation30_spill]] %s3014_s1  ;;  %p428_p8 = scmp.lt.s32.totalorder %s2423_s27, 3 }
  0x1b   : > { %3017 = sst [smem:[#allocation31_spill]] %s3016_s20  ;;  %p2999_p9 = scmp.eq.s32.totalorder %s2554_s28, 0 }
  0x1c   : > { %p2582_p10 = pnand %p1752_p7, %p428_p8  ;;  %s2425_s22 = smov [#allocation7]  }
  0x1d   : > { %s458_s23 = sshll.u32 %s2425_s22, 4  ;;  %s2426_s29 = smov [#allocation10]   ;;  %s459_s23 = int_to_ptr.vmem [resolvable:$true] %s458_s23 }
  0x1e   : > { %s3018_s21 = scalar_select %p2582_p10, 1, 0 }
  0x1f   : > { %p1986_p11 = pneg %p2582_p10  ;;  %s482_s30 = sshll.u32 %s2426_s29, 4  ;;  %s2594_s30 = int_to_ptr.vmem [resolvable:$true] %s482_s30 }
  0x20   : > { %s2427_s19 = smov [#allocation13]   ;;  %s3020_s4 = sld [smem:[#allocation34_spill]] }
  0x21   : > { %p2590_p12 = pnand %p2999_p9, %p1986_p11  ;;  %s2596_s26 = sshll.u32 %s2427_s19, 4  ;;  %s511_s26 = int_to_ptr.vmem [resolvable:$true] %s2596_s26 }
  0x23   : > { %p2606_p0 = pneg %p2590_p12 }
  0x26   : > { %s2117_s22 = scalar_lea.hbm %s3020_s4, 16 }
  0x27   : > { %p2118_p13 = scmp.ne.s32.totalorder %s3020_s4, %s2117_s22  ;;  %p2124_p3 = scmp.lt.u32.totalorder %s2117_s22, %s3020_s4 }
  0x29   : > { %p2120_p1 = pnand %p2606_p0, %p2118_p13 }
  0x2b   : > { %p2121_p2 = pneg %p2120_p1 }
  0x2d   : > { %p2126_p4 = pnand %p2124_p3, %p2121_p2 }
  0x2f   : > { %2129 = shalt.err (!%p2126_p4)
}
  0x30   : > { %s2130_s0 = scalar_lea.vmem %s459_s23, 16  ;;  %s2137_s24 = scalar_lea.vmem %s459_s23, 32 }
  0x31   : > { %p2131_p7 = scmp.ne.s32.totalorder %s459_s23, %s2130_s0  ;;  %p2138_p9 = scmp.lt.s32.totalorder %s459_s23, %s459_s23 }
  0x32   : > { %p2139_p6 = scmp.lt.s32.totalorder %s2137_s24, %s2130_s0 }
  0x33   : > { %p2133_p8 = pnand %p2131_p7, %p2606_p0 }
  0x34   : > { %p2140_p5 = por %p2139_p6, %p2138_p9 }
  0x35   : > { %p2134_p11 = pneg %p2133_p8 }
  0x37   : > { %p2141_p10 = pnand %p2140_p5, %p2134_p11 }
  0x39   : > { %2144 = shalt.err (!%p2141_p10)
}
  0x3a   : > { %1992 = dma.hbm_to_vmem [thread:$0]  (!%p2590_p12), %s3020_s4, 16, %s459_s23, [#allocation8]  }
  0x3b   : > { %s2145_s19 = scalar_lea.hbm %s2981_s7, 256 }
  0x3c   : > { %p2146_p13 = scmp.ne.s32.totalorder %s2981_s7, %s2145_s19  ;;  %p2152_p5 = scmp.lt.u32.totalorder %s2145_s19, %s2981_s7 }
  0x3e   : > { %p2148_p1 = pnand %p2146_p13, %p2606_p0 }
  0x40   : > { %p2149_p6 = pneg %p2148_p1 }
  0x42   : > { %p2154_p9 = pnand %p2152_p5, %p2149_p6 }
  0x44   : > { %2157 = shalt.err (!%p2154_p9)
}
  0x45   : > { %s2158_s23 = scalar_lea.vmem %s2594_s30, 256  ;;  %p2166_p4 = scmp.lt.s32.totalorder %s2594_s30, %s2594_s30 }
  0x46   : > { %p2159_p10 = scmp.ne.s32.totalorder %s2594_s30, %s2158_s23  ;;  %p2167_p7 = scmp.lt.s32.totalorder %s2158_s23, %s2158_s23 }
  0x48   : > { %p2161_p2 = pnand %p2159_p10, %p2606_p0  ;;  %p2168_p8 = por %p2167_p7, %p2166_p4 }
  0x4a   : > { %p2162_p3 = pneg %p2161_p2 }
  0x4c   : > { %p2169_p11 = pnand %p2168_p8, %p2162_p3 }
  0x4e   : > { %2172 = shalt.err (!%p2169_p11)
}
  0x4f   : > { %s2428_s16 = smov 64   ;;  %s2429_s1 = smov 4  }
  0x50   : > { %1998 = dma.hbm_to_vmem [thread:$0]  (!%p2590_p12), %s2981_s7, 256, %s2594_s30, [#allocation11], %s2428_s16, %s2428_s16, %s2429_s1  }
  0x51   : > { %s2173_s19 = scalar_lea.hbm %s2984_s10, 16 }
  0x52   : > { %p2174_p13 = scmp.ne.s32.totalorder %s2984_s10, %s2173_s19  ;;  %p2180_p5 = scmp.lt.u32.totalorder %s2173_s19, %s2984_s10 }
  0x54   : > { %p2176_p1 = pnand %p2174_p13, %p2606_p0 }
  0x56   : > { %p2177_p6 = pneg %p2176_p1 }
  0x58   : > { %p2182_p9 = pnand %p2180_p5, %p2177_p6 }
  0x5a   : > { %2185 = shalt.err (!%p2182_p9)
}
  0x5b   : > { %s2186_s27 = scalar_lea.vmem %s511_s26, 16  ;;  %s2193_s30 = scalar_lea.vmem %s511_s26, 32 }
  0x5c   : > { %p2187_p10 = scmp.ne.s32.totalorder %s511_s26, %s2186_s27  ;;  %p2194_p4 = scmp.lt.s32.totalorder %s511_s26, %s511_s26 }
  0x5d   : > { %p2195_p7 = scmp.lt.s32.totalorder %s2193_s30, %s2186_s27 }
  0x5e   : > { %p2189_p2 = pnand %p2187_p10, %p2606_p0 }
  0x5f   : > { %p2196_p8 = por %p2195_p7, %p2194_p4 }
  0x60   : > { %p2190_p3 = pneg %p2189_p2 }
  0x62   : > { %p2197_p11 = pnand %p2196_p8, %p2190_p3 }
  0x64   : > { %2200 = shalt.err (!%p2197_p11)
}
  0x65   : > { %2004 = dma.hbm_to_vmem [thread:$0]  (!%p2590_p12), %s2984_s10, 16, %s511_s26, [#allocation14]  }
  0x66   : > { %s2430_s4 = smov [#allocation4]   ;;  %s2431_s17 = smov [#allocation9]  }
  0x67   : > { %s444_s20 = sshll.u32 %s2430_s4, 4  ;;  %s472_s22 = sshll.u32 %s2431_s17, 4  ;;  %s445_s20 = int_to_ptr.vmem [resolvable:$true] %s444_s20  ;;  %s473_s22 = int_to_ptr.vmem [resolvable:$true] %s472_s22 }
  0x68   : > { %s2201_s24 = scalar_lea.hbm %s2976_s2, 16 }
  0x69   : > { %p2202_p13 = scmp.ne.s32.totalorder %s2976_s2, %s2201_s24  ;;  %p2208_p5 = scmp.lt.u32.totalorder %s2201_s24, %s2976_s2 }
  0x6b   : > { %p2204_p1 = pnand %p2202_p13, %p2606_p0 }
  0x6d   : > { %p2205_p6 = pneg %p2204_p1 }
  0x6f   : > { %p2210_p9 = pnand %p2208_p5, %p2205_p6 }
  0x71   : > { %2213 = shalt.err (!%p2210_p9)
}
  0x72   : > { %s2214_s26 = scalar_lea.vmem %s445_s20, 16  ;;  %s2221_s1 = scalar_lea.vmem %s445_s20, 32 }
  0x73   : > { %p2215_p10 = scmp.ne.s32.totalorder %s445_s20, %s2214_s26  ;;  %p2222_p4 = scmp.lt.s32.totalorder %s445_s20, %s445_s20 }
  0x74   : > { %p2223_p7 = scmp.lt.s32.totalorder %s2221_s1, %s2214_s26 }
  0x75   : > { %p2217_p2 = pnand %p2215_p10, %p2606_p0 }
  0x76   : > { %p2224_p8 = por %p2223_p7, %p2222_p4 }
  0x77   : > { %p2218_p3 = pneg %p2217_p2 }
  0x79   : > { %p2225_p11 = pnand %p2224_p8, %p2218_p3 }
  0x7b   : > { %2228 = shalt.err (!%p2225_p11)
}
  0x7c   : > { %1989 = dma.hbm_to_vmem [thread:$0]  (!%p2590_p12), %s2976_s2, 16, %s445_s20, [#allocation5]  }
  0x7d   : > { %s2229_s24 = scalar_lea.hbm %s2980_s6, 16 }
  0x7e   : > { %p2230_p13 = scmp.ne.s32.totalorder %s2980_s6, %s2229_s24  ;;  %p2236_p5 = scmp.lt.u32.totalorder %s2229_s24, %s2980_s6 }
  0x80   : > { %p2232_p1 = pnand %p2230_p13, %p2606_p0 }
  0x82   : > { %p2233_p6 = pneg %p2232_p1 }
  0x84   : > { %p2238_p9 = pnand %p2236_p5, %p2233_p6 }
  0x86   : > { %2241 = shalt.err (!%p2238_p9)
}
  0x87   : > { %s2242_s26 = scalar_lea.vmem %s473_s22, 16  ;;  %s2249_s20 = scalar_lea.vmem %s473_s22, 32 }
  0x88   : > { %p2243_p10 = scmp.ne.s32.totalorder %s473_s22, %s2242_s26  ;;  %p2250_p4 = scmp.lt.s32.totalorder %s473_s22, %s473_s22 }
  0x89   : > { %p2251_p7 = scmp.lt.s32.totalorder %s2249_s20, %s2242_s26 }
  0x8a   : > { %p2245_p2 = pnand %p2243_p10, %p2606_p0 }
  0x8b   : > { %p2252_p8 = por %p2251_p7, %p2250_p4 }
  0x8c   : > { %p2246_p3 = pneg %p2245_p2 }
  0x8e   : > { %p2253_p11 = pnand %p2252_p8, %p2246_p3 }
  0x90   : > { %2256 = shalt.err (!%p2253_p11)
}
  0x91   : > { %1995 = dma.hbm_to_vmem [thread:$0]  (!%p2590_p12), %s2980_s6, 16, %s473_s22, [#allocation8]  }
  0x92   : > { %s2432_s17 = smov [#allocation12]   ;;  %s2433_s0 = smov [#allocation15]  }
  0x93   : > { %s496_s19 = sshll.u32 %s2432_s17, 4  ;;  %s521_s24 = sshll.u32 %s2433_s0, 4  ;;  %s497_s19 = int_to_ptr.vmem [resolvable:$true] %s496_s19  ;;  %s522_s24 = int_to_ptr.vmem [resolvable:$true] %s521_s24 }
  0x94   : > { %s2257_s30 = scalar_lea.hbm %s2982_s8, 16 }
  0x95   : > { %p2258_p13 = scmp.ne.s32.totalorder %s2982_s8, %s2257_s30  ;;  %p2264_p5 = scmp.lt.u32.totalorder %s2257_s30, %s2982_s8 }
  0x97   : > { %p2260_p1 = pnand %p2258_p13, %p2606_p0 }
  0x99   : > { %p2261_p6 = pneg %p2260_p1 }
  0x9b   : > { %p2266_p9 = pnand %p2264_p5, %p2261_p6 }
  0x9d   : > { %2269 = shalt.err (!%p2266_p9)
}
  0x9e   : > { %s2270_s22 = scalar_lea.vmem %s497_s19, 16  ;;  %s2277_s4 = scalar_lea.vmem %s497_s19, 32 }
  0x9f   : > { %p2271_p10 = scmp.ne.s32.totalorder %s497_s19, %s2270_s22  ;;  %p2278_p4 = scmp.lt.s32.totalorder %s497_s19, %s497_s19 }
  0xa0   : > { %p2279_p7 = scmp.lt.s32.totalorder %s2277_s4, %s2270_s22 }
  0xa1   : > { %p2273_p2 = pnand %p2271_p10, %p2606_p0 }
  0xa2   : > { %p2280_p8 = por %p2279_p7, %p2278_p4 }
  0xa3   : > { %p2274_p3 = pneg %p2273_p2 }
  0xa5   : > { %p2281_p11 = pnand %p2280_p8, %p2274_p3 }
  0xa7   : > { %2284 = shalt.err (!%p2281_p11)
}
  0xa8   : > { %2001 = dma.hbm_to_vmem [thread:$0]  (!%p2590_p12), %s2982_s8, 16, %s497_s19, [#allocation11]  }
  0xa9   : > { %s2285_s30 = scalar_lea.hbm %s2985_s11, 16 }
  0xaa   : > { %p2286_p13 = scmp.ne.s32.totalorder %s2985_s11, %s2285_s30  ;;  %p2292_p5 = scmp.lt.u32.totalorder %s2285_s30, %s2985_s11 }
  0xac   : > { %p2288_p1 = pnand %p2286_p13, %p2606_p0 }
  0xae   : > { %p2289_p6 = pneg %p2288_p1 }
  0xb0   : > { %p2294_p9 = pnand %p2292_p5, %p2289_p6 }
  0xb2   : > { %2297 = shalt.err (!%p2294_p9)
}
  0xb3   : > { %s2298_s22 = scalar_lea.vmem %s522_s24, 16  ;;  %s2305_s19 = scalar_lea.vmem %s522_s24, 32 }
  0xb4   : > { %p2299_p10 = scmp.ne.s32.totalorder %s522_s24, %s2298_s22  ;;  %p2306_p4 = scmp.lt.s32.totalorder %s522_s24, %s522_s24 }
  0xb5   : > { %p2307_p7 = scmp.lt.s32.totalorder %s2305_s19, %s2298_s22 }
  0xb6   : > { %p2301_p2 = pnand %p2299_p10, %p2606_p0 }
  0xb7   : > { %p2308_p8 = por %p2307_p7, %p2306_p4 }
  0xb8   : > { %p2302_p3 = pneg %p2301_p2 }
  0xba   : > { %p2309_p11 = pnand %p2308_p8, %p2302_p3 }
  0xbc   : > { %2312 = shalt.err (!%p2309_p11)
}
  0xbd   : > { %2007 = dma.hbm_to_vmem [thread:$0]  (!%p2590_p12), %s2985_s11, 16, %s522_s24, [#allocation14]  }
  0xbe   : > { %s2434_s0 = smov [#allocation16]   ;;  %s2313_s16 = scalar_lea.hbm %s2986_s12, 16 }
  0xbf   : > { %s532_s23 = sshll.u32 %s2434_s0, 4  ;;  %p2314_p13 = scmp.ne.s32.totalorder %s2986_s12, %s2313_s16  ;;  %s533_s23 = int_to_ptr.vmem [resolvable:$true] %s532_s23 }
  0xc0   : > { %p2320_p5 = scmp.lt.u32.totalorder %s2313_s16, %s2986_s12 }
  0xc1   : > { %p2316_p1 = pnand %p2314_p13, %p2606_p0 }
  0xc3   : > { %p2317_p6 = pneg %p2316_p1 }
  0xc5   : > { %p2322_p9 = pnand %p2320_p5, %p2317_p6 }
  0xc7   : > { %2325 = shalt.err (!%p2322_p9)
}
  0xc8   : > { %s2326_s24 = scalar_lea.vmem %s533_s23, 16  ;;  %s2333_s19 = scalar_lea.vmem %s533_s23, 32 }
  0xc9   : > { %p2327_p10 = scmp.ne.s32.totalorder %s533_s23, %s2326_s24  ;;  %p2334_p4 = scmp.lt.s32.totalorder %s533_s23, %s533_s23 }
  0xca   : > { %p2335_p7 = scmp.lt.s32.totalorder %s2333_s19, %s2326_s24 }
  0xcb   : > { %p2329_p2 = pnand %p2327_p10, %p2606_p0 }
  0xcc   : > { %p2336_p8 = por %p2335_p7, %p2334_p4 }
  0xcd   : > { %p2330_p3 = pneg %p2329_p2 }
  0xcf   : > { %p2337_p11 = pnand %p2336_p8, %p2330_p3 }
  0xd1   : > { %2340 = shalt.err (!%p2337_p11)
}
  0xd2   : > { %2010 = dma.hbm_to_vmem [thread:$0]  (!%p2590_p12), %s2986_s12, 16, %s533_s23, [#allocation17]  }
  0xd3   : > { %p3022_p13 = scmp.ne.s32.totalorder %s3018_s21, 0 }
  0xd4   : > { %p3023_p1 = scmp.eq.s32.totalorder (!%p3022_p13), %s2554_s28, 0 }
  0xd5   : > { %564 = sbr.rel (%p3022_p13) target bundleno = 2743 (0xab7), region = 88 }
  0xdc   : > { %2386 = dma.done.wait (%p3023_p1), [#allocation5], 16   ;;  %p3024_p0 = pmov %p3023_p1 }
  0xde   : > { %2388 = vsyncadd (%p3024_p0), [#allocation5], 4294967280  ;;  %p3025_p6 = pmov %p3024_p0 }
  0xdf   : > { %p3026_p5 = pmov %p3024_p0 }
  0xe0   : > { %2390 = dma.done.wait (%p3025_p6), [#allocation8], 32  }
  0xe1   : > { %2392 = vsyncadd (%p3026_p5), [#allocation8], 4294967264  ;;  %p3027_p9 = pmov %p3024_p0 }
  0xe2   : > { %p3028_p12 = pmov %p3024_p0 }
  0xe3   : > { %2394 = dma.done.wait (%p3027_p9), [#allocation11], 272  }
  0xe4   : > { %2396 = vsyncadd (%p3028_p12), [#allocation11], 4294967024  ;;  %p3029_p10 = pmov %p3024_p0 }
  0xe5   : > { %p3030_p2 = pmov %p3024_p0 }
  0xe6   : > { %2398 = dma.done.wait (%p3029_p10), [#allocation14], 32  }
  0xe7   : > { %2400 = vsyncadd (%p3030_p2), [#allocation14], 4294967264  ;;  %p3031_p3 = pmov %p3024_p0 }
  0xe8   : > { %p3032_p4 = pmov %p3024_p0 }
  0xe9   : > { %2402 = dma.done.wait (%p3031_p3), [#allocation17], 16  }
  0xea   : > { %2404 = vsyncadd (%p3032_p4), [#allocation17], 4294967280  ;;  %p643_p7 = scmp.lt.s32.totalorder %s2554_s28, 1  ;;  %s3033_s23 = sld [smem:[#allocation32_spill]]  ;;  %vm651_vm0 = vcmask 261120   ;;  %v2081_v7 = vld [vmem:[%s2977_s3] sm:$0xff]  }
  0xeb   : > { %v2082_v8 = vld [vmem:[%s2979_s5] sm:$0xff]   ;;  %v2435_v9 = vmov 0.0   ;;  %v2083_v10 = vld [vmem:[%s2977_s3 + $0x8] sm:$0xff]   ;;  %vm2436_vm1 = vmmov 0   ;;  %v2085_v21 = vld [vmem:[#allocation10] sm:$0xff]   ;;  %vm876_vm2 = vcmask 64512  }
  0xec   : > { %s644_s21 = scalar_select %p643_p7, %s2554_s28, 1  ;;  %1852 = vmatprep.subr.bf16.mxu0 %v2435_v9  ;;  %1860 = vmatprep.subr.bf16.mxu1 %v2435_v9  ;;  %v2084_v11 = vld [vmem:[%s2979_s5 + $0x8] sm:$0xff]   ;;  %v2086_v23 = vld [vmem:[#allocation10 + $0x8] sm:$0xff]   ;;  %v1779_v24 = vld [vmem:[#allocation9] ss:$0 sm:$0xff]  ;;  %vm936_vm3 = vcmask 1043456  }
  0xed   : > { %1853 = vmatpush3.bf16.msra.mxu0 %v2081_v7  ;;  %1861 = vmatpush3.bf16.msra.mxu1 %v2082_v8  ;;  %v1774_v18 = vld [vmem:[#allocation4] ss:$0 sm:$0xff]  ;;  %v1775_v25 = vld [vmem:[#allocation7] ss:$0 sm:$0xff]  ;;  %s2438_s29 = smov 120   ;;  %s2439_s0 = smov 104  }
  0xee   : > { %s1772_s18 = sshll.u32 %s644_s21, 3  ;;  %1854 = vmatprep.subr.bf16.mxu0 %v2435_v9  ;;  %1862 = vmatprep.subr.bf16.mxu1 %v2435_v9  ;;  %s3034_s21 = sld [smem:[#allocation33_spill]]  ;;  %v1783_v38 = vld [vmem:[#allocation12] ss:$0 sm:$0xff]  ;;  %vm1104_vm4 = vcmask 125952   ;;  %vm1340_vm5 = vcmask 257152  }
  0xef   : > { %1856 = vmatprep.mubr.msk.bf16.mxu0 %vm2436_vm1, %v2435_v9  ;;  %1864 = vmatprep.mubr.msk.bf16.mxu1 %vm2436_vm1, %v2435_v9  ;;  %s2441_s20 = smov 16   ;;  %vm1553_vm6 = vcmask 523264   ;;  %s640_s26 = sand.u32 1, %s2415_s25  }
  0xf0   : > { %s646_s27 = scalar_lea.vmem %s3033_s23, %s1772_s18  ;;  %s2437_s18 = smov 112  }
  0xf1   : > { %v2781_v0 = vld [vmem:[%s646_s27] sm:$0xff]  ;;  %1855 = vmatpush3.bf16.msra.mxu0 %v2083_v10  ;;  %1863 = vmatpush3.bf16.msra.mxu1 %v2084_v11  ;;  %s2440_s23 = smov 8   ;;  %s3035_s24 = sld [smem:[#allocation35_spill]] }
  0xf2   : > { %v652_v1 = vsel %vm651_vm0, %v2781_v0, 0.0  ;;  %1868 = vmatprep.subr.bf16.mxu0 %v2435_v9  ;;  %1876 = vmatprep.subr.bf16.mxu1 %v2435_v9  ;;  %s3036_s19 = sld [smem:[#allocation30_spill]]  ;;  %s1813_s4 = sshll.u32 %s2554_s28, 7 }
  0xf3   : > { %653 = vadd.xlane.f32.xlu0 %v652_v1  ;;  %s1600_s28 = scalar_lea.sflag [#allocation6], %s640_s26  ;;  %s2442_s30 = smov [#allocation18]  }
  0xf4   : > { %v1773_v16 = vld [vmem:[%s3034_s21] ss:$0 sm:$0xff]  ;;  %s2345_s16 = sshll.u32 %s2442_s30, 4  ;;  %s2346_s16 = int_to_ptr.vmem [resolvable:$false] %s2345_s16 }
  0xf8   : > { %p3038_p11 = scmp.ne.s32.totalorder %s3036_s19, 0 }
 0x180   : > { %v654_v2 = vpop.xlane.xlu0 %653 }
 0x181   : > { %v656_v3 = vmul.f32 0.03125, %v654_v2 }
 0x183   : > { %v657_v4 = vsub.f32 %v2781_v0, %v656_v3 }
 0x185   : > { %v658_v5 = vmul.f32 %v657_v4, %v657_v4 }
 0x187   : > { %v659_v6 = vsel %vm651_vm0, %v658_v5, 0.0 }
 0x188   : > { %660 = vadd.xlane.f32.xlu0 %v659_v6 }
 0x215   : > { %v661_v12 = vpop.xlane.xlu0 %660 }
 0x216   : > { %v662_v13 = vmul.f32 0.03125, %v661_v12 }
 0x218   : > { %v663_v14 = vadd.f32 1e-05, %v662_v13 }
 0x21a   : > { %2095 = vrsqrt.f32 %v663_v14 }
 0x224   : > { %v2096_v15 = vpop.eup %2095 }
 0x225   : > { %v665_v17 = vmul.f32 %v2096_v15, %v657_v4 }
 0x227   : > { %v672_v19 = vmul.f32 %v1773_v16, %v665_v17 }
 0x229   : > { %v679_v20 = vadd.f32 %v1774_v18, %v672_v19 }
 0x22b   : > { %v680_v22 = vpack.c.bf16 %v679_v20, %v679_v20 }
 0x22d   : > { %1857 = vmatmul.mubr.msk.bf16.vlgmr.msra.gmra.mrb[0].mxu0 %vm651_vm0, %v680_v22  ;;  %1865 = vmatmul.mubr.msk.bf16.vlgmr.msra.gmra.mrb[0].mxu1 %vm651_vm0, %v680_v22 }
 0x22e   : > { %1869 = vmatpush3.bf16.msra.mxu0 %v2085_v21  ;;  %1872 = vmatprep.mubr.msk.bf16.mxu0 %vm2436_vm1, %v2435_v9 }
 0x22f   : > { %1870 = vmatprep.subr.bf16.mxu0 %v2435_v9  ;;  %1878 = vmatprep.mubr.msk.bf16.mxu1 %vm2436_vm1, %v2435_v9 }
 0x232   : > { %1871 = vmatpush3.bf16.msra.mxu0 %v2086_v23 }
 0x233   : > { %1882 = vmatprep.subr.bf16.mxu0 %v2435_v9 }
 0x235   : > { %1873 = vmatmul.mubr.msk.bf16.vlgmr.msra.gmra.mrb[4].mxu0 %vm651_vm0, %v680_v22 }
 0x236   : > { %1884 = vmatprep.mubr.msk.bf16.mxu0 %vm2436_vm1, %v2435_v9 }
 0x300   : > { %v741_v26 = vpop.f32.mrb[0].mxu0  ;;  %v805_v27 = vpop.f32.mrb[0].mxu1 }
 0x301   : > { %v806_v28 = vadd.f32 %v1779_v24, %v805_v27  ;;  %v1858_v29 = vpop.f32.mrb[1].mxu0  ;;  %v1866_v30 = vpop.f32.mrb[1].mxu1  ;;  %v742_v33 = vadd.f32 %v1775_v25, %v741_v26 }
 0x302   : > { %v744_v31 = vpop.f32.mrb[2].mxu0  ;;  %v808_v32 = vpop.f32.mrb[2].mxu1 }
 0x303   : > { %v811_v34 = vpack.c.bf16 %v806_v28, %v806_v28  ;;  %v1859_v35 = vpop.f32.mrb[3].mxu0  ;;  %v1867_v36 = vpop.f32.mrb[3].mxu1  ;;  %v747_v39 = vpack.c.bf16 %v742_v33, %v742_v33 }
 0x305   : > { %1108 = vrot.lane.b32.xlu0 %v811_v34, %s2437_s18  ;;  %987 = vrot.lane.b32.xlu1 %v811_v34, %s2438_s29  ;;  %v881_v37 = vsel %vm876_vm2, %v811_v34, 0 }
 0x306   : > { %1877 = vmatpush3.bf16.xpose.msra.mxu1 %v881_v37 }
 0x307   : > { %1888 = vmatprep.subr.bf16.mxu1 %v2435_v9 }
 0x308   : > { %v869_v40 = vpop.f32.mrb[4].mxu0 }
 0x309   : > { %v870_v41 = vadd.f32 %v1783_v38, %v869_v40  ;;  %984 = vrot.lane.b32.xlu1 %v747_v39, %s2438_s29  ;;  %v1874_v42 = vpop.f32.mrb[5].mxu0 }
 0x30a   : > { %v872_v43 = vpop.f32.mrb[6].mxu0 }
 0x30b   : > { %v875_v44 = vpack.c.bf16 %v870_v41, %v870_v41  ;;  %v1875_v45 = vpop.f32.mrb[7].mxu0 }
 0x30d   : > { %1106 = vrot.lane.b32.xlu1 %v747_v39, %s2437_s18  ;;  %1879 = vmatmul.mubr.msk.bf16.vlgmr.msra.gmra.mrb[4].mxu1 %vm876_vm2, %v747_v39  ;;  %v938_v46 = vsel %vm936_vm3, %v875_v44, 0 }
 0x30e   : > { %1883 = vmatpush3.bf16.msra.mxu0 %v938_v46  ;;  %1890 = vmatprep.mubr.msk.bf16.mxu1 %vm2436_vm1, %v2435_v9 }
 0x30f   : > { %1894 = vmatprep.subr.bf16.mxu0 %v2435_v9 }
 0x311   : > { %1219 = vrot.lane.b32.xlu1 %v811_v34, %s2439_s0 }
 0x315   : > { %1217 = vrot.lane.b32.xlu1 %v747_v39, %s2439_s0 }
 0x377   : > { %v988_v47 = vpop.permute.xlu1 %987  ;;  %v1109_v50 = vpop.permute.xlu0 %1108 }
 0x378   : > { %v993_v48 = vsel %vm876_vm2, %v988_v47, 0  ;;  %v1114_v52 = vsel %vm876_vm2, %v1109_v50, 0 }
 0x379   : > { %1889 = vmatpush3.bf16.xpose.msra.mxu1 %v993_v48 }
 0x37a   : > { %1900 = vmatprep.subr.bf16.mxu1 %v2435_v9 }
 0x37b   : > { %v985_v49 = vpop.permute.xlu1 %984 }
 0x37f   : > { %v1107_v51 = vpop.permute.xlu1 %1106 }
 0x380   : > { %1891 = vmatmul.mubr.msk.bf16.vlgmr.msra.gmra.mrb[8].mxu1 %vm876_vm2, %v985_v49 }
 0x381   : > { %1901 = vmatpush3.bf16.xpose.msra.mxu1 %v1114_v52  ;;  %1902 = vmatprep.mubr.msk.bf16.mxu1 %vm2436_vm1, %v2435_v9 }
 0x382   : > { %1912 = vmatprep.subr.bf16.mxu1 %v2435_v9 }
 0x383   : > { %v1220_v53 = vpop.permute.xlu1 %1219 }
 0x384   : > { %v1225_v54 = vsel %vm876_vm2, %v1220_v53, 0 }
 0x387   : > { %v1218_v55 = vpop.permute.xlu1 %1217 }
 0x388   : > { %1903 = vmatmul.mubr.msk.bf16.vlgmr.msra.gmra.mrb[12].mxu1 %vm876_vm2, %v1107_v51 }
 0x389   : > { %1913 = vmatpush3.bf16.xpose.msra.mxu1 %v1225_v54  ;;  %1914 = vmatprep.mubr.msk.bf16.mxu1 %vm2436_vm1, %v2435_v9 }
 0x38a   : > { %1924 = vmatprep.subr.bf16.mxu1 %v2435_v9 }
 0x390   : > { %1915 = vmatmul.mubr.msk.bf16.vlgmr.msra.gmra.mrb[16].mxu1 %vm876_vm2, %v1218_v55 }
 0x391   : > { %1928 = vmatprep.mubr.msk.bf16.mxu1 %vm2436_vm1, %v2435_v9 }
 0x3e0   : > { %v917_v56 = vpop.f32.mrb[4].mxu1 }
 0x3e1   : > { %v1880_v57 = vpop.f32.mrb[5].mxu1  ;;  %v923_v58 = vsel %vm876_vm2, %v917_v56, -inf }
 0x3e2   : > { %924 = vmax.xlane.f32.xlu1 %v923_v58  ;;  %v920_v59 = vpop.f32.mrb[6].mxu1 }
 0x3e3   : > { %v1881_v60 = vpop.f32.mrb[7].mxu1 }
 0x3f3   : > { %1166 = vrot.lane.b32.xlu1 %v875_v44, %s2437_s18 }
 0x453   : > { %v1029_v61 = vpop.f32.mrb[8].mxu1 }
 0x454   : > { %v1892_v62 = vpop.f32.mrb[9].mxu1  ;;  %v1035_v63 = vsel %vm876_vm2, %v1029_v61, -inf }
 0x455   : > { %1036 = vmax.xlane.f32.xlu0 %v1035_v63  ;;  %v1032_v1 = vpop.f32.mrb[10].mxu1 }
 0x456   : > { %v1893_v2 = vpop.f32.mrb[11].mxu1 }
 0x45b   : > { %v1150_v3 = vpop.f32.mrb[12].mxu1 }
 0x45c   : > { %v1904_v4 = vpop.f32.mrb[13].mxu1  ;;  %v1156_v5 = vsel %vm876_vm2, %v1150_v3, -inf }
 0x45d   : > { %v1153_v6 = vpop.f32.mrb[14].mxu1  ;;  %1157 = vmax.xlane.f32.xlu1 %v1156_v5 }
 0x45e   : > { %v1905_v7 = vpop.f32.mrb[15].mxu1 }
 0x463   : > { %v1261_v8 = vpop.f32.mrb[16].mxu1 }
 0x464   : > { %v1916_v10 = vpop.f32.mrb[17].mxu1  ;;  %v1267_v11 = vsel %vm876_vm2, %v1261_v8, -inf }
 0x465   : > { %v1264_v12 = vpop.f32.mrb[18].mxu1  ;;  %1268 = vmax.xlane.f32.xlu1 %v1267_v11 }
 0x466   : > { %v1917_v13 = vpop.f32.mrb[19].mxu1 }
 0x467   : > { %v2087_v13 = vld [vmem:[%s2983_s9] sm:$0xff]  }
 0x468   : > { %1925 = vmatpush3.bf16.msra.mxu1 %v2087_v13 }
 0x469   : > { %1926 = vmatprep.subr.bf16.mxu1 %v2435_v9 }
 0x46b   : > { %1046 = vrot.lane.b32.xlu0 %v875_v44, %s2438_s29 }
 0x46f   : > { %v925_v14 = vpop.xlane.xlu1 %924 }
 0x470   : > { %v926_v15 = vsub.f32 %v917_v56, %v925_v14  ;;  %v2088_v14 = vld [vmem:[%s2983_s9 + $0x8] sm:$0xff]  }
 0x471   : > { %1927 = vmatpush3.bf16.msra.mxu1 %v2088_v14 }
 0x472   : > { %v927_v16 = vmul.f32 1.442695, %v926_v15  ;;  %1940 = vmatprep.subr.bf16.mxu1 %v2435_v9 }
 0x473   : > { %v1167_v22 = vpop.permute.xlu1 %1166 }
 0x474   : > { %2097 = vpow2.f32 %v927_v16  ;;  %v1172_v32 = vsel %vm936_vm3, %v1167_v22, 0 }
 0x476   : > { %1277 = vrot.lane.b32.xlu1 %v875_v44, %s2439_s0  ;;  %s3037_s0 = sld [smem:[#allocation36_spill]] }
 0x47e   : > { %v2098_v17 = vpop.eup %2097 }
 0x47f   : > { %v932_v18 = vpack.c.bf16 %v2098_v17, %v2098_v17  ;;  %v929_v39 = vsel %vm876_vm2, %v2098_v17, 0.0 }
 0x481   : > { %1885 = vmatmul.mubr.msk.bf16.vlgmr.msra.gmra.mrb[8].mxu0 %vm876_vm2, %v932_v18 }
 0x482   : > { %1896 = vmatprep.mubr.msk.bf16.mxu0 %vm2436_vm1, %v2435_v9 }
 0x4e2   : > { %v1037_v19 = vpop.xlane.xlu0 %1036 }
 0x4e3   : > { %v1038_v20 = vsub.f32 %v1029_v61, %v1037_v19 }
 0x4e5   : > { %v1039_v21 = vmul.f32 1.442695, %v1038_v20 }
 0x4e6   : > { %v1047_v23 = vpop.permute.xlu0 %1046 }
 0x4e7   : > { %2099 = vpow2.f32 %v1039_v21  ;;  %v1052_v24 = vsel %vm936_vm3, %v1047_v23, 0  ;;  %v1796_v23 = vld [vmem:[#allocation13] ss:$0 sm:$0xff] }
 0x4e8   : > { %1895 = vmatpush3.bf16.msra.mxu0 %v1052_v24 }
 0x4e9   : > { %1906 = vmatprep.subr.bf16.mxu0 %v2435_v9 }
 0x4ea   : > { %v1158_v25 = vpop.xlane.xlu1 %1157 }
 0x4eb   : > { %v1159_v26 = vsub.f32 %v1150_v3, %v1158_v25 }
 0x4ed   : > { %v1160_v27 = vmul.f32 1.442695, %v1159_v26 }
 0x4ef   : > { %2101 = vpow2.f32 %v1160_v27 }
 0x4f1   : > { %v2100_v28 = vpop.eup %2099 }
 0x4f2   : > { %v1269_v29 = vpop.xlane.xlu1 %1268  ;;  %v1044_v30 = vpack.c.bf16 %v2100_v28, %v2100_v28  ;;  %v1041_v43 = vsel %vm876_vm2, %v2100_v28, 0.0 }
 0x4f3   : > { %v1270_v31 = vsub.f32 %v1261_v8, %v1269_v29 }
 0x4f4   : > { %1897 = vmatmul.mubr.msk.bf16.vlgmr.msra.gmra.mrb[12].mxu0 %vm876_vm2, %v1044_v30 }
 0x4f5   : > { %v1271_v33 = vmul.f32 1.442695, %v1270_v31  ;;  %1907 = vmatpush3.bf16.msra.mxu0 %v1172_v32  ;;  %1908 = vmatprep.mubr.msk.bf16.mxu0 %vm2436_vm1, %v2435_v9 }
 0x4f6   : > { %1918 = vmatprep.subr.bf16.mxu0 %v2435_v9  ;;  %v1278_v35 = vpop.permute.xlu1 %1277 }
 0x4f7   : > { %2103 = vpow2.f32 %v1271_v33  ;;  %v1283_v38 = vsel %vm936_vm3, %v1278_v35, 0 }
 0x4f9   : > { %v2102_v34 = vpop.eup %2101 }
 0x4fa   : > { %v1162_v36 = vsel %vm876_vm2, %v2102_v34, 0.0  ;;  %v1165_v37 = vpack.c.bf16 %v2102_v34, %v2102_v34 }
 0x4fb   : > { %1163 = vadd.xlane.f32.xlu1 %v1162_v36 }
 0x4fc   : > { %1909 = vmatmul.mubr.msk.bf16.vlgmr.msra.gmra.mrb[16].mxu0 %vm876_vm2, %v1165_v37  ;;  %v2089_v37 = vld [vmem:[%s2987_s13] sm:$0xff]  }
 0x4fd   : > { %1919 = vmatpush3.bf16.msra.mxu0 %v1283_v38  ;;  %1920 = vmatprep.mubr.msk.bf16.mxu0 %vm2436_vm1, %v2435_v9 }
 0x4fe   : > { %1932 = vmatprep.subr.bf16.mxu0 %v2435_v9 }
 0x4ff   : > { %930 = vadd.xlane.f32.xlu1 %v929_v39 }
 0x501   : > { %v2104_v40 = vpop.eup %2103 }
 0x502   : > { %v1273_v41 = vsel %vm876_vm2, %v2104_v40, 0.0  ;;  %v1276_v42 = vpack.c.bf16 %v2104_v40, %v2104_v40 }
 0x503   : > { %1274 = vadd.xlane.f32.xlu0 %v1273_v41 }
 0x504   : > { %1921 = vmatmul.mubr.msk.bf16.vlgmr.msra.gmra.mrb[20].mxu0 %vm876_vm2, %v1276_v42  ;;  %v1800_v42 = vld [vmem:[#allocation15] ss:$0 sm:$0xff] }
 0x505   : > { %1936 = vmatprep.mubr.msk.bf16.mxu0 %vm2436_vm1, %v2435_v9  ;;  %1933 = vmatpush3.bf16.msra.mxu0 %v2089_v37 }
 0x506   : > { %1934 = vmatprep.subr.bf16.mxu0 %v2435_v9 }
 0x507   : > { %1042 = vadd.xlane.f32.xlu0 %v1041_v43 }
 0x554   : > { %v974_v44 = vpop.f32.mrb[8].mxu0 }
 0x555   : > { %v1886_v45 = vpop.f32.mrb[9].mxu0 }
 0x556   : > { %v977_v46 = vpop.f32.mrb[10].mxu0 }
 0x557   : > { %v1887_v47 = vpop.f32.mrb[11].mxu0 }
 0x588   : > { %v1164_v5 = vpop.xlane.xlu1 %1163 }
 0x58c   : > { %v931_v6 = vpop.xlane.xlu1 %930 }
 0x590   : > { %v1275_v48 = vpop.xlane.xlu0 %1274 }
 0x594   : > { %v1043_v49 = vpop.xlane.xlu0 %1042 }
 0x595   : > { %2105 = vrcp.f32 %v1043_v49  ;;  %v2092_v49 = vld [vmem:[%s2989_s15 + $0x8] sm:$0xff]  }
 0x596   : > { %2107 = vrcp.f32 %v1275_v48  ;;  %v2091_v48 = vld [vmem:[%s2989_s15] sm:$0xff]  }
 0x597   : > { %2109 = vrcp.f32 %v931_v6 }
 0x598   : > { %2111 = vrcp.f32 %v1164_v5 }
 0x59f   : > { %v2106_v50 = vpop.eup %2105 }
 0x5a0   : > { %v2108_v61 = vpop.eup %2107 }
 0x5a1   : > { %v2110_v7 = vpop.eup %2109 }
 0x5a2   : > { %v981_v8 = vmul.f32 %v2110_v7, %v974_v44  ;;  %v2112_v15 = vpop.eup %2111  ;;  %v1801_v44 = vld [vmem:[#allocation16] ss:$0 sm:$0xff] }
 0x5a4   : > { %v982_v10 = vpack.c.bf16 %v981_v8, %v981_v8 }
 0x5c7   : > { %v1088_v51 = vpop.f32.mrb[12].mxu0 }
 0x5c8   : > { %v1095_v52 = vmul.f32 %v2106_v50, %v1088_v51  ;;  %v1898_v53 = vpop.f32.mrb[13].mxu0  ;;  %v2093_v50 = vld [vmem:[%s2989_s15 + $0x10] sm:$0xff]   ;;  %v2094_v51 = vld [vmem:[%s2989_s15 + $0x18] sm:$0xff]  }
 0x5c9   : > { %v1091_v54 = vpop.f32.mrb[14].mxu0 }
 0x5ca   : > { %v1096_v55 = vpack.c.bf16 %v1095_v52, %v1095_v52  ;;  %v1899_v56 = vpop.f32.mrb[15].mxu0  ;;  %v1802_v52 = vld [vmem:[%s2988_s14] ss:$0 sm:$0xff] }
 0x5cc   : > { %1098 = vrot.lane.b32.xlu1 %v1096_v55, %s2440_s23 }
 0x5cf   : > { %v1208_v57 = vpop.f32.mrb[16].mxu0 }
 0x5d0   : > { %v1910_v58 = vpop.f32.mrb[17].mxu0  ;;  %v1215_v16 = vmul.f32 %v2112_v15, %v1208_v57 }
 0x5d1   : > { %v1211_v59 = vpop.f32.mrb[18].mxu0 }
 0x5d2   : > { %v1911_v60 = vpop.f32.mrb[19].mxu0  ;;  %v1216_v17 = vpack.c.bf16 %v1215_v16, %v1215_v16 }
 0x5d7   : > { %v1319_v62 = vpop.f32.mrb[20].mxu0 }
 0x5d8   : > { %v1326_v63 = vmul.f32 %v2108_v61, %v1319_v62  ;;  %v1922_v1 = vpop.f32.mrb[21].mxu0 }
 0x5d9   : > { %v1322_v2 = vpop.f32.mrb[22].mxu0 }
 0x5da   : > { %v1327_v3 = vpack.c.bf16 %v1326_v63, %v1326_v63  ;;  %v1923_v4 = vpop.f32.mrb[23].mxu0  ;;  %v1806_v63 = vld [vmem:[%s3035_s24] ss:$0 sm:$0xff] }
 0x5dc   : > { %1329 = vrot.lane.b32.xlu0 %v1327_v3, %s2440_s23  ;;  %s2931_s23 = scalar_lea.hbm %s3037_s0, %s1813_s4 }
 0x63e   : > { %v1099_v11 = vpop.permute.xlu1 %1098 }
 0x63f   : > { %v1102_v12 = vsel %vm876_vm2, %v982_v10, %v1099_v11 }
 0x640   : > { %1105 = vst.msk [vmem:[#allocation2] sm:$0xf] %vm1104_vm4, %v1102_v12 }
 0x64e   : > { %v1330_v18 = vpop.permute.xlu0 %1329 }
 0x64f   : > { %v1333_v19 = vsel %vm876_vm2, %v1216_v17, %v1330_v18 }
 0x650   : > { %v1795_v20 = vcombine.low %v1333_v19, %v1333_v19 }
 0x652   : > { %1337 = vrot.lane.b32.xlu0 %v1795_v20, %s2441_s20  ;;  %s1771_s20 = sshll.u32 %s640_s26, 3 }
 0x653   : > { %s642_s17 = scalar_lea.vmem [#allocation18], %s1771_s20  ;;  %s2347_s20 = scalar_lea.vmem %s2346_s16, 256 }
 0x654   : > { %s1613_s21 = sshll.u32 %s642_s17, 4  ;;  %s2933_s21 = int_to_ptr.vmem [resolvable:$true] %s1613_s21 }
 0x655   : > { %s2341_s27 = scalar_lea.vmem %s2933_s21, 128  ;;  %p2348_p0 = scmp.lt.s32.totalorder %s2933_s21, %s2346_s16 }
 0x656   : > { %p2342_p8 = scmp.ne.s32.totalorder %s2933_s21, %s2341_s27  ;;  %p2349_p6 = scmp.lt.s32.totalorder %s2347_s20, %s2341_s27 }
 0x658   : > { %p2343_p13 = pnand %p2342_p8, %p3038_p11  ;;  %p2350_p5 = por %p2349_p6, %p2348_p0 }
 0x65a   : > { %p2344_p1 = pneg %p2343_p13 }
 0x65c   : > { %p2351_p9 = pnand %p2350_p5, %p2344_p1 }
 0x6c4   : > { %v1338_v21 = vpop.permute.xlu0 %1337 }
 0x6c5   : > { %1341 = vst.msk [vmem:[#allocation2] sm:$0xf] %vm1340_vm5, %v1338_v21 }
 0x6cc   : > { %v1342_v22 = vld [vmem:[#allocation2] sm:$0xf] }
 0x6cd   : > { %1929 = vmatmul.mubr.msk.bf16.vlgmr.msra.gmra.mrb[20].mxu1 %vm651_vm0, %v1342_v22 }
 0x6ce   : > { %1948 = vmatprep.mubr.msk.bf16.mxu1 %vm2436_vm1, %v2435_v9  ;;  %1941 = vmatpush3.bf16.msra.mxu1 %v2091_v48 }
 0x6cf   : > { %1942 = vmatprep.subr.bf16.mxu1 %v2435_v9 }
 0x6d2   : > { %1943 = vmatpush3.bf16.msra.mxu1 %v2092_v49 }
 0x6d3   : > { %1944 = vmatprep.subr.bf16.mxu1 %v2435_v9 }
 0x6d6   : > { %1945 = vmatpush3.bf16.msra.mxu1 %v2093_v50 }
 0x6d7   : > { %1946 = vmatprep.subr.bf16.mxu1 %v2435_v9 }
 0x6da   : > { %1947 = vmatpush3.bf16.msra.mxu1 %v2094_v51 }
 0x7a0   : > { %v1403_v24 = vpop.f32.mrb[20].mxu1 }
 0x7a1   : > { %v1404_v25 = vadd.f32 %v1796_v23, %v1403_v24  ;;  %v1930_v26 = vpop.f32.mrb[21].mxu1 }
 0x7a2   : > { %v1406_v27 = vpop.f32.mrb[22].mxu1 }
 0x7a3   : > { %v1409_v28 = vadd.f32 %v1404_v25, %v2781_v0  ;;  %v1931_v29 = vpop.f32.mrb[23].mxu1  ;;  %v2090_v0 = vld [vmem:[%s2987_s13 + $0x8] sm:$0xff]  }
 0x7a4   : > { %1935 = vmatpush3.bf16.msra.mxu0 %v2090_v0 }
 0x7a5   : > { %1410 = vst.msk [vmem:[#allocation3] sm:$0xff] %vm651_vm0, %v1409_v28 }
 0x7ac   : > { %v1415_v30 = vld [vmem:[#allocation3] sm:$0xff] }
 0x7ad   : > { %v1416_v31 = vsel %vm651_vm0, %v1415_v30, 0.0 }
 0x7ae   : > { %1417 = vadd.xlane.f32.xlu1 %v1416_v31 }
 0x83b   : > { %v1418_v32 = vpop.xlane.xlu1 %1417 }
 0x83c   : > { %v1419_v33 = vmul.f32 0.03125, %v1418_v32 }
 0x83e   : > { %v1420_v34 = vsub.f32 %v1415_v30, %v1419_v33 }
 0x840   : > { %v1421_v35 = vmul.f32 %v1420_v34, %v1420_v34 }
 0x842   : > { %v1422_v36 = vsel %vm651_vm0, %v1421_v35, 0.0 }
 0x843   : > { %1423 = vadd.xlane.f32.xlu0 %v1422_v36 }
 0x8d0   : > { %v1424_v38 = vpop.xlane.xlu0 %1423 }
 0x8d1   : > { %v1425_v39 = vmul.f32 0.03125, %v1424_v38 }
 0x8d3   : > { %v1426_v40 = vadd.f32 1e-05, %v1425_v39 }
 0x8d5   : > { %2113 = vrsqrt.f32 %v1426_v40 }
 0x8df   : > { %v2114_v41 = vpop.eup %2113 }
 0x8e0   : > { %v1428_v43 = vmul.f32 %v2114_v41, %v1420_v34 }
 0x8e2   : > { %v1435_v45 = vmul.f32 %v1800_v42, %v1428_v43 }
 0x8e4   : > { %v1442_v46 = vadd.f32 %v1801_v44, %v1435_v45 }
 0x8e6   : > { %v1443_v47 = vpack.c.bf16 %v1442_v46, %v1442_v46 }
 0x8e8   : > { %1937 = vmatmul.mubr.msk.bf16.vlgmr.msra.gmra.mrb[24].mxu0 %vm651_vm0, %v1443_v47 }
 0x9bb   : > { %v1503_v53 = vpop.f32.mrb[24].mxu0 }
 0x9bc   : > { %v1504_v54 = vadd.f32 %v1802_v52, %v1503_v53  ;;  %v1938_v55 = vpop.f32.mrb[25].mxu0 }
 0x9bd   : > { %v1506_v56 = vpop.f32.mrb[26].mxu0 }
 0x9be   : > { %v1510_v57 = vmul.f32 0.70710677, %v1504_v54  ;;  %v1939_v58 = vpop.f32.mrb[27].mxu0  ;;  %v1509_v9 = vmul.f32 0.5, %v1504_v54 }
 0x9c0   : > { %2115 = verf.f32 %v1510_v57 }
 0x9ca   : > { %v2116_v59 = vpop.eup %2115 }
 0x9cb   : > { %v1512_v60 = vadd.f32 1.0, %v2116_v59 }
 0x9cd   : > { %v1513_v61 = vmul.f32 %v1512_v60, %v1509_v9 }
 0x9cf   : > { %v1514_v62 = vpack.c.bf16 %v1513_v61, %v1513_v61 }
 0x9d1   : > { %1949 = vmatmul.mubr.msk.bf16.vlgmr.msra.gmra.mrb[24].mxu1 %vm1553_vm6, %v1514_v62 }
 0xaa4   : > { %v1591_v1 = vpop.f32.mrb[24].mxu1 }
 0xaa5   : > { %v1592_v2 = vadd.f32 %v1806_v63, %v1591_v1  ;;  %v1950_v3 = vpop.f32.mrb[25].mxu1 }
 0xaa6   : > { %v1594_v4 = vpop.f32.mrb[26].mxu1 }
 0xaa7   : > { %v1597_v5 = vadd.f32 %v1592_v2, %v1415_v30  ;;  %v1951_v6 = vpop.f32.mrb[27].mxu1 }
 0xaa9   : > { %1598 = vst.msk [vmem:[%s642_s17] sm:$0xff] %vm651_vm0, %v1597_v5 }
 0xaaa   : > { %2354 = shalt.err (!%p2351_p9)
}
 0xaab   : > { %s2355_s26 = scalar_lea.hbm %s2931_s23, 128  ;;  %s2359_s24 = scalar_lea.hbm %s3037_s0, 256 }
 0xaac   : > { %p2356_p12 = scmp.ne.s32.totalorder %s2931_s23, %s2355_s26  ;;  %p2360_p3 = scmp.lt.u32.totalorder %s2931_s23, %s3037_s0 }
 0xaad   : > { %p2361_p4 = scmp.lt.u32.totalorder %s2359_s24, %s2355_s26  ;;  %p2363_p8 = scmp.lt.u32.totalorder %s2355_s26, %s2931_s23 }
 0xaae   : > { %p2357_p10 = pnand %p2356_p12, %p3038_p11 }
 0xaaf   : > { %p2362_p7 = por %p2361_p4, %p2360_p3 }
 0xab0   : > { %p2358_p2 = pneg %p2357_p10 }
 0xab1   : > { %p2364_p13 = por %p2363_p8, %p2362_p7 }
 0xab3   : > { %p2365_p1 = pnand %p2364_p13, %p2358_p2 }
 0xab5   : > { %2368 = shalt.err (!%p2365_p1)
}
 0xab6   : > { %1984 = dma.vmem_to_hbm [thread:$0]  (%p3038_p11), %s2933_s21, 128, %s2931_s23, %s1600_s28  }
 0xab7 PF: > { %s3039_s18 = sld [smem:[#allocation27_spill]]  ;;  %s3040_s29 = sld [smem:[#allocation25_spill]] }
 0xab8   : > { %s3041_s27 = sld [smem:[#allocation31_spill]] }
 0xabd   : > { %p2031_p0 = scmp.ge.s32.totalorder %s3039_s18, 2  ;;  %s1625_s30 = sand.u32 1, %s3040_s29  }
 0xabe   : > { %p3042_p6 = scmp.ne.s32.totalorder %s3041_s27, 0  ;;  %s1626_s16 = scalar_lea.sflag [#allocation6], %s1625_s30 }
 0xac0   : > { %p2012_p5 = pnand %p2031_p0, %p3042_p6 }
 0xac2   : > { %2406 = dma.done.wait (!%p2012_p5), %s1626_s16, 128  }
 0xac3   : > { %2408 = vsyncadd (!%p2012_p5), %s1626_s16, 4294967168  ;;  %s3043_s27 = sld [smem:[#allocation28_spill]]  ;;  %s3044_s20 = sld [smem:[#allocation26_spill]] }
 0xac4   : > { %s3045_s26 = sld [smem:[#allocation29_spill]]  ;;  %s3046_s24 = smov %s2415_s25 }
 0xac9   : > { %p32_p9 = scmp.ge.s32.totalorder %s3043_s27, 4   ;;  %s3047_s25 = smov %s3044_s20 }
 0xacb   :  { %34 = sbr.rel (!%p32_p9) target bundleno = 14 (0xe), region = 156 }
 0xad2   :  { %1631 = vsyncpa [#allocation5], 1 }
 0xad3   :  { %1633 = vsyncpa [#allocation5 + $0x1], 1 }
 0xad4   :  { %1634 = vsyncpa [#allocation8], 1 }
 0xad5   :  { %1635 = vsyncpa [#allocation11], 1 }
 0xad6   :  { %1636 = vsyncpa [#allocation14], 1 }
 0xad7   :  { %1637 = vsyncpa [#allocation17], 1 }
 0xad8   :  { %1638 = vsyncpa [#allocation6], 1 }
 0xad9   :  { %1640 = vsyncpa [#allocation6 + $0x1], 1 }

// kernel: tpu_custom_call.1
= control target key start
LH: loop header
LB: loop body
LE: loop exit
PB: predicated region body
PF: predicated region fallthrough
CT: control target
= control target key end

     0   :  { %s2974_s0 = inlined_call_operand.vmem [shape: f32[2,8,32], index: 0, kind: input, shape index: {}]   ;;  %s2975_s1 = inlined_call_operand.vmem [shape: f32[1,32], index: 1, kind: input, shape index: {}]   ;;  %s2976_s2 = inlined_call_operand.hbm [shape: f32[1,32], index: 2, kind: input, shape index: {}]   ;;  %s2977_s3 = inlined_call_operand.vmem [shape: bf16[32,32], index: 3, kind: input, shape index: {}]   ;;  %s2978_s4 = inlined_call_operand.hbm [shape: f32[1,32], index: 4, kind: input, shape index: {}]   ;;  %s2979_s5 = inlined_call_operand.vmem [shape: bf16[32,32], index: 5, kind: input, shape index: {}]   ;;  %s2980_s6 = inlined_call_operand.hbm [shape: f32[1,32], index: 6, kind: input, shape index: {}]   ;;  %s2981_s7 = inlined_call_operand.hbm [shape: bf16[32,32], index: 7, kind: input, shape index: {}]   ;;  %s2982_s8 = inlined_call_operand.hbm [shape: f32[1,32], index: 8, kind: input, shape index: {}]   ;;  %s2983_s9 = inlined_call_operand.vmem [shape: bf16[32,32], index: 9, kind: input, shape index: {}]   ;;  %s2984_s10 = inlined_call_operand.hbm [shape: f32[1,32], index: 10, kind: input, shape index: {}]   ;;  %s2985_s11 = inlined_call_operand.hbm [shape: f32[1,32], index: 11, kind: input, shape index: {}]   ;;  %s2986_s12 = inlined_call_operand.hbm [shape: f32[1,32], index: 12, kind: input, shape index: {}]   ;;  %s2987_s13 = inlined_call_operand.vmem [shape: bf16[32,64], index: 13, kind: input, shape index: {}]   ;;  %s2988_s14 = inlined_call_operand.vmem [shape: f32[1,64], index: 14, kind: input, shape index: {}]   ;;  %s2989_s15 = inlined_call_operand.vmem [shape: bf16[64,32], index: 15, kind: input, shape index: {}]   ;;  %s2990_s16 = inlined_call_operand.vmem [shape: f32[1,32], index: 16, kind: input, shape index: {}]   ;;  %s2991_s17 = inlined_call_operand.hbm [shape: f32[2,8,32], index: 17, kind: output, shape index: {}]  }
   0x1   :  { %3004 = sst [smem:[#allocation32_spill]] %s2974_s0 }
   0x2   :  { %3005 = sst [smem:[#allocation33_spill]] %s2975_s1 }
   0x3   :  { %3006 = sst [smem:[#allocation34_spill]] %s2978_s4 }
   0x4   :  { %3007 = sst [smem:[#allocation35_spill]] %s2990_s16 }
   0x5   :  { %3008 = sst [smem:[#allocation36_spill]] %s2991_s17 }
   0x6   :  { %22 = vsyncpa [#allocation5], 0 }
   0x7   :  { %23 = vsyncpa [#allocation8], 0 }
   0x8   :  { %24 = vsyncpa [#allocation11], 0 }
   0x9   :  { %25 = vsyncpa [#allocation14], 0 }
   0xa   :  { %26 = vsyncpa [#allocation17], 0 }
   0xb   :  { %27 = vsyncpa [#allocation6], 0 }
   0xc   :  { %29 = vsyncpa [#allocation6 + $0x1], 0  ;;  %s2533_s24 = smov 0   ;;  %s2535_s25 = smov 0  }
   0xd   :  { %s2537_s26 = smov 0   ;;  %s2539_s27 = smov 0  }
   0xe LB: > { %3009 = sst [smem:[#allocation25_spill]] %s2411_s24  ;;  %s2554_s28 = sadd.s32 4294967295, %s2423_s27   ;;  %s2423_s27 = sphi %s2539_s27, %s3043_s27   ;;  %s2419_s26 = sphi %s2537_s26, %s3045_s26   ;;  %s2415_s25 = sphi %s2535_s25, %s3047_s25   ;;  %s2411_s24 = sphi %s2533_s24, %s3046_s24  }
   0xf   : > { %3010 = sst [smem:[#allocation26_spill]] %s2419_s26  ;;  %s1751_s29 = sadd.s32 4294967294, %s2423_s27  }
  0x10   : > { %3011 = sst [smem:[#allocation27_spill]] %s2423_s27  ;;  %s2558_s0 = sadd.s32 1, %s2423_s27  }
  0x11   : > { %3012 = sst [smem:[#allocation28_spill]] %s2558_s0  ;;  %s404_s30 = sadd.s32 1, %s2419_s26 }
  0x12   : > { %s401_s18 = ssub.s32 %s2423_s27, %s2558_s0  ;;  %p414_p0 = scmp.ne.s32.totalorder %s2419_s26, %s2415_s25 }
  0x13   : > { %p402_p1 = scmp.eq.s32.totalorder %s401_s18, 0  ;;  %p415_p2 = scmp.eq.s32.totalorder %s2554_s28, 1 }
  0x14   : > { %p420_p3 = scmp.ne.s32.totalorder %s2415_s25, %s2411_s24  ;;  %p421_p4 = scmp.eq.s32.totalorder %s1751_s29, 1 }
  0x15   : > { %s2569_s19 = scalar_select %p402_p1, %s2419_s26, %s404_s30  }
  0x16   : > { %p2571_p5 = por %p415_p2, %p414_p0  ;;  %p2575_p6 = por %p421_p4, %p420_p3 }
  0x17   : > { %3013 = sst [smem:[#allocation29_spill]] %s2569_s19  ;;  %p1752_p7 = scmp.ge.s32.totalorder %s2423_s27, 1 }
  0x18   : > { %s3014_s1 = scalar_select %p2571_p5, 1, 0 }
  0x19   : > { %s3016_s20 = scalar_select %p2575_p6, 1, 0 }
  0x1a   : > { %3015 = sst [smem:[#allocation30_spill]] %s3014_s1  ;;  %p428_p8 = scmp.lt.s32.totalorder %s2423_s27, 3 }
  0x1b   : > { %3017 = sst [smem:[#allocation31_spill]] %s3016_s20  ;;  %p2999_p9 = scmp.eq.s32.totalorder %s2554_s28, 0 }
  0x1c   : > { %p2582_p10 = pnand %p1752_p7, %p428_p8  ;;  %s2425_s22 = smov [#allocation7]  }
  0x1d   : > { %s458_s23 = sshll.u32 %s2425_s22, 4  ;;  %s2426_s29 = smov [#allocation10]   ;;  %s459_s23 = int_to_ptr.vmem [resolvable:$true] %s458_s23 }
  0x1e   : > { %s3018_s21 = scalar_select %p2582_p10, 1, 0 }
  0x1f   : > { %p1986_p11 = pneg %p2582_p10  ;;  %s482_s30 = sshll.u32 %s2426_s29, 4  ;;  %s2594_s30 = int_to_ptr.vmem [resolvable:$true] %s482_s30 }
  0x20   : > { %s2427_s19 = smov [#allocation13]   ;;  %s3020_s4 = sld [smem:[#allocation34_spill]] }
  0x21   : > { %p2590_p12 = pnand %p2999_p9, %p1986_p11  ;;  %s2596_s26 = sshll.u32 %s2427_s19, 4  ;;  %s511_s26 = int_to_ptr.vmem [resolvable:$true] %s2596_s26 }
  0x23   : > { %p2606_p0 = pneg %p2590_p12 }
  0x26   : > { %s2117_s22 = scalar_lea.hbm %s3020_s4, 16 }
  0x27   : > { %p2118_p13 = scmp.ne.s32.totalorder %s3020_s4, %s2117_s22  ;;  %p2124_p3 = scmp.lt.u32.totalorder %s2117_s22, %s3020_s4 }
  0x29   : > { %p2120_p1 = pnand %p2606_p0, %p2118_p13 }
  0x2b   : > { %p2121_p2 = pneg %p2120_p1 }
  0x2d   : > { %p2126_p4 = pnand %p2124_p3, %p2121_p2 }
  0x2f   : > { %2129 = shalt.err (!%p2126_p4)
}
  0x30   : > { %s2130_s0 = scalar_lea.vmem %s459_s23, 16  ;;  %s2137_s24 = scalar_lea.vmem %s459_s23, 32 }
  0x31   : > { %p2131_p7 = scmp.ne.s32.totalorder %s459_s23, %s2130_s0  ;;  %p2138_p9 = scmp.lt.s32.totalorder %s459_s23, %s459_s23 }
  0x32   : > { %p2139_p6 = scmp.lt.s32.totalorder %s2137_s24, %s2130_s0 }
  0x33   : > { %p2133_p8 = pnand %p2131_p7, %p2606_p0 }
  0x34   : > { %p2140_p5 = por %p2139_p6, %p2138_p9 }
  0x35   : > { %p2134_p11 = pneg %p2133_p8 }
  0x37   : > { %p2141_p10 = pnand %p2140_p5, %p2134_p11 }
  0x39   : > { %2144 = shalt.err (!%p2141_p10)
}
  0x3a   : > { %1992 = dma.hbm_to_vmem [thread:$0]  (!%p2590_p12), %s3020_s4, 16, %s459_s23, [#allocation8]  }
  0x3b   : > { %s2145_s19 = scalar_lea.hbm %s2981_s7, 256 }
  0x3c   : > { %p2146_p13 = scmp.ne.s32.totalorder %s2981_s7, %s2145_s19  ;;  %p2152_p5 = scmp.lt.u32.totalorder %s2145_s19, %s2981_s7 }
  0x3e   : > { %p2148_p1 = pnand %p2146_p13, %p2606_p0 }
  0x40   : > { %p2149_p6 = pneg %p2148_p1 }
  0x42   : > { %p2154_p9 = pnand %p2152_p5, %p2149_p6 }
  0x44   : > { %2157 = shalt.err (!%p2154_p9)
}
  0x45   : > { %s2158_s23 = scalar_lea.vmem %s2594_s30, 256  ;;  %p2166_p4 = scmp.lt.s32.totalorder %s2594_s30, %s2594_s30 }
  0x46   : > { %p2159_p10 = scmp.ne.s32.totalorder %s2594_s30, %s2158_s23  ;;  %p2167_p7 = scmp.lt.s32.totalorder %s2158_s23, %s2158_s23 }
  0x48   : > { %p2161_p2 = pnand %p2159_p10, %p2606_p0  ;;  %p2168_p8 = por %p2167_p7, %p2166_p4 }
  0x4a   : > { %p2162_p3 = pneg %p2161_p2 }
  0x4c   : > { %p2169_p11 = pnand %p2168_p8, %p2162_p3 }
  0x4e   : > { %2172 = shalt.err (!%p2169_p11)
}
  0x4f   : > { %s2428_s16 = smov 64   ;;  %s2429_s1 = smov 4  }
  0x50   : > { %1998 = dma.hbm_to_vmem [thread:$0]  (!%p2590_p12), %s2981_s7, 256, %s2594_s30, [#allocation11], %s2428_s16, %s2428_s16, %s2429_s1  }
  0x51   : > { %s2173_s19 = scalar_lea.hbm %s2984_s10, 16 }
  0x52   : > { %p2174_p13 = scmp.ne.s32.totalorder %s2984_s10, %s2173_s19  ;;  %p2180_p5 = scmp.lt.u32.totalorder %s2173_s19, %s2984_s10 }
  0x54   : > { %p2176_p1 = pnand %p2174_p13, %p2606_p0 }
  0x56   : > { %p2177_p6 = pneg %p2176_p1 }
  0x58   : > { %p2182_p9 = pnand %p2180_p5, %p2177_p6 }
  0x5a   : > { %2185 = shalt.err (!%p2182_p9)
}
  0x5b   : > { %s2186_s27 = scalar_lea.vmem %s511_s26, 16  ;;  %s2193_s30 = scalar_lea.vmem %s511_s26, 32 }
  0x5c   : > { %p2187_p10 = scmp.ne.s32.totalorder %s511_s26, %s2186_s27  ;;  %p2194_p4 = scmp.lt.s32.totalorder %s511_s26, %s511_s26 }
  0x5d   : > { %p2195_p7 = scmp.lt.s32.totalorder %s2193_s30, %s2186_s27 }
  0x5e   : > { %p2189_p2 = pnand %p2187_p10, %p2606_p0 }
  0x5f   : > { %p2196_p8 = por %p2195_p7, %p2194_p4 }
  0x60   : > { %p2190_p3 = pneg %p2189_p2 }
  0x62   : > { %p2197_p11 = pnand %p2196_p8, %p2190_p3 }
  0x64   : > { %2200 = shalt.err (!%p2197_p11)
}
  0x65   : > { %2004 = dma.hbm_to_vmem [thread:$0]  (!%p2590_p12), %s2984_s10, 16, %s511_s26, [#allocation14]  }
  0x66   : > { %s2430_s4 = smov [#allocation4]   ;;  %s2431_s17 = smov [#allocation9]  }
  0x67   : > { %s444_s20 = sshll.u32 %s2430_s4, 4  ;;  %s472_s22 = sshll.u32 %s2431_s17, 4  ;;  %s445_s20 = int_to_ptr.vmem [resolvable:$true] %s444_s20  ;;  %s473_s22 = int_to_ptr.vmem [resolvable:$true] %s472_s22 }
  0x68   : > { %s2201_s24 = scalar_lea.hbm %s2976_s2, 16 }
  0x69   : > { %p2202_p13 = scmp.ne.s32.totalorder %s2976_s2, %s2201_s24  ;;  %p2208_p5 = scmp.lt.u32.totalorder %s2201_s24, %s2976_s2 }
  0x6b   : > { %p2204_p1 = pnand %p2202_p13, %p2606_p0 }
  0x6d   : > { %p2205_p6 = pneg %p2204_p1 }
  0x6f   : > { %p2210_p9 = pnand %p2208_p5, %p2205_p6 }
  0x71   : > { %2213 = shalt.err (!%p2210_p9)
}
  0x72   : > { %s2214_s26 = scalar_lea.vmem %s445_s20, 16  ;;  %s2221_s1 = scalar_lea.vmem %s445_s20, 32 }
  0x73   : > { %p2215_p10 = scmp.ne.s32.totalorder %s445_s20, %s2214_s26  ;;  %p2222_p4 = scmp.lt.s32.totalorder %s445_s20, %s445_s20 }
  0x74   : > { %p2223_p7 = scmp.lt.s32.totalorder %s2221_s1, %s2214_s26 }
  0x75   : > { %p2217_p2 = pnand %p2215_p10, %p2606_p0 }
  0x76   : > { %p2224_p8 = por %p2223_p7, %p2222_p4 }
  0x77   : > { %p2218_p3 = pneg %p2217_p2 }
  0x79   : > { %p2225_p11 = pnand %p2224_p8, %p2218_p3 }
  0x7b   : > { %2228 = shalt.err (!%p2225_p11)
}
  0x7c   : > { %1989 = dma.hbm_to_vmem [thread:$0]  (!%p2590_p12), %s2976_s2, 16, %s445_s20, [#allocation5]  }
  0x7d   : > { %s2229_s24 = scalar_lea.hbm %s2980_s6, 16 }
  0x7e   : > { %p2230_p13 = scmp.ne.s32.totalorder %s2980_s6, %s2229_s24  ;;  %p2236_p5 = scmp.lt.u32.totalorder %s2229_s24, %s2980_s6 }
  0x80   : > { %p2232_p1 = pnand %p2230_p13, %p2606_p0 }
  0x82   : > { %p2233_p6 = pneg %p2232_p1 }
  0x84   : > { %p2238_p9 = pnand %p2236_p5, %p2233_p6 }
  0x86   : > { %2241 = shalt.err (!%p2238_p9)
}
  0x87   : > { %s2242_s26 = scalar_lea.vmem %s473_s22, 16  ;;  %s2249_s20 = scalar_lea.vmem %s473_s22, 32 }
  0x88   : > { %p2243_p10 = scmp.ne.s32.totalorder %s473_s22, %s2242_s26  ;;  %p2250_p4 = scmp.lt.s32.totalorder %s473_s22, %s473_s22 }
  0x89   : > { %p2251_p7 = scmp.lt.s32.totalorder %s2249_s20, %s2242_s26 }
  0x8a   : > { %p2245_p2 = pnand %p2243_p10, %p2606_p0 }
  0x8b   : > { %p2252_p8 = por %p2251_p7, %p2250_p4 }
  0x8c   : > { %p2246_p3 = pneg %p2245_p2 }
  0x8e   : > { %p2253_p11 = pnand %p2252_p8, %p2246_p3 }
  0x90   : > { %2256 = shalt.err (!%p2253_p11)
}
  0x91   : > { %1995 = dma.hbm_to_vmem [thread:$0]  (!%p2590_p12), %s2980_s6, 16, %s473_s22, [#allocation8]  }
  0x92   : > { %s2432_s17 = smov [#allocation12]   ;;  %s2433_s0 = smov [#allocation15]  }
  0x93   : > { %s496_s19 = sshll.u32 %s2432_s17, 4  ;;  %s521_s24 = sshll.u32 %s2433_s0, 4  ;;  %s497_s19 = int_to_ptr.vmem [resolvable:$true] %s496_s19  ;;  %s522_s24 = int_to_ptr.vmem [resolvable:$true] %s521_s24 }
  0x94   : > { %s2257_s30 = scalar_lea.hbm %s2982_s8, 16 }
  0x95   : > { %p2258_p13 = scmp.ne.s32.totalorder %s2982_s8, %s2257_s30  ;;  %p2264_p5 = scmp.lt.u32.totalorder %s2257_s30, %s2982_s8 }
  0x97   : > { %p2260_p1 = pnand %p2258_p13, %p2606_p0 }
  0x99   : > { %p2261_p6 = pneg %p2260_p1 }
  0x9b   : > { %p2266_p9 = pnand %p2264_p5, %p2261_p6 }
  0x9d   : > { %2269 = shalt.err (!%p2266_p9)
}
  0x9e   : > { %s2270_s22 = scalar_lea.vmem %s497_s19, 16  ;;  %s2277_s4 = scalar_lea.vmem %s497_s19, 32 }
  0x9f   : > { %p2271_p10 = scmp.ne.s32.totalorder %s497_s19, %s2270_s22  ;;  %p2278_p4 = scmp.lt.s32.totalorder %s497_s19, %s497_s19 }
  0xa0   : > { %p2279_p7 = scmp.lt.s32.totalorder %s2277_s4, %s2270_s22 }
  0xa1   : > { %p2273_p2 = pnand %p2271_p10, %p2606_p0 }
  0xa2   : > { %p2280_p8 = por %p2279_p7, %p2278_p4 }
  0xa3   : > { %p2274_p3 = pneg %p2273_p2 }
  0xa5   : > { %p2281_p11 = pnand %p2280_p8, %p2274_p3 }
  0xa7   : > { %2284 = shalt.err (!%p2281_p11)
}
  0xa8   : > { %2001 = dma.hbm_to_vmem [thread:$0]  (!%p2590_p12), %s2982_s8, 16, %s497_s19, [#allocation11]  }
  0xa9   : > { %s2285_s30 = scalar_lea.hbm %s2985_s11, 16 }
  0xaa   : > { %p2286_p13 = scmp.ne.s32.totalorder %s2985_s11, %s2285_s30  ;;  %p2292_p5 = scmp.lt.u32.totalorder %s2285_s30, %s2985_s11 }
  0xac   : > { %p2288_p1 = pnand %p2286_p13, %p2606_p0 }
  0xae   : > { %p2289_p6 = pneg %p2288_p1 }
  0xb0   : > { %p2294_p9 = pnand %p2292_p5, %p2289_p6 }
  0xb2   : > { %2297 = shalt.err (!%p2294_p9)
}
  0xb3   : > { %s2298_s22 = scalar_lea.vmem %s522_s24, 16  ;;  %s2305_s19 = scalar_lea.vmem %s522_s24, 32 }
  0xb4   : > { %p2299_p10 = scmp.ne.s32.totalorder %s522_s24, %s2298_s22  ;;  %p2306_p4 = scmp.lt.s32.totalorder %s522_s24, %s522_s24 }
  0xb5   : > { %p2307_p7 = scmp.lt.s32.totalorder %s2305_s19, %s2298_s22 }
  0xb6   : > { %p2301_p2 = pnand %p2299_p10, %p2606_p0 }
  0xb7   : > { %p2308_p8 = por %p2307_p7, %p2306_p4 }
  0xb8   : > { %p2302_p3 = pneg %p2301_p2 }
  0xba   : > { %p2309_p11 = pnand %p2308_p8, %p2302_p3 }
  0xbc   : > { %2312 = shalt.err (!%p2309_p11)
}
  0xbd   : > { %2007 = dma.hbm_to_vmem [thread:$0]  (!%p2590_p12), %s2985_s11, 16, %s522_s24, [#allocation14]  }
  0xbe   : > { %s2434_s0 = smov [#allocation16]   ;;  %s2313_s16 = scalar_lea.hbm %s2986_s12, 16 }
  0xbf   : > { %s532_s23 = sshll.u32 %s2434_s0, 4  ;;  %p2314_p13 = scmp.ne.s32.totalorder %s2986_s12, %s2313_s16  ;;  %s533_s23 = int_to_ptr.vmem [resolvable:$true] %s532_s23 }
  0xc0   : > { %p2320_p5 = scmp.lt.u32.totalorder %s2313_s16, %s2986_s12 }
  0xc1   : > { %p2316_p1 = pnand %p2314_p13, %p2606_p0 }
  0xc3   : > { %p2317_p6 = pneg %p2316_p1 }
  0xc5   : > { %p2322_p9 = pnand %p2320_p5, %p2317_p6 }
  0xc7   : > { %2325 = shalt.err (!%p2322_p9)
}
  0xc8   : > { %s2326_s24 = scalar_lea.vmem %s533_s23, 16  ;;  %s2333_s19 = scalar_lea.vmem %s533_s23, 32 }
  0xc9   : > { %p2327_p10 = scmp.ne.s32.totalorder %s533_s23, %s2326_s24  ;;  %p2334_p4 = scmp.lt.s32.totalorder %s533_s23, %s533_s23 }
  0xca   : > { %p2335_p7 = scmp.lt.s32.totalorder %s2333_s19, %s2326_s24 }
  0xcb   : > { %p2329_p2 = pnand %p2327_p10, %p2606_p0 }
  0xcc   : > { %p2336_p8 = por %p2335_p7, %p2334_p4 }
  0xcd   : > { %p2330_p3 = pneg %p2329_p2 }
  0xcf   : > { %p2337_p11 = pnand %p2336_p8, %p2330_p3 }
  0xd1   : > { %2340 = shalt.err (!%p2337_p11)
}
  0xd2   : > { %2010 = dma.hbm_to_vmem [thread:$0]  (!%p2590_p12), %s2986_s12, 16, %s533_s23, [#allocation17]  }
  0xd3   : > { %p3022_p13 = scmp.ne.s32.totalorder %s3018_s21, 0 }
  0xd4   : > { %p3023_p1 = scmp.eq.s32.totalorder (!%p3022_p13), %s2554_s28, 0 }
  0xd5   : > { %564 = sbr.rel (%p3022_p13) target bundleno = 2743 (0xab7), region = 88 }
  0xdc   : > { %2386 = dma.done.wait (%p3023_p1), [#allocation5], 16   ;;  %p3024_p0 = pmov %p3023_p1 }
  0xde   : > { %2388 = vsyncadd (%p3024_p0), [#allocation5], 4294967280  ;;  %p3025_p6 = pmov %p3024_p0 }
  0xdf   : > { %p3026_p5 = pmov %p3024_p0 }
  0xe0   : > { %2390 = dma.done.wait (%p3025_p6), [#allocation8], 32  }
  0xe1   : > { %2392 = vsyncadd (%p3026_p5), [#allocation8], 4294967264  ;;  %p3027_p9 = pmov %p3024_p0 }
  0xe2   : > { %p3028_p12 = pmov %p3024_p0 }
  0xe3   : > { %2394 = dma.done.wait (%p3027_p9), [#allocation11], 272  }
  0xe4   : > { %2396 = vsyncadd (%p3028_p12), [#allocation11], 4294967024  ;;  %p3029_p10 = pmov %p3024_p0 }
  0xe5   : > { %p3030_p2 = pmov %p3024_p0 }
  0xe6   : > { %2398 = dma.done.wait (%p3029_p10), [#allocation14], 32  }
  0xe7   : > { %2400 = vsyncadd (%p3030_p2), [#allocation14], 4294967264  ;;  %p3031_p3 = pmov %p3024_p0 }
  0xe8   : > { %p3032_p4 = pmov %p3024_p0 }
  0xe9   : > { %2402 = dma.done.wait (%p3031_p3), [#allocation17], 16  }
  0xea   : > { %2404 = vsyncadd (%p3032_p4), [#allocation17], 4294967280  ;;  %p643_p7 = scmp.lt.s32.totalorder %s2554_s28, 1  ;;  %s3033_s23 = sld [smem:[#allocation32_spill]]  ;;  %vm651_vm0 = vcmask 261120   ;;  %v2081_v7 = vld [vmem:[%s2977_s3] sm:$0xff]  }
  0xeb   : > { %v2082_v8 = vld [vmem:[%s2979_s5] sm:$0xff]   ;;  %v2435_v9 = vmov 0.0   ;;  %v2083_v10 = vld [vmem:[%s2977_s3 + $0x8] sm:$0xff]   ;;  %vm2436_vm1 = vmmov 0   ;;  %v2085_v21 = vld [vmem:[#allocation10] sm:$0xff]   ;;  %vm876_vm2 = vcmask 64512  }
  0xec   : > { %s644_s21 = scalar_select %p643_p7, %s2554_s28, 1  ;;  %1852 = vmatprep.subr.bf16.mxu0 %v2435_v9  ;;  %1860 = vmatprep.subr.bf16.mxu1 %v2435_v9  ;;  %v2084_v11 = vld [vmem:[%s2979_s5 + $0x8] sm:$0xff]   ;;  %v2086_v23 = vld [vmem:[#allocation10 + $0x8] sm:$0xff]   ;;  %v1779_v24 = vld [vmem:[#allocation9] ss:$0 sm:$0xff]  ;;  %vm936_vm3 = vcmask 1043456  }
  0xed   : > { %1853 = vmatpush3.bf16.msra.mxu0 %v2081_v7  ;;  %1861 = vmatpush3.bf16.msra.mxu1 %v2082_v8  ;;  %v1774_v18 = vld [vmem:[#allocation4] ss:$0 sm:$0xff]  ;;  %v1775_v25 = vld [vmem:[#allocation7] ss:$0 sm:$0xff]  ;;  %s2438_s29 = smov 120   ;;  %s2439_s0 = smov 104  }
  0xee   : > { %s1772_s18 = sshll.u32 %s644_s21, 3  ;;  %1854 = vmatprep.subr.bf16.mxu0 %v2435_v9  ;;  %1862 = vmatprep.subr.bf16.mxu1 %v2435_v9  ;;  %s3034_s21 = sld [smem:[#allocation33_spill]]  ;;  %v1783_v38 = vld [vmem:[#allocation12] ss:$0 sm:$0xff]  ;;  %vm1104_vm4 = vcmask 125952   ;;  %vm1340_vm5 = vcmask 257152  }
  0xef   : > { %1856 = vmatprep.mubr.msk.bf16.mxu0 %vm2436_vm1, %v2435_v9  ;;  %1864 = vmatprep.mubr.msk.bf16.mxu1 %vm2436_vm1, %v2435_v9  ;;  %s2441_s20 = smov 16   ;;  %vm1553_vm6 = vcmask 523264   ;;  %s640_s26 = sand.u32 1, %s2415_s25  }
  0xf0   : > { %s646_s27 = scalar_lea.vmem %s3033_s23, %s1772_s18  ;;  %s2437_s18 = smov 112  }
  0xf1   : > { %v2781_v0 = vld [vmem:[%s646_s27] sm:$0xff]  ;;  %1855 = vmatpush3.bf16.msra.mxu0 %v2083_v10  ;;  %1863 = vmatpush3.bf16.msra.mxu1 %v2084_v11  ;;  %s2440_s23 = smov 8   ;;  %s3035_s24 = sld [smem:[#allocation35_spill]] }
  0xf2   : > { %v652_v1 = vsel %vm651_vm0, %v2781_v0, 0.0  ;;  %1868 = vmatprep.subr.bf16.mxu0 %v2435_v9  ;;  %1876 = vmatprep.subr.bf16.mxu1 %v2435_v9  ;;  %s3036_s19 = sld [smem:[#allocation30_spill]]  ;;  %s1813_s4 = sshll.u32 %s2554_s28, 7 }
  0xf3   : > { %653 = vadd.xlane.f32.xlu0 %v652_v1  ;;  %s1600_s28 = scalar_lea.sflag [#allocation6], %s640_s26  ;;  %s2442_s30 = smov [#allocation18]  }
  0xf4   : > { %v1773_v16 = vld [vmem:[%s3034_s21] ss:$0 sm:$0xff]  ;;  %s2345_s16 = sshll.u32 %s2442_s30, 4  ;;  %s2346_s16 = int_to_ptr.vmem [resolvable:$false] %s2345_s16 }
  0xf8   : > { %p3038_p11 = scmp.ne.s32.totalorder %s3036_s19, 0 }
 0x180   : > { %v654_v2 = vpop.xlane.xlu0 %653 }
 0x181   : > { %v656_v3 = vmul.f32 0.03125, %v654_v2 }
 0x183   : > { %v657_v4 = vsub.f32 %v2781_v0, %v656_v3 }
 0x185   : > { %v658_v5 = vmul.f32 %v657_v4, %v657_v4 }
 0x187   : > { %v659_v6 = vsel %vm651_vm0, %v658_v5, 0.0 }
 0x188   : > { %660 = vadd.xlane.f32.xlu0 %v659_v6 }
 0x215   : > { %v661_v12 = vpop.xlane.xlu0 %660 }
 0x216   : > { %v662_v13 = vmul.f32 0.03125, %v661_v12 }
 0x218   : > { %v663_v14 = vadd.f32 1e-05, %v662_v13 }
 0x21a   : > { %2095 = vrsqrt.f32 %v663_v14 }
 0x224   : > { %v2096_v15 = vpop.eup %2095 }
 0x225   : > { %v665_v17 = vmul.f32 %v2096_v15, %v657_v4 }
 0x227   : > { %v672_v19 = vmul.f32 %v1773_v16, %v665_v17 }
 0x229   : > { %v679_v20 = vadd.f32 %v1774_v18, %v672_v19 }
 0x22b   : > { %v680_v22 = vpack.c.bf16 %v679_v20, %v679_v20 }
 0x22d   : > { %1857 = vmatmul.mubr.msk.bf16.vlgmr.msra.gmra.mrb[0].mxu0 %vm651_vm0, %v680_v22  ;;  %1865 = vmatmul.mubr.msk.bf16.vlgmr.msra.gmra.mrb[0].mxu1 %vm651_vm0, %v680_v22 }
 0x22e   : > { %1869 = vmatpush3.bf16.msra.mxu0 %v2085_v21  ;;  %1872 = vmatprep.mubr.msk.bf16.mxu0 %vm2436_vm1, %v2435_v9 }
 0x22f   : > { %1870 = vmatprep.subr.bf16.mxu0 %v2435_v9  ;;  %1878 = vmatprep.mubr.msk.bf16.mxu1 %vm2436_vm1, %v2435_v9 }
 0x232   : > { %1871 = vmatpush3.bf16.msra.mxu0 %v2086_v23 }
 0x233   : > { %1882 = vmatprep.subr.bf16.mxu0 %v2435_v9 }
 0x235   : > { %1873 = vmatmul.mubr.msk.bf16.vlgmr.msra.gmra.mrb[4].mxu0 %vm651_vm0, %v680_v22 }
 0x236   : > { %1884 = vmatprep.mubr.msk.bf16.mxu0 %vm2436_vm1, %v2435_v9 }
 0x300   : > { %v741_v26 = vpop.f32.mrb[0].mxu0  ;;  %v805_v27 = vpop.f32.mrb[0].mxu1 }
 0x301   : > { %v806_v28 = vadd.f32 %v1779_v24, %v805_v27  ;;  %v1858_v29 = vpop.f32.mrb[1].mxu0  ;;  %v1866_v30 = vpop.f32.mrb[1].mxu1  ;;  %v742_v33 = vadd.f32 %v1775_v25, %v741_v26 }
 0x302   : > { %v744_v31 = vpop.f32.mrb[2].mxu0  ;;  %v808_v32 = vpop.f32.mrb[2].mxu1 }
 0x303   : > { %v811_v34 = vpack.c.bf16 %v806_v28, %v806_v28  ;;  %v1859_v35 = vpop.f32.mrb[3].mxu0  ;;  %v1867_v36 = vpop.f32.mrb[3].mxu1  ;;  %v747_v39 = vpack.c.bf16 %v742_v33, %v742_v33 }
 0x305   : > { %1108 = vrot.lane.b32.xlu0 %v811_v34, %s2437_s18  ;;  %987 = vrot.lane.b32.xlu1 %v811_v34, %s2438_s29  ;;  %v881_v37 = vsel %vm876_vm2, %v811_v34, 0 }
 0x306   : > { %1877 = vmatpush3.bf16.xpose.msra.mxu1 %v881_v37 }
 0x307   : > { %1888 = vmatprep.subr.bf16.mxu1 %v2435_v9 }
 0x308   : > { %v869_v40 = vpop.f32.mrb[4].mxu0 }
 0x309   : > { %v870_v41 = vadd.f32 %v1783_v38, %v869_v40  ;;  %984 = vrot.lane.b32.xlu1 %v747_v39, %s2438_s29  ;;  %v1874_v42 = vpop.f32.mrb[5].mxu0 }
 0x30a   : > { %v872_v43 = vpop.f32.mrb[6].mxu0 }
 0x30b   : > { %v875_v44 = vpack.c.bf16 %v870_v41, %v870_v41  ;;  %v1875_v45 = vpop.f32.mrb[7].mxu0 }
 0x30d   : > { %1106 = vrot.lane.b32.xlu1 %v747_v39, %s2437_s18  ;;  %1879 = vmatmul.mubr.msk.bf16.vlgmr.msra.gmra.mrb[4].mxu1 %vm876_vm2, %v747_v39  ;;  %v938_v46 = vsel %vm936_vm3, %v875_v44, 0 }
 0x30e   : > { %1883 = vmatpush3.bf16.msra.mxu0 %v938_v46  ;;  %1890 = vmatprep.mubr.msk.bf16.mxu1 %vm2436_vm1, %v2435_v9 }
 0x30f   : > { %1894 = vmatprep.subr.bf16.mxu0 %v2435_v9 }
 0x311   : > { %1219 = vrot.lane.b32.xlu1 %v811_v34, %s2439_s0 }
 0x315   : > { %1217 = vrot.lane.b32.xlu1 %v747_v39, %s2439_s0 }
 0x377   : > { %v988_v47 = vpop.permute.xlu1 %987  ;;  %v1109_v50 = vpop.permute.xlu0 %1108 }
 0x378   : > { %v993_v48 = vsel %vm876_vm2, %v988_v47, 0  ;;  %v1114_v52 = vsel %vm876_vm2, %v1109_v50, 0 }
 0x379   : > { %1889 = vmatpush3.bf16.xpose.msra.mxu1 %v993_v48 }
 0x37a   : > { %1900 = vmatprep.subr.bf16.mxu1 %v2435_v9 }
 0x37b   : > { %v985_v49 = vpop.permute.xlu1 %984 }
 0x37f   : > { %v1107_v51 = vpop.permute.xlu1 %1106 }
 0x380   : > { %1891 = vmatmul.mubr.msk.bf16.vlgmr.msra.gmra.mrb[8].mxu1 %vm876_vm2, %v985_v49 }
 0x381   : > { %1901 = vmatpush3.bf16.xpose.msra.mxu1 %v1114_v52  ;;  %1902 = vmatprep.mubr.msk.bf16.mxu1 %vm2436_vm1, %v2435_v9 }
 0x382   : > { %1912 = vmatprep.subr.bf16.mxu1 %v2435_v9 }
 0x383   : > { %v1220_v53 = vpop.permute.xlu1 %1219 }
 0x384   : > { %v1225_v54 = vsel %vm876_vm2, %v1220_v53, 0 }
 0x387   : > { %v1218_v55 = vpop.permute.xlu1 %1217 }
 0x388   : > { %1903 = vmatmul.mubr.msk.bf16.vlgmr.msra.gmra.mrb[12].mxu1 %vm876_vm2, %v1107_v51 }
 0x389   : > { %1913 = vmatpush3.bf16.xpose.msra.mxu1 %v1225_v54  ;;  %1914 = vmatprep.mubr.msk.bf16.mxu1 %vm2436_vm1, %v2435_v9 }
 0x38a   : > { %1924 = vmatprep.subr.bf16.mxu1 %v2435_v9 }
 0x390   : > { %1915 = vmatmul.mubr.msk.bf16.vlgmr.msra.gmra.mrb[16].mxu1 %vm876_vm2, %v1218_v55 }
 0x391   : > { %1928 = vmatprep.mubr.msk.bf16.mxu1 %vm2436_vm1, %v2435_v9 }
 0x3e0   : > { %v917_v56 = vpop.f32.mrb[4].mxu1 }
 0x3e1   : > { %v1880_v57 = vpop.f32.mrb[5].mxu1  ;;  %v923_v58 = vsel %vm876_vm2, %v917_v56, -inf }
 0x3e2   : > { %924 = vmax.xlane.f32.xlu1 %v923_v58  ;;  %v920_v59 = vpop.f32.mrb[6].mxu1 }
 0x3e3   : > { %v1881_v60 = vpop.f32.mrb[7].mxu1 }
 0x3f3   : > { %1166 = vrot.lane.b32.xlu1 %v875_v44, %s2437_s18 }
 0x453   : > { %v1029_v61 = vpop.f32.mrb[8].mxu1 }
 0x454   : > { %v1892_v62 = vpop.f32.mrb[9].mxu1  ;;  %v1035_v63 = vsel %vm876_vm2, %v1029_v61, -inf }
 0x455   : > { %1036 = vmax.xlane.f32.xlu0 %v1035_v63  ;;  %v1032_v1 = vpop.f32.mrb[10].mxu1 }
 0x456   : > { %v1893_v2 = vpop.f32.mrb[11].mxu1 }
 0x45b   : > { %v1150_v3 = vpop.f32.mrb[12].mxu1 }
 0x45c   : > { %v1904_v4 = vpop.f32.mrb[13].mxu1  ;;  %v1156_v5 = vsel %vm876_vm2, %v1150_v3, -inf }
 0x45d   : > { %v1153_v6 = vpop.f32.mrb[14].mxu1  ;;  %1157 = vmax.xlane.f32.xlu1 %v1156_v5 }
 0x45e   : > { %v1905_v7 = vpop.f32.mrb[15].mxu1 }
 0x463   : > { %v1261_v8 = vpop.f32.mrb[16].mxu1 }
 0x464   : > { %v1916_v10 = vpop.f32.mrb[17].mxu1  ;;  %v1267_v11 = vsel %vm876_vm2, %v1261_v8, -inf }
 0x465   : > { %v1264_v12 = vpop.f32.mrb[18].mxu1  ;;  %1268 = vmax.xlane.f32.xlu1 %v1267_v11 }
 0x466   : > { %v1917_v13 = vpop.f32.mrb[19].mxu1 }
 0x467   : > { %v2087_v13 = vld [vmem:[%s2983_s9] sm:$0xff]  }
 0x468   : > { %1925 = vmatpush3.bf16.msra.mxu1 %v2087_v13 }
 0x469   : > { %1926 = vmatprep.subr.bf16.mxu1 %v2435_v9 }
 0x46b   : > { %1046 = vrot.lane.b32.xlu0 %v875_v44, %s2438_s29 }
 0x46f   : > { %v925_v14 = vpop.xlane.xlu1 %924 }
 0x470   : > { %v926_v15 = vsub.f32 %v917_v56, %v925_v14  ;;  %v2088_v14 = vld [vmem:[%s2983_s9 + $0x8] sm:$0xff]  }
 0x471   : > { %1927 = vmatpush3.bf16.msra.mxu1 %v2088_v14 }
 0x472   : > { %v927_v16 = vmul.f32 1.442695, %v926_v15  ;;  %1940 = vmatprep.subr.bf16.mxu1 %v2435_v9 }
 0x473   : > { %v1167_v22 = vpop.permute.xlu1 %1166 }
 0x474   : > { %2097 = vpow2.f32 %v927_v16  ;;  %v1172_v32 = vsel %vm936_vm3, %v1167_v22, 0 }
 0x476   : > { %1277 = vrot.lane.b32.xlu1 %v875_v44, %s2439_s0  ;;  %s3037_s0 = sld [smem:[#allocation36_spill]] }
 0x47e   : > { %v2098_v17 = vpop.eup %2097 }
 0x47f   : > { %v932_v18 = vpack.c.bf16 %v2098_v17, %v2098_v17  ;;  %v929_v39 = vsel %vm876_vm2, %v2098_v17, 0.0 }
 0x481   : > { %1885 = vmatmul.mubr.msk.bf16.vlgmr.msra.gmra.mrb[8].mxu0 %vm876_vm2, %v932_v18 }
 0x482   : > { %1896 = vmatprep.mubr.msk.bf16.mxu0 %vm2436_vm1, %v2435_v9 }
 0x4e2   : > { %v1037_v19 = vpop.xlane.xlu0 %1036 }
 0x4e3   : > { %v1038_v20 = vsub.f32 %v1029_v61, %v1037_v19 }
 0x4e5   : > { %v1039_v21 = vmul.f32 1.442695, %v1038_v20 }
 0x4e6   : > { %v1047_v23 = vpop.permute.xlu0 %1046 }
 0x4e7   : > { %2099 = vpow2.f32 %v1039_v21  ;;  %v1052_v24 = vsel %vm936_vm3, %v1047_v23, 0  ;;  %v1796_v23 = vld [vmem:[#allocation13] ss:$0 sm:$0xff] }
 0x4e8   : > { %1895 = vmatpush3.bf16.msra.mxu0 %v1052_v24 }
 0x4e9   : > { %1906 = vmatprep.subr.bf16.mxu0 %v2435_v9 }
 0x4ea   : > { %v1158_v25 = vpop.xlane.xlu1 %1157 }
 0x4eb   : > { %v1159_v26 = vsub.f32 %v1150_v3, %v1158_v25 }
 0x4ed   : > { %v1160_v27 = vmul.f32 1.442695, %v1159_v26 }
 0x4ef   : > { %2101 = vpow2.f32 %v1160_v27 }
 0x4f1   : > { %v2100_v28 = vpop.eup %2099 }
 0x4f2   : > { %v1269_v29 = vpop.xlane.xlu1 %1268  ;;  %v1044_v30 = vpack.c.bf16 %v2100_v28, %v2100_v28  ;;  %v1041_v43 = vsel %vm876_vm2, %v2100_v28, 0.0 }
 0x4f3   : > { %v1270_v31 = vsub.f32 %v1261_v8, %v1269_v29 }
 0x4f4   : > { %1897 = vmatmul.mubr.msk.bf16.vlgmr.msra.gmra.mrb[12].mxu0 %vm876_vm2, %v1044_v30 }
 0x4f5   : > { %v1271_v33 = vmul.f32 1.442695, %v1270_v31  ;;  %1907 = vmatpush3.bf16.msra.mxu0 %v1172_v32  ;;  %1908 = vmatprep.mubr.msk.bf16.mxu0 %vm2436_vm1, %v2435_v9 }
 0x4f6   : > { %1918 = vmatprep.subr.bf16.mxu0 %v2435_v9  ;;  %v1278_v35 = vpop.permute.xlu1 %1277 }
 0x4f7   : > { %2103 = vpow2.f32 %v1271_v33  ;;  %v1283_v38 = vsel %vm936_vm3, %v1278_v35, 0 }
 0x4f9   : > { %v2102_v34 = vpop.eup %2101 }
 0x4fa   : > { %v1162_v36 = vsel %vm876_vm2, %v2102_v34, 0.0  ;;  %v1165_v37 = vpack.c.bf16 %v2102_v34, %v2102_v34 }
 0x4fb   : > { %1163 = vadd.xlane.f32.xlu1 %v1162_v36 }
 0x4fc   : > { %1909 = vmatmul.mubr.msk.bf16.vlgmr.msra.gmra.mrb[16].mxu0 %vm876_vm2, %v1165_v37  ;;  %v2089_v37 = vld [vmem:[%s2987_s13] sm:$0xff]  }
 0x4fd   : > { %1919 = vmatpush3.bf16.msra.mxu0 %v1283_v38  ;;  %1920 = vmatprep.mubr.msk.bf16.mxu0 %vm2436_vm1, %v2435_v9 }
 0x4fe   : > { %1932 = vmatprep.subr.bf16.mxu0 %v2435_v9 }
 0x4ff   : > { %930 = vadd.xlane.f32.xlu1 %v929_v39 }
 0x501   : > { %v2104_v40 = vpop.eup %2103 }
 0x502   : > { %v1273_v41 = vsel %vm876_vm2, %v2104_v40, 0.0  ;;  %v1276_v42 = vpack.c.bf16 %v2104_v40, %v2104_v40 }
 0x503   : > { %1274 = vadd.xlane.f32.xlu0 %v1273_v41 }
 0x504   : > { %1921 = vmatmul.mubr.msk.bf16.vlgmr.msra.gmra.mrb[20].mxu0 %vm876_vm2, %v1276_v42  ;;  %v1800_v42 = vld [vmem:[#allocation15] ss:$0 sm:$0xff] }
 0x505   : > { %1936 = vmatprep.mubr.msk.bf16.mxu0 %vm2436_vm1, %v2435_v9  ;;  %1933 = vmatpush3.bf16.msra.mxu0 %v2089_v37 }
 0x506   : > { %1934 = vmatprep.subr.bf16.mxu0 %v2435_v9 }
 0x507   : > { %1042 = vadd.xlane.f32.xlu0 %v1041_v43 }
 0x554   : > { %v974_v44 = vpop.f32.mrb[8].mxu0 }
 0x555   : > { %v1886_v45 = vpop.f32.mrb[9].mxu0 }
 0x556   : > { %v977_v46 = vpop.f32.mrb[10].mxu0 }
 0x557   : > { %v1887_v47 = vpop.f32.mrb[11].mxu0 }
 0x588   : > { %v1164_v5 = vpop.xlane.xlu1 %1163 }
 0x58c   : > { %v931_v6 = vpop.xlane.xlu1 %930 }
 0x590   : > { %v1275_v48 = vpop.xlane.xlu0 %1274 }
 0x594   : > { %v1043_v49 = vpop.xlane.xlu0 %1042 }
 0x595   : > { %2105 = vrcp.f32 %v1043_v49  ;;  %v2092_v49 = vld [vmem:[%s2989_s15 + $0x8] sm:$0xff]  }
 0x596   : > { %2107 = vrcp.f32 %v1275_v48  ;;  %v2091_v48 = vld [vmem:[%s2989_s15] sm:$0xff]  }
 0x597   : > { %2109 = vrcp.f32 %v931_v6 }
 0x598   : > { %2111 = vrcp.f32 %v1164_v5 }
 0x59f   : > { %v2106_v50 = vpop.eup %2105 }
 0x5a0   : > { %v2108_v61 = vpop.eup %2107 }
 0x5a1   : > { %v2110_v7 = vpop.eup %2109 }
 0x5a2   : > { %v981_v8 = vmul.f32 %v2110_v7, %v974_v44  ;;  %v2112_v15 = vpop.eup %2111  ;;  %v1801_v44 = vld [vmem:[#allocation16] ss:$0 sm:$0xff] }
 0x5a4   : > { %v982_v10 = vpack.c.bf16 %v981_v8, %v981_v8 }
 0x5c7   : > { %v1088_v51 = vpop.f32.mrb[12].mxu0 }
 0x5c8   : > { %v1095_v52 = vmul.f32 %v2106_v50, %v1088_v51  ;;  %v1898_v53 = vpop.f32.mrb[13].mxu0  ;;  %v2093_v50 = vld [vmem:[%s2989_s15 + $0x10] sm:$0xff]   ;;  %v2094_v51 = vld [vmem:[%s2989_s15 + $0x18] sm:$0xff]  }
 0x5c9   : > { %v1091_v54 = vpop.f32.mrb[14].mxu0 }
 0x5ca   : > { %v1096_v55 = vpack.c.bf16 %v1095_v52, %v1095_v52  ;;  %v1899_v56 = vpop.f32.mrb[15].mxu0  ;;  %v1802_v52 = vld [vmem:[%s2988_s14] ss:$0 sm:$0xff] }
 0x5cc   : > { %1098 = vrot.lane.b32.xlu1 %v1096_v55, %s2440_s23 }
 0x5cf   : > { %v1208_v57 = vpop.f32.mrb[16].mxu0 }
 0x5d0   : > { %v1910_v58 = vpop.f32.mrb[17].mxu0  ;;  %v1215_v16 = vmul.f32 %v2112_v15, %v1208_v57 }
 0x5d1   : > { %v1211_v59 = vpop.f32.mrb[18].mxu0 }
 0x5d2   : > { %v1911_v60 = vpop.f32.mrb[19].mxu0  ;;  %v1216_v17 = vpack.c.bf16 %v1215_v16, %v1215_v16 }
 0x5d7   : > { %v1319_v62 = vpop.f32.mrb[20].mxu0 }
 0x5d8   : > { %v1326_v63 = vmul.f32 %v2108_v61, %v1319_v62  ;;  %v1922_v1 = vpop.f32.mrb[21].mxu0 }
 0x5d9   : > { %v1322_v2 = vpop.f32.mrb[22].mxu0 }
 0x5da   : > { %v1327_v3 = vpack.c.bf16 %v1326_v63, %v1326_v63  ;;  %v1923_v4 = vpop.f32.mrb[23].mxu0  ;;  %v1806_v63 = vld [vmem:[%s3035_s24] ss:$0 sm:$0xff] }
 0x5dc   : > { %1329 = vrot.lane.b32.xlu0 %v1327_v3, %s2440_s23  ;;  %s2931_s23 = scalar_lea.hbm %s3037_s0, %s1813_s4 }
 0x63e   : > { %v1099_v11 = vpop.permute.xlu1 %1098 }
 0x63f   : > { %v1102_v12 = vsel %vm876_vm2, %v982_v10, %v1099_v11 }
 0x640   : > { %1105 = vst.msk [vmem:[#allocation2] sm:$0xf] %vm1104_vm4, %v1102_v12 }
 0x64e   : > { %v1330_v18 = vpop.permute.xlu0 %1329 }
 0x64f   : > { %v1333_v19 = vsel %vm876_vm2, %v1216_v17, %v1330_v18 }
 0x650   : > { %v1795_v20 = vcombine.low %v1333_v19, %v1333_v19 }
 0x652   : > { %1337 = vrot.lane.b32.xlu0 %v1795_v20, %s2441_s20  ;;  %s1771_s20 = sshll.u32 %s640_s26, 3 }
 0x653   : > { %s642_s17 = scalar_lea.vmem [#allocation18], %s1771_s20  ;;  %s2347_s20 = scalar_lea.vmem %s2346_s16, 256 }
 0x654   : > { %s1613_s21 = sshll.u32 %s642_s17, 4  ;;  %s2933_s21 = int_to_ptr.vmem [resolvable:$true] %s1613_s21 }
 0x655   : > { %s2341_s27 = scalar_lea.vmem %s2933_s21, 128  ;;  %p2348_p0 = scmp.lt.s32.totalorder %s2933_s21, %s2346_s16 }
 0x656   : > { %p2342_p8 = scmp.ne.s32.totalorder %s2933_s21, %s2341_s27  ;;  %p2349_p6 = scmp.lt.s32.totalorder %s2347_s20, %s2341_s27 }
 0x658   : > { %p2343_p13 = pnand %p2342_p8, %p3038_p11  ;;  %p2350_p5 = por %p2349_p6, %p2348_p0 }
 0x65a   : > { %p2344_p1 = pneg %p2343_p13 }
 0x65c   : > { %p2351_p9 = pnand %p2350_p5, %p2344_p1 }
 0x6c4   : > { %v1338_v21 = vpop.permute.xlu0 %1337 }
 0x6c5   : > { %1341 = vst.msk [vmem:[#allocation2] sm:$0xf] %vm1340_vm5, %v1338_v21 }
 0x6cc   : > { %v1342_v22 = vld [vmem:[#allocation2] sm:$0xf] }
 0x6cd   : > { %1929 = vmatmul.mubr.msk.bf16.vlgmr.msra.gmra.mrb[20].mxu1 %vm651_vm0, %v1342_v22 }
 0x6ce   : > { %1948 = vmatprep.mubr.msk.bf16.mxu1 %vm2436_vm1, %v2435_v9  ;;  %1941 = vmatpush3.bf16.msra.mxu1 %v2091_v48 }
 0x6cf   : > { %1942 = vmatprep.subr.bf16.mxu1 %v2435_v9 }
 0x6d2   : > { %1943 = vmatpush3.bf16.msra.mxu1 %v2092_v49 }
 0x6d3   : > { %1944 = vmatprep.subr.bf16.mxu1 %v2435_v9 }
 0x6d6   : > { %1945 = vmatpush3.bf16.msra.mxu1 %v2093_v50 }
 0x6d7   : > { %1946 = vmatprep.subr.bf16.mxu1 %v2435_v9 }
 0x6da   : > { %1947 = vmatpush3.bf16.msra.mxu1 %v2094_v51 }
 0x7a0   : > { %v1403_v24 = vpop.f32.mrb[20].mxu1 }
 0x7a1   : > { %v1404_v25 = vadd.f32 %v1796_v23, %v1403_v24  ;;  %v1930_v26 = vpop.f32.mrb[21].mxu1 }
 0x7a2   : > { %v1406_v27 = vpop.f32.mrb[22].mxu1 }
 0x7a3   : > { %v1409_v28 = vadd.f32 %v1404_v25, %v2781_v0  ;;  %v1931_v29 = vpop.f32.mrb[23].mxu1  ;;  %v2090_v0 = vld [vmem:[%s2987_s13 + $0x8] sm:$0xff]  }
 0x7a4   : > { %1935 = vmatpush3.bf16.msra.mxu0 %v2090_v0 }
 0x7a5   : > { %1410 = vst.msk [vmem:[#allocation3] sm:$0xff] %vm651_vm0, %v1409_v28 }
 0x7ac   : > { %v1415_v30 = vld [vmem:[#allocation3] sm:$0xff] }
 0x7ad   : > { %v1416_v31 = vsel %vm651_vm0, %v1415_v30, 0.0 }
 0x7ae   : > { %1417 = vadd.xlane.f32.xlu1 %v1416_v31 }
 0x83b   : > { %v1418_v32 = vpop.xlane.xlu1 %1417 }
 0x83c   : > { %v1419_v33 = vmul.f32 0.03125, %v1418_v32 }
 0x83e   : > { %v1420_v34 = vsub.f32 %v1415_v30, %v1419_v33 }
 0x840   : > { %v1421_v35 = vmul.f32 %v1420_v34, %v1420_v34 }
 0x842   : > { %v1422_v36 = vsel %vm651_vm0, %v1421_v35, 0.0 }
 0x843   : > { %1423 = vadd.xlane.f32.xlu0 %v1422_v36 }
 0x8d0   : > { %v1424_v38 = vpop.xlane.xlu0 %1423 }
 0x8d1   : > { %v1425_v39 = vmul.f32 0.03125, %v1424_v38 }
 0x8d3   : > { %v1426_v40 = vadd.f32 1e-05, %v1425_v39 }
 0x8d5   : > { %2113 = vrsqrt.f32 %v1426_v40 }
 0x8df   : > { %v2114_v41 = vpop.eup %2113 }
 0x8e0   : > { %v1428_v43 = vmul.f32 %v2114_v41, %v1420_v34 }
 0x8e2   : > { %v1435_v45 = vmul.f32 %v1800_v42, %v1428_v43 }
 0x8e4   : > { %v1442_v46 = vadd.f32 %v1801_v44, %v1435_v45 }
 0x8e6   : > { %v1443_v47 = vpack.c.bf16 %v1442_v46, %v1442_v46 }
 0x8e8   : > { %1937 = vmatmul.mubr.msk.bf16.vlgmr.msra.gmra.mrb[24].mxu0 %vm651_vm0, %v1443_v47 }
 0x9bb   : > { %v1503_v53 = vpop.f32.mrb[24].mxu0 }
 0x9bc   : > { %v1504_v54 = vadd.f32 %v1802_v52, %v1503_v53  ;;  %v1938_v55 = vpop.f32.mrb[25].mxu0 }
 0x9bd   : > { %v1506_v56 = vpop.f32.mrb[26].mxu0 }
 0x9be   : > { %v1510_v57 = vmul.f32 0.70710677, %v1504_v54  ;;  %v1939_v58 = vpop.f32.mrb[27].mxu0  ;;  %v1509_v9 = vmul.f32 0.5, %v1504_v54 }
 0x9c0   : > { %2115 = verf.f32 %v1510_v57 }
 0x9ca   : > { %v2116_v59 = vpop.eup %2115 }
 0x9cb   : > { %v1512_v60 = vadd.f32 1.0, %v2116_v59 }
 0x9cd   : > { %v1513_v61 = vmul.f32 %v1512_v60, %v1509_v9 }
 0x9cf   : > { %v1514_v62 = vpack.c.bf16 %v1513_v61, %v1513_v61 }
 0x9d1   : > { %1949 = vmatmul.mubr.msk.bf16.vlgmr.msra.gmra.mrb[24].mxu1 %vm1553_vm6, %v1514_v62 }
 0xaa4   : > { %v1591_v1 = vpop.f32.mrb[24].mxu1 }
 0xaa5   : > { %v1592_v2 = vadd.f32 %v1806_v63, %v1591_v1  ;;  %v1950_v3 = vpop.f32.mrb[25].mxu1 }
 0xaa6   : > { %v1594_v4 = vpop.f32.mrb[26].mxu1 }
 0xaa7   : > { %v1597_v5 = vadd.f32 %v1592_v2, %v1415_v30  ;;  %v1951_v6 = vpop.f32.mrb[27].mxu1 }
 0xaa9   : > { %1598 = vst.msk [vmem:[%s642_s17] sm:$0xff] %vm651_vm0, %v1597_v5 }
 0xaaa   : > { %2354 = shalt.err (!%p2351_p9)
}
 0xaab   : > { %s2355_s26 = scalar_lea.hbm %s2931_s23, 128  ;;  %s2359_s24 = scalar_lea.hbm %s3037_s0, 256 }
 0xaac   : > { %p2356_p12 = scmp.ne.s32.totalorder %s2931_s23, %s2355_s26  ;;  %p2360_p3 = scmp.lt.u32.totalorder %s2931_s23, %s3037_s0 }
 0xaad   : > { %p2361_p4 = scmp.lt.u32.totalorder %s2359_s24, %s2355_s26  ;;  %p2363_p8 = scmp.lt.u32.totalorder %s2355_s26, %s2931_s23 }
 0xaae   : > { %p2357_p10 = pnand %p2356_p12, %p3038_p11 }
 0xaaf   : > { %p2362_p7 = por %p2361_p4, %p2360_p3 }
 0xab0   : > { %p2358_p2 = pneg %p2357_p10 }
 0xab1   : > { %p2364_p13 = por %p2363_p8, %p2362_p7 }
 0xab3   : > { %p2365_p1 = pnand %p2364_p13, %p2358_p2 }
 0xab5   : > { %2368 = shalt.err (!%p2365_p1)
}
 0xab6   : > { %1984 = dma.vmem_to_hbm [thread:$0]  (%p3038_p11), %s2933_s21, 128, %s2931_s23, %s1600_s28  }
 0xab7 PF: > { %s3039_s18 = sld [smem:[#allocation27_spill]]  ;;  %s3040_s29 = sld [smem:[#allocation25_spill]] }
 0xab8   : > { %s3041_s27 = sld [smem:[#allocation31_spill]] }
 0xabd   : > { %p2031_p0 = scmp.ge.s32.totalorder %s3039_s18, 2  ;;  %s1625_s30 = sand.u32 1, %s3040_s29  }
 0xabe   : > { %p3042_p6 = scmp.ne.s32.totalorder %s3041_s27, 0  ;;  %s1626_s16 = scalar_lea.sflag [#allocation6], %s1625_s30 }
 0xac0   : > { %p2012_p5 = pnand %p2031_p0, %p3042_p6 }
 0xac2   : > { %2406 = dma.done.wait (!%p2012_p5), %s1626_s16, 128  }
 0xac3   : > { %2408 = vsyncadd (!%p2012_p5), %s1626_s16, 4294967168  ;;  %s3043_s27 = sld [smem:[#allocation28_spill]]  ;;  %s3044_s20 = sld [smem:[#allocation26_spill]] }
 0xac4   : > { %s3045_s26 = sld [smem:[#allocation29_spill]]  ;;  %s3046_s24 = smov %s2415_s25 }
 0xac9   : > { %p32_p9 = scmp.ge.s32.totalorder %s3043_s27, 4   ;;  %s3047_s25 = smov %s3044_s20 }
 0xacb   :  { %34 = sbr.rel (!%p32_p9) target bundleno = 14 (0xe), region = 156 }
 0xad2   :  { %1631 = vsyncpa [#allocation5], 1 }
 0xad3   :  { %1633 = vsyncpa [#allocation5 + $0x1], 1 }
 0xad4   :  { %1634 = vsyncpa [#allocation8], 1 }
 0xad5   :  { %1635 = vsyncpa [#allocation11], 1 }
 0xad6   :  { %1636 = vsyncpa [#allocation14], 1 }
 0xad7   :  { %1637 = vsyncpa [#allocation17], 1 }
 0xad8   :  { %1638 = vsyncpa [#allocation6], 1 }
 0xad9   :  { %1640 = vsyncpa [#allocation6 + $0x1], 1 }

</bundles_post_ra>
